<compile_context>
chip_gen: v7x
topology: tpu7x:2x2x1
jax: 0.10.0
libtpu: 0.0.40
codegen_flags: <defaults>
</compile_context>

<pallas_src>
import math
from functools import partial

import jax
import jax.numpy as jnp
from jax.experimental import pallas as pl
from jax.experimental.pallas import tpu as pltpu


_COMPUTE_DTYPE = jnp.bfloat16   # MXU operand dtype (accumulation stays f32)
_MASK_NEG = -1e30               # additive mask for cross-image attention


def _layernorm(x, gamma, beta, eps=1e-5):
    # matches torch.nn.LayerNorm (eps=1e-5); x: (R, D), gamma/beta: (1, D)
    mean = jnp.mean(x, axis=-1, keepdims=True)
    var = jnp.mean(jnp.square(x - mean), axis=-1, keepdims=True)
    return (x - mean) * jax.lax.rsqrt(var + eps) * gamma + beta


def _erf(x):
    # Abramowitz & Stegun 7.1.26, |error| <= 1.5e-7 -- exact-GELU fidelity with
    # only supported primitives (mul/add, exp, where).
    a1, a2, a3, a4, a5 = 0.254829592, -0.284496736, 1.421413741, -1.453152027, 1.061405429
    p = 0.3275911
    ax = jnp.abs(x)
    t = 1.0 / (1.0 + p * ax)
    poly = ((((a5 * t + a4) * t + a3) * t + a2) * t + a1) * t
    y = 1.0 - poly * jnp.exp(-(ax * ax))
    return jnp.where(x < 0.0, -y, y)


def _gelu_exact(x):
    return 0.5 * x * (1.0 + _erf(x * (1.0 / math.sqrt(2.0))))


# ------------------------------ Pallas kernel --------------------------------

def encoder_stack_kernel(patches_ref, poscb_ref, mask_ref, pw_ref,
                         g1_ref, be1_ref, g2_ref, be2_ref,
                         wqkv_ref, bqkv_ref, wo_ref, bo_ref,
                         w1_ref, bb1_ref, w2_ref, bb2_ref,
                         gf_ref, bf_ref,
                         o_ref,
                         xs_ref, qkv_ref, ao_ref,
                         *, heads, bs, seq):
    d = pl.program_id(1)               # depth (layer) index -- "arbitrary"
    n_layers = pl.num_programs(1)

    R, D = xs_ref.shape                # R = bs * seq (flattened batch tile)
    H = heads
    Dh = D // H
    scale = 1.0 / math.sqrt(Dh)
    cdt = _COMPUTE_DTYPE

    # ---- fused patch embedding + cls token + positional embedding (d == 0) ----
    @pl.when(d == 0)
    def _():
        emb = jnp.dot(patches_ref[...].astype(cdt), pw_ref[...],
                      preferred_element_type=jnp.float32)
        xs_ref[...] = emb + poscb_ref[...]     # poscb folds conv bias/cls/pos

    x = xs_ref[...]                                           # (R, D) f32

    # ---- multi-head self-attention: x + MHA(LN1(x)) ----
    xn = _layernorm(x, g1_ref[...], be1_ref[...])
    # packed lane-dense QKV matmul: (R, D) @ (D, 3D), M = bs*seq rows
    qkv_ref[...] = jnp.dot(xn.astype(cdt), wqkv_ref[...],
                           preferred_element_type=jnp.float32) + bqkv_ref[...]

    neg = mask_ref[...]        # (R, R): 0 within an image, -1e30 across images
    for h in range(H):         # static unroll; all 2-D matmuls, no reshapes
        q = qkv_ref[:, h * Dh:(h + 1) * Dh].astype(cdt)
        k = qkv_ref[:, (H + h) * Dh:(H + h + 1) * Dh].astype(cdt)
        v = qkv_ref[:, (2 * H + h) * Dh:(2 * H + h + 1) * Dh].astype(cdt)
        s = jax.lax.dot_general(q, k, (((1,), (1,)), ((), ())),
                                preferred_element_type=jnp.float32) * scale
        s = s + neg
        s = s - jnp.max(s, axis=-1, keepdims=True)
        e = jnp.exp(s)
        p = e * pl.reciprocal(jnp.sum(e, axis=-1, keepdims=True), approx=True)
        ao_ref[:, h * Dh:(h + 1) * Dh] = jnp.dot(
            p.astype(cdt), v, preferred_element_type=jnp.float32).astype(cdt)

    # packed out-projection: single K = D matmul over the assembled heads
    x = x + jnp.dot(ao_ref[...], wo_ref[...],
                    preferred_element_type=jnp.float32) + bo_ref[...]

    # ---- feed-forward: x + MLP(LN2(x)) ----
    xn2 = _layernorm(x, g2_ref[...], be2_ref[...])
    h1 = jnp.dot(xn2.astype(cdt), w1_ref[...],
                 preferred_element_type=jnp.float32) + bb1_ref[...]
    h1 = _gelu_exact(h1)                       # exact erf GELU (torch default)
    x = x + jnp.dot(h1.astype(cdt), w2_ref[...],
                    preferred_element_type=jnp.float32) + bb2_ref[...]

    xs_ref[...] = x                            # depth carry stays in VMEM

    # ---- final LayerNorm of each image's cls token (last layer only) ----
    @pl.when(d == n_layers - 1)
    def _():
        gf = gf_ref[...]
        bf = bf_ref[...]
        for b in range(bs):                    # static unroll over the tile
            row = xs_ref[pl.ds(b * seq, 1), :]             # (1, D) cls row
            o_ref[pl.ds(b, 1), :] = _layernorm(row, gf, bf)


# -------------------------------- parameters ---------------------------------

def init_params(key, *, image_size, patch_size, in_channels, dim, depth, heads,
                mlp_dim):
    assert dim % heads == 0
    num_patches = (image_size // patch_size) ** 2
    k = jax.random.split(key, 8)

    def nrm(kk, shape, scale=0.02, dtype=jnp.float32):
        return (jax.random.normal(kk, shape, jnp.float32) * scale).astype(dtype)

    return {
        # Conv2d(in_channels, dim, kernel=stride=patch) as a per-patch matmul
        "patch_w": nrm(k[0], (in_channels * patch_size * patch_size, dim),
                       dtype=_COMPUTE_DTYPE),
        "patch_b": jnp.zeros((1, dim), jnp.float32),
        "cls_token": nrm(k[1], (1, dim), 1.0),                 # torch.randn
        "pos_emb": nrm(k[2], (num_patches + 1, dim), 1.0),     # torch.randn
        # per-layer LayerNorms, stacked over depth
        "g1": jnp.ones((depth, 1, dim), jnp.float32),
        "be1": jnp.zeros((depth, 1, dim), jnp.float32),
        "g2": jnp.ones((depth, 1, dim), jnp.float32),
        "be2": jnp.zeros((depth, 1, dim), jnp.float32),
        # packed QKV: columns [0,D) = q, [D,2D) = k, [2D,3D) = v, each ordered
        # head-major (head h occupies lanes h*Dh:(h+1)*Dh of its segment);
        # equals nn.MultiheadAttention in_proj_weight.T
        "wqkv": nrm(k[3], (depth, dim, 3 * dim), dtype=_COMPUTE_DTYPE),
        "bqkv": jnp.zeros((depth, 1, 3 * dim), jnp.float32),
        # out_proj.weight.T
        "wo": nrm(k[4], (depth, dim, dim), dtype=_COMPUTE_DTYPE),
        "bo": jnp.zeros((depth, 1, dim), jnp.float32),
        # feed-forward
        "w1": nrm(k[5], (depth, dim, mlp_dim), dtype=_COMPUTE_DTYPE),
        "bb1": jnp.zeros((depth, 1, mlp_dim), jnp.float32),
        "w2": nrm(k[6], (depth, mlp_dim, dim), dtype=_COMPUTE_DTYPE),
        "bb2": jnp.zeros((depth, 1, dim), jnp.float32),
        # final LayerNorm
        "gf": jnp.ones((1, dim), jnp.float32),
        "bf": jnp.zeros((1, dim), jnp.float32),
    }


# ---------------------------------- wrapper -----------------------------------

def _patchify(img, patch_size):
    B, C, Hi, Wi = img.shape
    pp = patch_size
    Hn, Wn = Hi // pp, Wi // pp
    # NCHW -> per-patch rows [B, N, C*p*p]; flatten order (c, ph, pw) matches
    # Conv2d weight.reshape(dim, -1).
    p = img.reshape(B, C, Hn, pp, Wn, pp).transpose(0, 2, 4, 1, 3, 5)
    return p.reshape(B, Hn * Wn, C * pp * pp)


def vit_encoder_forward(img, params, *, patch_size, heads, batch_tile=None):
    B, C, Hi, Wi = img.shape
    pp = patch_size
    N = (Hi // pp) * (Wi // pp)
    P = C * pp * pp
    D = params["patch_w"].shape[1]
    S = N + 1
    depth = params["wqkv"].shape[0]
    M = params["w1"].shape[2]

    # batch tile: keep <= 8 (block-diag attention cost grows with bs^2)
    bs = min(batch_tile if batch_tile is not None else 8, B)
    while B % bs:
        bs -= 1
    NB = B // bs
    R = bs * S

    # patches with a zero "cls" row per image, flattened per batch tile
    patches = _patchify(img, pp)                              # (B, N, P)
    patches = jnp.pad(patches, ((0, 0), (1, 0), (0, 0)))      # (B, S, P)
    patches = patches.reshape(NB, R, P)

    # additive per-row bias: row 0 = cls + pos[0]; rows 1.. = pos + conv bias
    pb = jnp.broadcast_to(params["patch_b"], (N, D))
    bias_rows = params["pos_emb"] + jnp.concatenate(
        [params["cls_token"], pb], axis=0)                    # (S, D)
    poscb = jnp.tile(bias_rows, (bs, 1)).astype(jnp.float32)  # (R, D)

    # block-diagonal additive attention mask (0 within image, -1e30 across)
    img_id = jnp.repeat(jnp.arange(bs), S)
    attn_mask = jnp.where(img_id[:, None] == img_id[None, :], 0.0,
                          _MASK_NEG).astype(jnp.float32)       # (R, R)

    def wspec(*shape):   # depth-stacked weight block
        return pl.BlockSpec((None,) + shape,
                            lambda i, d: (d,) + (0,) * len(shape))

    def cspec(*shape):   # constant (grid-invariant) block
        return pl.BlockSpec(shape, lambda i, d: (0,) * len(shape))

    # VMEM budget derived from actual block sizes (double-buffered) + headroom
    def nb(shape, dtype):
        return int(math.prod(shape)) * jnp.dtype(dtype).itemsize

    per_step_in = (nb((R, P), jnp.float32) + nb((R, D), jnp.float32)
                   + nb((R, R), jnp.float32) + nb((P, D), _COMPUTE_DTYPE)
                   + 4 * nb((1, D), jnp.float32)
                   + nb((D, 3 * D), _COMPUTE_DTYPE) + nb((1, 3 * D), jnp.float32)
                   + nb((D, D), _COMPUTE_DTYPE) + nb((1, D), jnp.float32)
                   + nb((D, M), _COMPUTE_DTYPE) + nb((1, M), jnp.float32)
                   + nb((M, D), _COMPUTE_DTYPE) + nb((1, D), jnp.float32)
                   + 2 * nb((1, D), jnp.float32))
    scratch_b = (nb((R, D), jnp.float32) + nb((R, 3 * D), jnp.float32)
                 + nb((R, D), _COMPUTE_DTYPE))
    vmem_limit = min(64 * 1024 * 1024,
                     2 * (per_step_in + nb((bs, D), jnp.float32))
                     + scratch_b + (16 << 20))

    out = pl.pallas_call(
        partial(encoder_stack_kernel, heads=heads, bs=bs, seq=S),
        out_shape=jax.ShapeDtypeStruct((NB, bs, D), jnp.float32),
        grid=(NB, depth),
        in_specs=[
            pl.BlockSpec((None, R, P), lambda i, d: (i, 0, 0)),   # patches
            cspec(R, D),                                          # poscb
            cspec(R, R),                                          # attn mask
            cspec(P, D),                                          # patch_w
            wspec(1, D), wspec(1, D), wspec(1, D), wspec(1, D),   # g1 be1 g2 be2
            wspec(D, 3 * D), wspec(1, 3 * D),                     # wqkv bqkv
            wspec(D, D), wspec(1, D),                             # wo bo
            wspec(D, M), wspec(1, M),                             # w1 bb1
            wspec(M, D), wspec(1, D),                             # w2 bb2
            cspec(1, D), cspec(1, D),                             # gf bf
        ],
        out_specs=pl.BlockSpec((None, bs, D), lambda i, d: (i, 0, 0)),
        scratch_shapes=[
            pltpu.VMEM((R, D), jnp.float32),        # residual carry
            pltpu.VMEM((R, 3 * D), jnp.float32),    # packed QKV
            pltpu.VMEM((R, D), _COMPUTE_DTYPE),     # assembled attention out
        ],
        compiler_params=pltpu.CompilerParams(
            dimension_semantics=("parallel", "arbitrary"),
            vmem_limit_bytes=vmem_limit),
    )(patches, poscb, attn_mask, params["patch_w"],
      params["g1"], params["be1"], params["g2"], params["be2"],
      params["wqkv"], params["bqkv"], params["wo"], params["bo"],
      params["w1"], params["bb1"], params["w2"], params["bb2"],
      params["gf"], params["bf"])

    return out.reshape(B, D)


# ----------------------------- pure-JAX reference -----------------------------

def reference_forward(img, params, *, patch_size, heads):
    B = img.shape[0]
    D = params["patch_w"].shape[1]
    depth = params["wqkv"].shape[0]
    Dh = D // heads
    cdt = _COMPUTE_DTYPE

    def ln(z, g, b):
        m = z.mean(-1, keepdims=True)
        v = ((z - m) ** 2).mean(-1, keepdims=True)
        return (z - m) * jax.lax.rsqrt(v + 1e-5) * g + b

    patches = _patchify(img, patch_size)
    x = jnp.dot(patches.astype(cdt), params["patch_w"],
                preferred_element_type=jnp.float32) + params["patch_b"]
    cls = jnp.broadcast_to(params["cls_token"][None], (B, 1, D))
    x = jnp.concatenate([cls, x], axis=1) + params["pos_emb"][None]
    S = x.shape[1]
    for l in range(depth):
        xn = ln(x, params["g1"][l], params["be1"][l])
        qkv = jnp.dot(xn.astype(cdt), params["wqkv"][l],
                      preferred_element_type=jnp.float32) + params["bqkv"][l]
        q, k, v = qkv[..., :D], qkv[..., D:2 * D], qkv[..., 2 * D:]
        q = q.reshape(B, S, heads, Dh).transpose(0, 2, 1, 3)
        k = k.reshape(B, S, heads, Dh).transpose(0, 2, 1, 3)
        v = v.reshape(B, S, heads, Dh).transpose(0, 2, 1, 3)
        s = jnp.einsum('bhse,bhte->bhst', q.astype(cdt), k.astype(cdt),
                       preferred_element_type=jnp.float32) / math.sqrt(Dh)
        p = jax.nn.softmax(s, axis=-1)
        ao = jnp.einsum('bhst,bhte->bhse', p.astype(cdt), v.astype(cdt),
                        preferred_element_type=jnp.float32)
        ao = ao.transpose(0, 2, 1, 3).reshape(B, S, D)
        x = x + jnp.dot(ao.astype(cdt), params["wo"][l],
                        preferred_element_type=jnp.float32) + params["bo"][l]
        xn2 = ln(x, params["g2"][l], params["be2"][l])
        h1 = jnp.dot(xn2.astype(cdt), params["w1"][l],
                     preferred_element_type=jnp.float32) + params["bb1"][l]
        h1 = jax.nn.gelu(h1, approximate=False)
        x = x + jnp.dot(h1.astype(cdt), params["w2"][l],
                        preferred_element_type=jnp.float32) + params["bb2"][l]
    x = ln(x, params["gf"], params["bf"])
    return x[:, 0]


# ------------------------------------ main ------------------------------------

if __name__ == "__main__":
    B, C, IMG, PATCH = 4, 3, 16, 4            # 16 patches -> 17 tokens / image
    DIM, DEPTH, HEADS, MLP = 128, 3, 4, 256   # lane-dense D, Dh = 32

    key = jax.random.PRNGKey(0)
    pkey, xkey = jax.random.split(key)
    params = init_params(pkey, image_size=IMG, patch_size=PATCH, in_channels=C,
                         dim=DIM, depth=DEPTH, heads=HEADS, mlp_dim=MLP)
    img = jax.random.normal(xkey, (B, C, IMG, IMG), jnp.float32)

    fwd = jax.jit(partial(vit_encoder_forward, patch_size=PATCH, heads=HEADS,
                          batch_tile=2))      # grid = (2, DEPTH)
    out = jax.block_until_ready(fwd(img, params))

    assert out.shape == (B, DIM)
    assert bool(jnp.all(jnp.isfinite(out)))

    ref = reference_forward(img, params, patch_size=PATCH, heads=HEADS)
    err = float(jnp.max(jnp.abs(out - ref)))
    assert err < 5e-2, f"max abs err vs reference: {err}"
    print("KERNEL_OK")
</pallas_src>

<mosaic_0001>
module attributes {stable_mosaic.version = 11 : i64} {
  func.func @encoder_stack_kernel(%arg0: i32, %arg1: i32, %arg2: memref<1x34x48xf32, #tpu.memory_space<vmem>>, %arg3: memref<34x128xf32, #tpu.memory_space<vmem>>, %arg4: memref<34x34xf32, #tpu.memory_space<vmem>>, %arg5: memref<48x128xbf16, #tpu.memory_space<vmem>>, %arg6: memref<1x1x128xf32, #tpu.memory_space<vmem>>, %arg7: memref<1x1x128xf32, #tpu.memory_space<vmem>>, %arg8: memref<1x1x128xf32, #tpu.memory_space<vmem>>, %arg9: memref<1x1x128xf32, #tpu.memory_space<vmem>>, %arg10: memref<1x128x384xbf16, #tpu.memory_space<vmem>>, %arg11: memref<1x1x384xf32, #tpu.memory_space<vmem>>, %arg12: memref<1x128x128xbf16, #tpu.memory_space<vmem>>, %arg13: memref<1x1x128xf32, #tpu.memory_space<vmem>>, %arg14: memref<1x128x256xbf16, #tpu.memory_space<vmem>>, %arg15: memref<1x1x256xf32, #tpu.memory_space<vmem>>, %arg16: memref<1x256x128xbf16, #tpu.memory_space<vmem>>, %arg17: memref<1x1x128xf32, #tpu.memory_space<vmem>>, %arg18: memref<1x128xf32, #tpu.memory_space<vmem>>, %arg19: memref<1x128xf32, #tpu.memory_space<vmem>>, %arg20: memref<1x2x128xf32, #tpu.memory_space<vmem>>, %arg21: memref<34x128xf32, #tpu.memory_space<vmem>>, %arg22: memref<34x384xf32, #tpu.memory_space<vmem>>, %arg23: memref<34x128xbf16, #tpu.memory_space<vmem>>) attributes {dimension_semantics = [#tpu.dimension_semantics<parallel>, #tpu.dimension_semantics<arbitrary>], iteration_bounds = array<i64: 2, 3>, scalar_prefetch = 0 : i64, scratch_operands = 3 : i64, tpu.core_type = #tpu.core_type<tc>, window_params = [{transform_indices = @transform_0, window_bounds = array<i64: 1, 34, 48>}, {pipeline_mode = #tpu.pipeline_mode<synchronous>, transform_indices = @transform_1, window_bounds = array<i64: 34, 128>}, {pipeline_mode = #tpu.pipeline_mode<synchronous>, transform_indices = @transform_2, window_bounds = array<i64: 34, 34>}, {pipeline_mode = #tpu.pipeline_mode<synchronous>, transform_indices = @transform_3, window_bounds = array<i64: 48, 128>}, {transform_indices = @transform_4, window_bounds = array<i64: 1, 1, 128>}, {transform_indices = @transform_5, window_bounds = array<i64: 1, 1, 128>}, {transform_indices = @transform_6, window_bounds = array<i64: 1, 1, 128>}, {transform_indices = @transform_7, window_bounds = array<i64: 1, 1, 128>}, {transform_indices = @transform_8, window_bounds = array<i64: 1, 128, 384>}, {transform_indices = @transform_9, window_bounds = array<i64: 1, 1, 384>}, {transform_indices = @transform_10, window_bounds = array<i64: 1, 128, 128>}, {transform_indices = @transform_11, window_bounds = array<i64: 1, 1, 128>}, {transform_indices = @transform_12, window_bounds = array<i64: 1, 128, 256>}, {transform_indices = @transform_13, window_bounds = array<i64: 1, 1, 256>}, {transform_indices = @transform_14, window_bounds = array<i64: 1, 256, 128>}, {transform_indices = @transform_15, window_bounds = array<i64: 1, 1, 128>}, {pipeline_mode = #tpu.pipeline_mode<synchronous>, transform_indices = @transform_16, window_bounds = array<i64: 1, 128>}, {pipeline_mode = #tpu.pipeline_mode<synchronous>, transform_indices = @transform_17, window_bounds = array<i64: 1, 128>}, {transform_indices = @transform_18, window_bounds = array<i64: 1, 2, 128>}]} {
    %c0_i32 = arith.constant 0 : i32
    %0 = arith.cmpi eq, %arg1, %c0_i32 : i32
    %1 = arith.extui %0 : i1 to i32
    %c0_i32_0 = arith.constant 0 : i32
    %2 = arith.cmpi ne, %1, %c0_i32_0 : i32
    scf.if %2 {
      %c0_116 = arith.constant 0 : index
      %c0_117 = arith.constant 0 : index
      %c0_118 = arith.constant 0 : index
      %232 = vector.load %arg2[%c0_116, %c0_117, %c0_118] : memref<1x34x48xf32, #tpu.memory_space<vmem>>, vector<1x34x48xf32>
      %233 = vector.shape_cast %232 : vector<1x34x48xf32> to vector<34x48xf32>
      %234 = arith.truncf %233 : vector<34x48xf32> to vector<34x48xbf16>
      %c0_119 = arith.constant 0 : index
      %c0_120 = arith.constant 0 : index
      %235 = vector.load %arg5[%c0_119, %c0_120] : memref<48x128xbf16, #tpu.memory_space<vmem>>, vector<48x128xbf16>
      %cst_121 = arith.constant dense<0.000000e+00> : vector<34x128xf32>
      %236 = tpu.matmul %234, %235, %cst_121 {dimension_numbers = #tpu.dot_dimension_numbers<[1], [0], [0], [1], [0, 0, 1, 1], [], []>} : vector<34x48xbf16>, vector<48x128xbf16>, vector<34x128xf32> -> vector<34x128xf32>
      %c0_122 = arith.constant 0 : index
      %c0_123 = arith.constant 0 : index
      %237 = vector.load %arg3[%c0_122, %c0_123] : memref<34x128xf32, #tpu.memory_space<vmem>>, vector<34x128xf32>
      %238 = arith.addf %236, %237 : vector<34x128xf32>
      %c0_124 = arith.constant 0 : index
      %c0_125 = arith.constant 0 : index
      %239 = vector.load %arg21[%c0_124, %c0_125] : memref<34x128xf32, #tpu.memory_space<vmem>>, vector<34x128xf32>
      tpu.vector_store %arg21[%c0_124, %c0_125], %238 {strides = array<i32>} : memref<34x128xf32, #tpu.memory_space<vmem>>, vector<34x128xf32>,
    } else {
    }
    %c0 = arith.constant 0 : index
    %c0_1 = arith.constant 0 : index
    %3 = vector.load %arg21[%c0, %c0_1] : memref<34x128xf32, #tpu.memory_space<vmem>>, vector<34x128xf32>
    %c0_2 = arith.constant 0 : index
    %c0_3 = arith.constant 0 : index
    %c0_4 = arith.constant 0 : index
    %4 = vector.load %arg6[%c0_2, %c0_3, %c0_4] : memref<1x1x128xf32, #tpu.memory_space<vmem>>, vector<1x1x128xf32>
    %5 = vector.shape_cast %4 : vector<1x1x128xf32> to vector<1x128xf32>
    %c0_5 = arith.constant 0 : index
    %c0_6 = arith.constant 0 : index
    %c0_7 = arith.constant 0 : index
    %6 = vector.load %arg7[%c0_5, %c0_6, %c0_7] : memref<1x1x128xf32, #tpu.memory_space<vmem>>, vector<1x1x128xf32>
    %7 = vector.shape_cast %6 : vector<1x1x128xf32> to vector<1x128xf32>
    %cst = arith.constant dense<0.000000e+00> : vector<34xf32>
    %8 = vector.multi_reduction <add>, %3, %cst [1] : vector<34x128xf32> to vector<34xf32>
    %9 = vector.shape_cast %8 : vector<34xf32> to vector<34x1xf32>
    %cst_8 = arith.constant 1.280000e+02 : f32
    %10 = vector.broadcast %cst_8 : f32 to vector<34x1xf32>
    %11 = arith.divf %9, %10 : vector<34x1xf32>
    %12 = vector.broadcast %11 : vector<34x1xf32> to vector<34x128xf32>
    %13 = arith.subf %3, %12 : vector<34x128xf32>
    %14 = arith.mulf %13, %13 : vector<34x128xf32>
    %cst_9 = arith.constant dense<0.000000e+00> : vector<34xf32>
    %15 = vector.multi_reduction <add>, %14, %cst_9 [1] : vector<34x128xf32> to vector<34xf32>
    %16 = vector.shape_cast %15 : vector<34xf32> to vector<34x1xf32>
    %cst_10 = arith.constant 1.280000e+02 : f32
    %17 = vector.broadcast %cst_10 : f32 to vector<34x1xf32>
    %18 = arith.divf %16, %17 : vector<34x1xf32>
    %19 = vector.broadcast %11 : vector<34x1xf32> to vector<34x128xf32>
    %20 = arith.subf %3, %19 : vector<34x128xf32>
    %cst_11 = arith.constant 9.99999974E-6 : f32
    %21 = vector.broadcast %cst_11 : f32 to vector<34x1xf32>
    %22 = arith.addf %18, %21 : vector<34x1xf32>
    %23 = math.rsqrt %22 : vector<34x1xf32>
    %24 = vector.broadcast %23 : vector<34x1xf32> to vector<34x128xf32>
    %25 = arith.mulf %20, %24 : vector<34x128xf32>
    %26 = vector.broadcast %5 : vector<1x128xf32> to vector<34x128xf32>
    %27 = arith.mulf %25, %26 : vector<34x128xf32>
    %28 = vector.broadcast %7 : vector<1x128xf32> to vector<34x128xf32>
    %29 = arith.addf %27, %28 : vector<34x128xf32>
    %30 = arith.truncf %29 : vector<34x128xf32> to vector<34x128xbf16>
    %c0_12 = arith.constant 0 : index
    %c0_13 = arith.constant 0 : index
    %c0_14 = arith.constant 0 : index
    %31 = vector.load %arg10[%c0_12, %c0_13, %c0_14] : memref<1x128x384xbf16, #tpu.memory_space<vmem>>, vector<1x128x384xbf16>
    %32 = vector.shape_cast %31 : vector<1x128x384xbf16> to vector<128x384xbf16>
    %cst_15 = arith.constant dense<0.000000e+00> : vector<34x384xf32>
    %33 = tpu.matmul %30, %32, %cst_15 {dimension_numbers = #tpu.dot_dimension_numbers<[1], [0], [0], [1], [0, 0, 1, 1], [], []>} : vector<34x128xbf16>, vector<128x384xbf16>, vector<34x384xf32> -> vector<34x384xf32>
    %c0_16 = arith.constant 0 : index
    %c0_17 = arith.constant 0 : index
    %c0_18 = arith.constant 0 : index
    %34 = vector.load %arg11[%c0_16, %c0_17, %c0_18] : memref<1x1x384xf32, #tpu.memory_space<vmem>>, vector<1x1x384xf32>
    %35 = vector.shape_cast %34 : vector<1x1x384xf32> to vector<1x384xf32>
    %36 = vector.broadcast %35 : vector<1x384xf32> to vector<34x384xf32>
    %37 = arith.addf %33, %36 : vector<34x384xf32>
    %c0_19 = arith.constant 0 : index
    %c0_20 = arith.constant 0 : index
    %38 = vector.load %arg22[%c0_19, %c0_20] : memref<34x384xf32, #tpu.memory_space<vmem>>, vector<34x384xf32>
    tpu.vector_store %arg22[%c0_19, %c0_20], %37 {strides = array<i32>} : memref<34x384xf32, #tpu.memory_space<vmem>>, vector<34x384xf32>,
    %c0_21 = arith.constant 0 : index
    %c0_22 = arith.constant 0 : index
    %39 = vector.load %arg4[%c0_21, %c0_22] : memref<34x34xf32, #tpu.memory_space<vmem>>, vector<34x34xf32>
    %c0_23 = arith.constant 0 : index
    %c0_24 = arith.constant 0 : index
    %40 = vector.load %arg22[%c0_23, %c0_24] : memref<34x384xf32, #tpu.memory_space<vmem>>, vector<34x32xf32>
    %41 = arith.truncf %40 : vector<34x32xf32> to vector<34x32xbf16>
    %c0_25 = arith.constant 0 : index
    %c128 = arith.constant 128 : index
    %42 = vector.load %arg22[%c0_25, %c128] : memref<34x384xf32, #tpu.memory_space<vmem>>, vector<34x32xf32>
    %43 = arith.truncf %42 : vector<34x32xf32> to vector<34x32xbf16>
    %c0_26 = arith.constant 0 : index
    %c256 = arith.constant 256 : index
    %44 = vector.load %arg22[%c0_26, %c256] : memref<34x384xf32, #tpu.memory_space<vmem>>, vector<34x32xf32>
    %45 = arith.truncf %44 : vector<34x32xf32> to vector<34x32xbf16>
    %cst_27 = arith.constant dense<0.000000e+00> : vector<34x34xf32>
    %46 = tpu.matmul %41, %43, %cst_27 {dimension_numbers = #tpu.dot_dimension_numbers<[1], [1], [0], [0], [0, 0, 1, 0], [], []>} : vector<34x32xbf16>, vector<34x32xbf16>, vector<34x34xf32> -> vector<34x34xf32>
    %cst_28 = arith.constant 0.176776692 : f32
    %47 = vector.broadcast %cst_28 : f32 to vector<34x34xf32>
    %48 = arith.mulf %46, %47 : vector<34x34xf32>
    %49 = arith.addf %48, %39 : vector<34x34xf32>
    %cst_29 = arith.constant dense<0xFF800000> : vector<34xf32>
    %50 = vector.multi_reduction <maximumf>, %49, %cst_29 [1] : vector<34x34xf32> to vector<34xf32>
    %51 = vector.shape_cast %50 : vector<34xf32> to vector<34x1xf32>
    %52 = vector.broadcast %51 : vector<34x1xf32> to vector<34x34xf32>
    %53 = arith.subf %49, %52 : vector<34x34xf32>
    %54 = math.exp %53 : vector<34x34xf32>
    %cst_30 = arith.constant dense<0.000000e+00> : vector<34xf32>
    %55 = vector.multi_reduction <add>, %54, %cst_30 [1] : vector<34x34xf32> to vector<34xf32>
    %56 = vector.shape_cast %55 : vector<34xf32> to vector<34x1xf32>
    %57 = tpu.reciprocal %56 {approx = true} : vector<34x1xf32> -> vector<34x1xf32>
    %58 = vector.broadcast %57 : vector<34x1xf32> to vector<34x34xf32>
    %59 = arith.mulf %54, %58 : vector<34x34xf32>
    %60 = arith.truncf %59 : vector<34x34xf32> to vector<34x34xbf16>
    %cst_31 = arith.constant dense<0.000000e+00> : vector<34x32xf32>
    %61 = tpu.matmul %60, %45, %cst_31 {dimension_numbers = #tpu.dot_dimension_numbers<[1], [0], [0], [1], [0, 0, 1, 1], [], []>} : vector<34x34xbf16>, vector<34x32xbf16>, vector<34x32xf32> -> vector<34x32xf32>
    %62 = arith.truncf %61 : vector<34x32xf32> to vector<34x32xbf16>
    %c0_32 = arith.constant 0 : index
    %c0_33 = arith.constant 0 : index
    %63 = vector.load %arg23[%c0_32, %c0_33] : memref<34x128xbf16, #tpu.memory_space<vmem>>, vector<34x32xbf16>
    tpu.vector_store %arg23[%c0_32, %c0_33], %62 {strides = array<i32>} : memref<34x128xbf16, #tpu.memory_space<vmem>>, vector<34x32xbf16>,
    %c0_34 = arith.constant 0 : index
    %c32 = arith.constant 32 : index
    %64 = vector.load %arg22[%c0_34, %c32] : memref<34x384xf32, #tpu.memory_space<vmem>>, vector<34x32xf32>
    %65 = arith.truncf %64 : vector<34x32xf32> to vector<34x32xbf16>
    %c0_35 = arith.constant 0 : index
    %c160 = arith.constant 160 : index
    %66 = vector.load %arg22[%c0_35, %c160] : memref<34x384xf32, #tpu.memory_space<vmem>>, vector<34x32xf32>
    %67 = arith.truncf %66 : vector<34x32xf32> to vector<34x32xbf16>
    %c0_36 = arith.constant 0 : index
    %c288 = arith.constant 288 : index
    %68 = vector.load %arg22[%c0_36, %c288] : memref<34x384xf32, #tpu.memory_space<vmem>>, vector<34x32xf32>
    %69 = arith.truncf %68 : vector<34x32xf32> to vector<34x32xbf16>
    %cst_37 = arith.constant dense<0.000000e+00> : vector<34x34xf32>
    %70 = tpu.matmul %65, %67, %cst_37 {dimension_numbers = #tpu.dot_dimension_numbers<[1], [1], [0], [0], [0, 0, 1, 0], [], []>} : vector<34x32xbf16>, vector<34x32xbf16>, vector<34x34xf32> -> vector<34x34xf32>
    %cst_38 = arith.constant 0.176776692 : f32
    %71 = vector.broadcast %cst_38 : f32 to vector<34x34xf32>
    %72 = arith.mulf %70, %71 : vector<34x34xf32>
    %73 = arith.addf %72, %39 : vector<34x34xf32>
    %cst_39 = arith.constant dense<0xFF800000> : vector<34xf32>
    %74 = vector.multi_reduction <maximumf>, %73, %cst_39 [1] : vector<34x34xf32> to vector<34xf32>
    %75 = vector.shape_cast %74 : vector<34xf32> to vector<34x1xf32>
    %76 = vector.broadcast %75 : vector<34x1xf32> to vector<34x34xf32>
    %77 = arith.subf %73, %76 : vector<34x34xf32>
    %78 = math.exp %77 : vector<34x34xf32>
    %cst_40 = arith.constant dense<0.000000e+00> : vector<34xf32>
    %79 = vector.multi_reduction <add>, %78, %cst_40 [1] : vector<34x34xf32> to vector<34xf32>
    %80 = vector.shape_cast %79 : vector<34xf32> to vector<34x1xf32>
    %81 = tpu.reciprocal %80 {approx = true} : vector<34x1xf32> -> vector<34x1xf32>
    %82 = vector.broadcast %81 : vector<34x1xf32> to vector<34x34xf32>
    %83 = arith.mulf %78, %82 : vector<34x34xf32>
    %84 = arith.truncf %83 : vector<34x34xf32> to vector<34x34xbf16>
    %cst_41 = arith.constant dense<0.000000e+00> : vector<34x32xf32>
    %85 = tpu.matmul %84, %69, %cst_41 {dimension_numbers = #tpu.dot_dimension_numbers<[1], [0], [0], [1], [0, 0, 1, 1], [], []>} : vector<34x34xbf16>, vector<34x32xbf16>, vector<34x32xf32> -> vector<34x32xf32>
    %86 = arith.truncf %85 : vector<34x32xf32> to vector<34x32xbf16>
    %c0_42 = arith.constant 0 : index
    %c32_43 = arith.constant 32 : index
    %87 = vector.load %arg23[%c0_42, %c32_43] : memref<34x128xbf16, #tpu.memory_space<vmem>>, vector<34x32xbf16>
    tpu.vector_store %arg23[%c0_42, %c32_43], %86 {strides = array<i32>} : memref<34x128xbf16, #tpu.memory_space<vmem>>, vector<34x32xbf16>,
    %c0_44 = arith.constant 0 : index
    %c64 = arith.constant 64 : index
    %88 = vector.load %arg22[%c0_44, %c64] : memref<34x384xf32, #tpu.memory_space<vmem>>, vector<34x32xf32>
    %89 = arith.truncf %88 : vector<34x32xf32> to vector<34x32xbf16>
    %c0_45 = arith.constant 0 : index
    %c192 = arith.constant 192 : index
    %90 = vector.load %arg22[%c0_45, %c192] : memref<34x384xf32, #tpu.memory_space<vmem>>, vector<34x32xf32>
    %91 = arith.truncf %90 : vector<34x32xf32> to vector<34x32xbf16>
    %c0_46 = arith.constant 0 : index
    %c320 = arith.constant 320 : index
    %92 = vector.load %arg22[%c0_46, %c320] : memref<34x384xf32, #tpu.memory_space<vmem>>, vector<34x32xf32>
    %93 = arith.truncf %92 : vector<34x32xf32> to vector<34x32xbf16>
    %cst_47 = arith.constant dense<0.000000e+00> : vector<34x34xf32>
    %94 = tpu.matmul %89, %91, %cst_47 {dimension_numbers = #tpu.dot_dimension_numbers<[1], [1], [0], [0], [0, 0, 1, 0], [], []>} : vector<34x32xbf16>, vector<34x32xbf16>, vector<34x34xf32> -> vector<34x34xf32>
    %cst_48 = arith.constant 0.176776692 : f32
    %95 = vector.broadcast %cst_48 : f32 to vector<34x34xf32>
    %96 = arith.mulf %94, %95 : vector<34x34xf32>
    %97 = arith.addf %96, %39 : vector<34x34xf32>
    %cst_49 = arith.constant dense<0xFF800000> : vector<34xf32>
    %98 = vector.multi_reduction <maximumf>, %97, %cst_49 [1] : vector<34x34xf32> to vector<34xf32>
    %99 = vector.shape_cast %98 : vector<34xf32> to vector<34x1xf32>
    %100 = vector.broadcast %99 : vector<34x1xf32> to vector<34x34xf32>
    %101 = arith.subf %97, %100 : vector<34x34xf32>
    %102 = math.exp %101 : vector<34x34xf32>
    %cst_50 = arith.constant dense<0.000000e+00> : vector<34xf32>
    %103 = vector.multi_reduction <add>, %102, %cst_50 [1] : vector<34x34xf32> to vector<34xf32>
    %104 = vector.shape_cast %103 : vector<34xf32> to vector<34x1xf32>
    %105 = tpu.reciprocal %104 {approx = true} : vector<34x1xf32> -> vector<34x1xf32>
    %106 = vector.broadcast %105 : vector<34x1xf32> to vector<34x34xf32>
    %107 = arith.mulf %102, %106 : vector<34x34xf32>
    %108 = arith.truncf %107 : vector<34x34xf32> to vector<34x34xbf16>
    %cst_51 = arith.constant dense<0.000000e+00> : vector<34x32xf32>
    %109 = tpu.matmul %108, %93, %cst_51 {dimension_numbers = #tpu.dot_dimension_numbers<[1], [0], [0], [1], [0, 0, 1, 1], [], []>} : vector<34x34xbf16>, vector<34x32xbf16>, vector<34x32xf32> -> vector<34x32xf32>
    %110 = arith.truncf %109 : vector<34x32xf32> to vector<34x32xbf16>
    %c0_52 = arith.constant 0 : index
    %c64_53 = arith.constant 64 : index
    %111 = vector.load %arg23[%c0_52, %c64_53] : memref<34x128xbf16, #tpu.memory_space<vmem>>, vector<34x32xbf16>
    tpu.vector_store %arg23[%c0_52, %c64_53], %110 {strides = array<i32>} : memref<34x128xbf16, #tpu.memory_space<vmem>>, vector<34x32xbf16>,
    %c0_54 = arith.constant 0 : index
    %c96 = arith.constant 96 : index
    %112 = vector.load %arg22[%c0_54, %c96] : memref<34x384xf32, #tpu.memory_space<vmem>>, vector<34x32xf32>
    %113 = arith.truncf %112 : vector<34x32xf32> to vector<34x32xbf16>
    %c0_55 = arith.constant 0 : index
    %c224 = arith.constant 224 : index
    %114 = vector.load %arg22[%c0_55, %c224] : memref<34x384xf32, #tpu.memory_space<vmem>>, vector<34x32xf32>
    %115 = arith.truncf %114 : vector<34x32xf32> to vector<34x32xbf16>
    %c0_56 = arith.constant 0 : index
    %c352 = arith.constant 352 : index
    %116 = vector.load %arg22[%c0_56, %c352] : memref<34x384xf32, #tpu.memory_space<vmem>>, vector<34x32xf32>
    %117 = arith.truncf %116 : vector<34x32xf32> to vector<34x32xbf16>
    %cst_57 = arith.constant dense<0.000000e+00> : vector<34x34xf32>
    %118 = tpu.matmul %113, %115, %cst_57 {dimension_numbers = #tpu.dot_dimension_numbers<[1], [1], [0], [0], [0, 0, 1, 0], [], []>} : vector<34x32xbf16>, vector<34x32xbf16>, vector<34x34xf32> -> vector<34x34xf32>
    %cst_58 = arith.constant 0.176776692 : f32
    %119 = vector.broadcast %cst_58 : f32 to vector<34x34xf32>
    %120 = arith.mulf %118, %119 : vector<34x34xf32>
    %121 = arith.addf %120, %39 : vector<34x34xf32>
    %cst_59 = arith.constant dense<0xFF800000> : vector<34xf32>
    %122 = vector.multi_reduction <maximumf>, %121, %cst_59 [1] : vector<34x34xf32> to vector<34xf32>
    %123 = vector.shape_cast %122 : vector<34xf32> to vector<34x1xf32>
    %124 = vector.broadcast %123 : vector<34x1xf32> to vector<34x34xf32>
    %125 = arith.subf %121, %124 : vector<34x34xf32>
    %126 = math.exp %125 : vector<34x34xf32>
    %cst_60 = arith.constant dense<0.000000e+00> : vector<34xf32>
    %127 = vector.multi_reduction <add>, %126, %cst_60 [1] : vector<34x34xf32> to vector<34xf32>
    %128 = vector.shape_cast %127 : vector<34xf32> to vector<34x1xf32>
    %129 = tpu.reciprocal %128 {approx = true} : vector<34x1xf32> -> vector<34x1xf32>
    %130 = vector.broadcast %129 : vector<34x1xf32> to vector<34x34xf32>
    %131 = arith.mulf %126, %130 : vector<34x34xf32>
    %132 = arith.truncf %131 : vector<34x34xf32> to vector<34x34xbf16>
    %cst_61 = arith.constant dense<0.000000e+00> : vector<34x32xf32>
    %133 = tpu.matmul %132, %117, %cst_61 {dimension_numbers = #tpu.dot_dimension_numbers<[1], [0], [0], [1], [0, 0, 1, 1], [], []>} : vector<34x34xbf16>, vector<34x32xbf16>, vector<34x32xf32> -> vector<34x32xf32>
    %134 = arith.truncf %133 : vector<34x32xf32> to vector<34x32xbf16>
    %c0_62 = arith.constant 0 : index
    %c96_63 = arith.constant 96 : index
    %135 = vector.load %arg23[%c0_62, %c96_63] : memref<34x128xbf16, #tpu.memory_space<vmem>>, vector<34x32xbf16>
    tpu.vector_store %arg23[%c0_62, %c96_63], %134 {strides = array<i32>} : memref<34x128xbf16, #tpu.memory_space<vmem>>, vector<34x32xbf16>,
    %c0_64 = arith.constant 0 : index
    %c0_65 = arith.constant 0 : index
    %136 = vector.load %arg23[%c0_64, %c0_65] : memref<34x128xbf16, #tpu.memory_space<vmem>>, vector<34x128xbf16>
    %c0_66 = arith.constant 0 : index
    %c0_67 = arith.constant 0 : index
    %c0_68 = arith.constant 0 : index
    %137 = vector.load %arg12[%c0_66, %c0_67, %c0_68] : memref<1x128x128xbf16, #tpu.memory_space<vmem>>, vector<1x128x128xbf16>
    %138 = vector.shape_cast %137 : vector<1x128x128xbf16> to vector<128x128xbf16>
    %cst_69 = arith.constant dense<0.000000e+00> : vector<34x128xf32>
    %139 = tpu.matmul %136, %138, %cst_69 {dimension_numbers = #tpu.dot_dimension_numbers<[1], [0], [0], [1], [0, 0, 1, 1], [], []>} : vector<34x128xbf16>, vector<128x128xbf16>, vector<34x128xf32> -> vector<34x128xf32>
    %140 = arith.addf %3, %139 : vector<34x128xf32>
    %c0_70 = arith.constant 0 : index
    %c0_71 = arith.constant 0 : index
    %c0_72 = arith.constant 0 : index
    %141 = vector.load %arg13[%c0_70, %c0_71, %c0_72] : memref<1x1x128xf32, #tpu.memory_space<vmem>>, vector<1x1x128xf32>
    %142 = vector.shape_cast %141 : vector<1x1x128xf32> to vector<1x128xf32>
    %143 = vector.broadcast %142 : vector<1x128xf32> to vector<34x128xf32>
    %144 = arith.addf %140, %143 : vector<34x128xf32>
    %c0_73 = arith.constant 0 : index
    %c0_74 = arith.constant 0 : index
    %c0_75 = arith.constant 0 : index
    %145 = vector.load %arg8[%c0_73, %c0_74, %c0_75] : memref<1x1x128xf32, #tpu.memory_space<vmem>>, vector<1x1x128xf32>
    %146 = vector.shape_cast %145 : vector<1x1x128xf32> to vector<1x128xf32>
    %c0_76 = arith.constant 0 : index
    %c0_77 = arith.constant 0 : index
    %c0_78 = arith.constant 0 : index
    %147 = vector.load %arg9[%c0_76, %c0_77, %c0_78] : memref<1x1x128xf32, #tpu.memory_space<vmem>>, vector<1x1x128xf32>
    %148 = vector.shape_cast %147 : vector<1x1x128xf32> to vector<1x128xf32>
    %cst_79 = arith.constant dense<0.000000e+00> : vector<34xf32>
    %149 = vector.multi_reduction <add>, %144, %cst_79 [1] : vector<34x128xf32> to vector<34xf32>
    %150 = vector.shape_cast %149 : vector<34xf32> to vector<34x1xf32>
    %cst_80 = arith.constant 1.280000e+02 : f32
    %151 = vector.broadcast %cst_80 : f32 to vector<34x1xf32>
    %152 = arith.divf %150, %151 : vector<34x1xf32>
    %153 = vector.broadcast %152 : vector<34x1xf32> to vector<34x128xf32>
    %154 = arith.subf %144, %153 : vector<34x128xf32>
    %155 = arith.mulf %154, %154 : vector<34x128xf32>
    %cst_81 = arith.constant dense<0.000000e+00> : vector<34xf32>
    %156 = vector.multi_reduction <add>, %155, %cst_81 [1] : vector<34x128xf32> to vector<34xf32>
    %157 = vector.shape_cast %156 : vector<34xf32> to vector<34x1xf32>
    %cst_82 = arith.constant 1.280000e+02 : f32
    %158 = vector.broadcast %cst_82 : f32 to vector<34x1xf32>
    %159 = arith.divf %157, %158 : vector<34x1xf32>
    %160 = vector.broadcast %152 : vector<34x1xf32> to vector<34x128xf32>
    %161 = arith.subf %144, %160 : vector<34x128xf32>
    %cst_83 = arith.constant 9.99999974E-6 : f32
    %162 = vector.broadcast %cst_83 : f32 to vector<34x1xf32>
    %163 = arith.addf %159, %162 : vector<34x1xf32>
    %164 = math.rsqrt %163 : vector<34x1xf32>
    %165 = vector.broadcast %164 : vector<34x1xf32> to vector<34x128xf32>
    %166 = arith.mulf %161, %165 : vector<34x128xf32>
    %167 = vector.broadcast %146 : vector<1x128xf32> to vector<34x128xf32>
    %168 = arith.mulf %166, %167 : vector<34x128xf32>
    %169 = vector.broadcast %148 : vector<1x128xf32> to vector<34x128xf32>
    %170 = arith.addf %168, %169 : vector<34x128xf32>
    %171 = arith.truncf %170 : vector<34x128xf32> to vector<34x128xbf16>
    %c0_84 = arith.constant 0 : index
    %c0_85 = arith.constant 0 : index
    %c0_86 = arith.constant 0 : index
    %172 = vector.load %arg14[%c0_84, %c0_85, %c0_86] : memref<1x128x256xbf16, #tpu.memory_space<vmem>>, vector<1x128x256xbf16>
    %173 = vector.shape_cast %172 : vector<1x128x256xbf16> to vector<128x256xbf16>
    %cst_87 = arith.constant dense<0.000000e+00> : vector<34x256xf32>
    %174 = tpu.matmul %171, %173, %cst_87 {dimension_numbers = #tpu.dot_dimension_numbers<[1], [0], [0], [1], [0, 0, 1, 1], [], []>} : vector<34x128xbf16>, vector<128x256xbf16>, vector<34x256xf32> -> vector<34x256xf32>
    %c0_88 = arith.constant 0 : index
    %c0_89 = arith.constant 0 : index
    %c0_90 = arith.constant 0 : index
    %175 = vector.load %arg15[%c0_88, %c0_89, %c0_90] : memref<1x1x256xf32, #tpu.memory_space<vmem>>, vector<1x1x256xf32>
    %176 = vector.shape_cast %175 : vector<1x1x256xf32> to vector<1x256xf32>
    %177 = vector.broadcast %176 : vector<1x256xf32> to vector<34x256xf32>
    %178 = arith.addf %174, %177 : vector<34x256xf32>
    %cst_91 = arith.constant 5.000000e-01 : f32
    %179 = vector.broadcast %cst_91 : f32 to vector<34x256xf32>
    %180 = arith.mulf %179, %178 : vector<34x256xf32>
    %cst_92 = arith.constant 0.707106769 : f32
    %181 = vector.broadcast %cst_92 : f32 to vector<34x256xf32>
    %182 = arith.mulf %178, %181 : vector<34x256xf32>
    %183 = math.absf %182 : vector<34x256xf32>
    %cst_93 = arith.constant 0.327591091 : f32
    %184 = vector.broadcast %cst_93 : f32 to vector<34x256xf32>
    %185 = arith.mulf %184, %183 : vector<34x256xf32>
    %cst_94 = arith.constant 1.000000e+00 : f32
    %186 = vector.broadcast %cst_94 : f32 to vector<34x256xf32>
    %187 = arith.addf %186, %185 : vector<34x256xf32>
    %cst_95 = arith.constant 1.000000e+00 : f32
    %188 = vector.broadcast %cst_95 : f32 to vector<34x256xf32>
    %189 = arith.divf %188, %187 : vector<34x256xf32>
    %cst_96 = arith.constant 1.06140542 : f32
    %190 = vector.broadcast %cst_96 : f32 to vector<34x256xf32>
    %191 = arith.mulf %190, %189 : vector<34x256xf32>
    %cst_97 = arith.constant -1.45315206 : f32
    %192 = vector.broadcast %cst_97 : f32 to vector<34x256xf32>
    %193 = arith.addf %191, %192 : vector<34x256xf32>
    %194 = arith.mulf %193, %189 : vector<34x256xf32>
    %cst_98 = arith.constant 1.42141378 : f32
    %195 = vector.broadcast %cst_98 : f32 to vector<34x256xf32>
    %196 = arith.addf %194, %195 : vector<34x256xf32>
    %197 = arith.mulf %196, %189 : vector<34x256xf32>
    %cst_99 = arith.constant -0.284496725 : f32
    %198 = vector.broadcast %cst_99 : f32 to vector<34x256xf32>
    %199 = arith.addf %197, %198 : vector<34x256xf32>
    %200 = arith.mulf %199, %189 : vector<34x256xf32>
    %cst_100 = arith.constant 0.254829586 : f32
    %201 = vector.broadcast %cst_100 : f32 to vector<34x256xf32>
    %202 = arith.addf %200, %201 : vector<34x256xf32>
    %203 = arith.mulf %202, %189 : vector<34x256xf32>
    %204 = arith.mulf %183, %183 : vector<34x256xf32>
    %cst_101 = arith.constant 0.000000e+00 : f32
    %205 = vector.broadcast %cst_101 : f32 to vector<34x256xf32>
    %206 = arith.subf %205, %204 : vector<34x256xf32>
    %207 = math.exp %206 : vector<34x256xf32>
    %208 = arith.mulf %203, %207 : vector<34x256xf32>
    %cst_102 = arith.constant 1.000000e+00 : f32
    %209 = vector.broadcast %cst_102 : f32 to vector<34x256xf32>
    %210 = arith.subf %209, %208 : vector<34x256xf32>
    %cst_103 = arith.constant 0.000000e+00 : f32
    %211 = vector.broadcast %cst_103 : f32 to vector<34x256xf32>
    %212 = arith.cmpf olt, %182, %211 : vector<34x256xf32>
    %cst_104 = arith.constant 0.000000e+00 : f32
    %213 = vector.broadcast %cst_104 : f32 to vector<34x256xf32>
    %214 = arith.subf %213, %210 : vector<34x256xf32>
    %215 = arith.select %212, %214, %210 : vector<34x256xi1>, vector<34x256xf32>
    %cst_105 = arith.constant 1.000000e+00 : f32
    %216 = vector.broadcast %cst_105 : f32 to vector<34x256xf32>
    %217 = arith.addf %216, %215 : vector<34x256xf32>
    %218 = arith.mulf %180, %217 : vector<34x256xf32>
    %219 = arith.truncf %218 : vector<34x256xf32> to vector<34x256xbf16>
    %c0_106 = arith.constant 0 : index
    %c0_107 = arith.constant 0 : index
    %c0_108 = arith.constant 0 : index
    %220 = vector.load %arg16[%c0_106, %c0_107, %c0_108] : memref<1x256x128xbf16, #tpu.memory_space<vmem>>, vector<1x256x128xbf16>
    %221 = vector.shape_cast %220 : vector<1x256x128xbf16> to vector<256x128xbf16>
    %cst_109 = arith.constant dense<0.000000e+00> : vector<34x128xf32>
    %222 = tpu.matmul %219, %221, %cst_109 {dimension_numbers = #tpu.dot_dimension_numbers<[1], [0], [0], [1], [0, 0, 1, 1], [], []>} : vector<34x256xbf16>, vector<256x128xbf16>, vector<34x128xf32> -> vector<34x128xf32>
    %223 = arith.addf %144, %222 : vector<34x128xf32>
    %c0_110 = arith.constant 0 : index
    %c0_111 = arith.constant 0 : index
    %c0_112 = arith.constant 0 : index
    %224 = vector.load %arg17[%c0_110, %c0_111, %c0_112] : memref<1x1x128xf32, #tpu.memory_space<vmem>>, vector<1x1x128xf32>
    %225 = vector.shape_cast %224 : vector<1x1x128xf32> to vector<1x128xf32>
    %226 = vector.broadcast %225 : vector<1x128xf32> to vector<34x128xf32>
    %227 = arith.addf %223, %226 : vector<34x128xf32>
    %c0_113 = arith.constant 0 : index
    %c0_114 = arith.constant 0 : index
    %228 = vector.load %arg21[%c0_113, %c0_114] : memref<34x128xf32, #tpu.memory_space<vmem>>, vector<34x128xf32>
    tpu.vector_store %arg21[%c0_113, %c0_114], %227 {strides = array<i32>} : memref<34x128xf32, #tpu.memory_space<vmem>>, vector<34x128xf32>,
    %c2_i32 = arith.constant 2 : i32
    %229 = arith.cmpi eq, %arg1, %c2_i32 : i32
    %230 = arith.extui %229 : i1 to i32
    %c0_i32_115 = arith.constant 0 : i32
    %231 = arith.cmpi ne, %230, %c0_i32_115 : i32
    scf.if %231 {
      %c0_116 = arith.constant 0 : index
      %c0_117 = arith.constant 0 : index
      %232 = vector.load %arg18[%c0_116, %c0_117] : memref<1x128xf32, #tpu.memory_space<vmem>>, vector<1x128xf32>
      %c0_118 = arith.constant 0 : index
      %c0_119 = arith.constant 0 : index
      %233 = vector.load %arg19[%c0_118, %c0_119] : memref<1x128xf32, #tpu.memory_space<vmem>>, vector<1x128xf32>
      %c0_120 = arith.constant 0 : index
      %c0_121 = arith.constant 0 : index
      %234 = vector.load %arg21[%c0_120, %c0_121] : memref<34x128xf32, #tpu.memory_space<vmem>>, vector<1x128xf32>
      %cst_122 = arith.constant dense<0.000000e+00> : vector<1xf32>
      %235 = vector.multi_reduction <add>, %234, %cst_122 [1] : vector<1x128xf32> to vector<1xf32>
      %236 = vector.shape_cast %235 : vector<1xf32> to vector<1x1xf32>
      %cst_123 = arith.constant 1.280000e+02 : f32
      %237 = vector.broadcast %cst_123 : f32 to vector<1x1xf32>
      %238 = arith.divf %236, %237 : vector<1x1xf32>
      %239 = vector.broadcast %238 : vector<1x1xf32> to vector<1x128xf32>
      %240 = arith.subf %234, %239 : vector<1x128xf32>
      %241 = arith.mulf %240, %240 : vector<1x128xf32>
      %cst_124 = arith.constant dense<0.000000e+00> : vector<1xf32>
      %242 = vector.multi_reduction <add>, %241, %cst_124 [1] : vector<1x128xf32> to vector<1xf32>
      %243 = vector.shape_cast %242 : vector<1xf32> to vector<1x1xf32>
      %cst_125 = arith.constant 1.280000e+02 : f32
      %244 = vector.broadcast %cst_125 : f32 to vector<1x1xf32>
      %245 = arith.divf %243, %244 : vector<1x1xf32>
      %246 = vector.broadcast %238 : vector<1x1xf32> to vector<1x128xf32>
      %247 = arith.subf %234, %246 : vector<1x128xf32>
      %cst_126 = arith.constant 9.99999974E-6 : f32
      %248 = vector.broadcast %cst_126 : f32 to vector<1x1xf32>
      %249 = arith.addf %245, %248 : vector<1x1xf32>
      %250 = math.rsqrt %249 : vector<1x1xf32>
      %251 = vector.broadcast %250 : vector<1x1xf32> to vector<1x128xf32>
      %252 = arith.mulf %247, %251 : vector<1x128xf32>
      %253 = arith.mulf %252, %232 : vector<1x128xf32>
      %254 = arith.addf %253, %233 : vector<1x128xf32>
      %c0_127 = arith.constant 0 : index
      %c0_128 = arith.constant 0 : index
      %c0_129 = arith.constant 0 : index
      %255 = vector.load %arg20[%c0_127, %c0_128, %c0_129] : memref<1x2x128xf32, #tpu.memory_space<vmem>>, vector<1x1x128xf32>
      %256 = vector.shape_cast %255 : vector<1x1x128xf32> to vector<1x128xf32>
      %257 = vector.shape_cast %254 : vector<1x128xf32> to vector<1x1x128xf32>
      tpu.vector_store %arg20[%c0_127, %c0_128, %c0_129], %257 {strides = array<i32>} : memref<1x2x128xf32, #tpu.memory_space<vmem>>, vector<1x1x128xf32>,
      %c17 = arith.constant 17 : index
      %c0_130 = arith.constant 0 : index
      %258 = vector.load %arg21[%c17, %c0_130] : memref<34x128xf32, #tpu.memory_space<vmem>>, vector<1x128xf32>
      %cst_131 = arith.constant dense<0.000000e+00> : vector<1xf32>
      %259 = vector.multi_reduction <add>, %258, %cst_131 [1] : vector<1x128xf32> to vector<1xf32>
      %260 = vector.shape_cast %259 : vector<1xf32> to vector<1x1xf32>
      %cst_132 = arith.constant 1.280000e+02 : f32
      %261 = vector.broadcast %cst_132 : f32 to vector<1x1xf32>
      %262 = arith.divf %260, %261 : vector<1x1xf32>
      %263 = vector.broadcast %262 : vector<1x1xf32> to vector<1x128xf32>
      %264 = arith.subf %258, %263 : vector<1x128xf32>
      %265 = arith.mulf %264, %264 : vector<1x128xf32>
      %cst_133 = arith.constant dense<0.000000e+00> : vector<1xf32>
      %266 = vector.multi_reduction <add>, %265, %cst_133 [1] : vector<1x128xf32> to vector<1xf32>
      %267 = vector.shape_cast %266 : vector<1xf32> to vector<1x1xf32>
      %cst_134 = arith.constant 1.280000e+02 : f32
      %268 = vector.broadcast %cst_134 : f32 to vector<1x1xf32>
      %269 = arith.divf %267, %268 : vector<1x1xf32>
      %270 = vector.broadcast %262 : vector<1x1xf32> to vector<1x128xf32>
      %271 = arith.subf %258, %270 : vector<1x128xf32>
      %cst_135 = arith.constant 9.99999974E-6 : f32
      %272 = vector.broadcast %cst_135 : f32 to vector<1x1xf32>
      %273 = arith.addf %269, %272 : vector<1x1xf32>
      %274 = math.rsqrt %273 : vector<1x1xf32>
      %275 = vector.broadcast %274 : vector<1x1xf32> to vector<1x128xf32>
      %276 = arith.mulf %271, %275 : vector<1x128xf32>
      %277 = arith.mulf %276, %232 : vector<1x128xf32>
      %278 = arith.addf %277, %233 : vector<1x128xf32>
      %c0_136 = arith.constant 0 : index
      %c1 = arith.constant 1 : index
      %c0_137 = arith.constant 0 : index
      %279 = vector.load %arg20[%c0_136, %c1, %c0_137] : memref<1x2x128xf32, #tpu.memory_space<vmem>>, vector<1x1x128xf32>
      %280 = vector.shape_cast %279 : vector<1x1x128xf32> to vector<1x128xf32>
      %281 = vector.shape_cast %278 : vector<1x128xf32> to vector<1x1x128xf32>
      tpu.vector_store %arg20[%c0_136, %c1, %c0_137], %281 {strides = array<i32>} : memref<1x2x128xf32, #tpu.memory_space<vmem>>, vector<1x1x128xf32>,
    } else {
    }
    return
  }
  func.func @transform_0(%arg0: i32, %arg1: i32) -> (i32, i32, i32) {
    %c0_i32 = arith.constant 0 : i32
    %c0_i32_0 = arith.constant 0 : i32
    %c0_i32_1 = arith.constant 0 : i32
    return %arg0, %c0_i32, %c0_i32_0 : i32, i32, i32
  }
  func.func @transform_1(%arg0: i32, %arg1: i32) -> (i32, i32) {
    %c0_i32 = arith.constant 0 : i32
    %c0_i32_0 = arith.constant 0 : i32
    %c0_i32_1 = arith.constant 0 : i32
    return %c0_i32, %c0_i32_0 : i32, i32
  }
  func.func @transform_2(%arg0: i32, %arg1: i32) -> (i32, i32) {
    %c0_i32 = arith.constant 0 : i32
    %c0_i32_0 = arith.constant 0 : i32
    %c0_i32_1 = arith.constant 0 : i32
    return %c0_i32, %c0_i32_0 : i32, i32
  }
  func.func @transform_3(%arg0: i32, %arg1: i32) -> (i32, i32) {
    %c0_i32 = arith.constant 0 : i32
    %c0_i32_0 = arith.constant 0 : i32
    %c0_i32_1 = arith.constant 0 : i32
    return %c0_i32, %c0_i32_0 : i32, i32
  }
  func.func @transform_4(%arg0: i32, %arg1: i32) -> (i32, i32, i32) {
    %c0_i32 = arith.constant 0 : i32
    %c0_i32_0 = arith.constant 0 : i32
    %c0_i32_1 = arith.constant 0 : i32
    return %arg1, %c0_i32, %c0_i32_0 : i32, i32, i32
  }
  func.func @transform_5(%arg0: i32, %arg1: i32) -> (i32, i32, i32) {
    %c0_i32 = arith.constant 0 : i32
    %c0_i32_0 = arith.constant 0 : i32
    %c0_i32_1 = arith.constant 0 : i32
    return %arg1, %c0_i32, %c0_i32_0 : i32, i32, i32
  }
  func.func @transform_6(%arg0: i32, %arg1: i32) -> (i32, i32, i32) {
    %c0_i32 = arith.constant 0 : i32
    %c0_i32_0 = arith.constant 0 : i32
    %c0_i32_1 = arith.constant 0 : i32
    return %arg1, %c0_i32, %c0_i32_0 : i32, i32, i32
  }
  func.func @transform_7(%arg0: i32, %arg1: i32) -> (i32, i32, i32) {
    %c0_i32 = arith.constant 0 : i32
    %c0_i32_0 = arith.constant 0 : i32
    %c0_i32_1 = arith.constant 0 : i32
    return %arg1, %c0_i32, %c0_i32_0 : i32, i32, i32
  }
  func.func @transform_8(%arg0: i32, %arg1: i32) -> (i32, i32, i32) {
    %c0_i32 = arith.constant 0 : i32
    %c0_i32_0 = arith.constant 0 : i32
    %c0_i32_1 = arith.constant 0 : i32
    return %arg1, %c0_i32, %c0_i32_0 : i32, i32, i32
  }
  func.func @transform_9(%arg0: i32, %arg1: i32) -> (i32, i32, i32) {
    %c0_i32 = arith.constant 0 : i32
    %c0_i32_0 = arith.constant 0 : i32
    %c0_i32_1 = arith.constant 0 : i32
    return %arg1, %c0_i32, %c0_i32_0 : i32, i32, i32
  }
  func.func @transform_10(%arg0: i32, %arg1: i32) -> (i32, i32, i32) {
    %c0_i32 = arith.constant 0 : i32
    %c0_i32_0 = arith.constant 0 : i32
    %c0_i32_1 = arith.constant 0 : i32
    return %arg1, %c0_i32, %c0_i32_0 : i32, i32, i32
  }
  func.func @transform_11(%arg0: i32, %arg1: i32) -> (i32, i32, i32) {
    %c0_i32 = arith.constant 0 : i32
    %c0_i32_0 = arith.constant 0 : i32
    %c0_i32_1 = arith.constant 0 : i32
    return %arg1, %c0_i32, %c0_i32_0 : i32, i32, i32
  }
  func.func @transform_12(%arg0: i32, %arg1: i32) -> (i32, i32, i32) {
    %c0_i32 = arith.constant 0 : i32
    %c0_i32_0 = arith.constant 0 : i32
    %c0_i32_1 = arith.constant 0 : i32
    return %arg1, %c0_i32, %c0_i32_0 : i32, i32, i32
  }
  func.func @transform_13(%arg0: i32, %arg1: i32) -> (i32, i32, i32) {
    %c0_i32 = arith.constant 0 : i32
    %c0_i32_0 = arith.constant 0 : i32
    %c0_i32_1 = arith.constant 0 : i32
    return %arg1, %c0_i32, %c0_i32_0 : i32, i32, i32
  }
  func.func @transform_14(%arg0: i32, %arg1: i32) -> (i32, i32, i32) {
    %c0_i32 = arith.constant 0 : i32
    %c0_i32_0 = arith.constant 0 : i32
    %c0_i32_1 = arith.constant 0 : i32
    return %arg1, %c0_i32, %c0_i32_0 : i32, i32, i32
  }
  func.func @transform_15(%arg0: i32, %arg1: i32) -> (i32, i32, i32) {
    %c0_i32 = arith.constant 0 : i32
    %c0_i32_0 = arith.constant 0 : i32
    %c0_i32_1 = arith.constant 0 : i32
    return %arg1, %c0_i32, %c0_i32_0 : i32, i32, i32
  }
  func.func @transform_16(%arg0: i32, %arg1: i32) -> (i32, i32) {
    %c0_i32 = arith.constant 0 : i32
    %c0_i32_0 = arith.constant 0 : i32
    %c0_i32_1 = arith.constant 0 : i32
    return %c0_i32, %c0_i32_0 : i32, i32
  }
  func.func @transform_17(%arg0: i32, %arg1: i32) -> (i32, i32) {
    %c0_i32 = arith.constant 0 : i32
    %c0_i32_0 = arith.constant 0 : i32
    %c0_i32_1 = arith.constant 0 : i32
    return %c0_i32, %c0_i32_0 : i32, i32
  }
  func.func @transform_18(%arg0: i32, %arg1: i32) -> (i32, i32, i32) {
    %c0_i32 = arith.constant 0 : i32
    %c0_i32_0 = arith.constant 0 : i32
    %c0_i32_1 = arith.constant 0 : i32
    return %arg0, %c0_i32, %c0_i32_0 : i32, i32, i32
  }
}

</mosaic_0001>

<bundles_post_ra>
// kernel: tile.9
= control target key start
LH: loop header
LB: loop body
LE: loop exit
PB: predicated region body
PF: predicated region fallthrough
CT: control target
= control target key end

     0   :  { %s9_s6 = smov 3  ;;  %s69_s0 = inlined_call_operand.vmem [shape: f32[2,17,128], index: 0, kind: input, shape index: {}]   ;;  %s70_s1 = inlined_call_operand.vmem [shape: f32[34,128], index: 1, kind: output, shape index: {}]  }
   0x1   :  { %v2_v0 = vld [vmem:[%s69_s0] sm:$0xff]   ;;  %v21_v1 = vld [vmem:[%s69_s0 + $0x8] sm:$0xff]  }
   0x2   :  { %v23_v2 = vld [vmem:[%s69_s0 + $0x10] ss:$8 sm:%s9_s6]   ;;  %3 = vst [vmem:[%s70_s1] sm:$0xff] %v2_v0   ;;  %22 = vst [vmem:[%s70_s1 + $0x8] sm:$0xff] %v21_v1  }
   0x3   :  { %24 = vst [vmem:[%s70_s1 + $0x10] sm:$0x3] %v23_v2   ;;  %v25_v3 = vld [vmem:[%s69_s0 + $0x19] sm:$0xff]   ;;  %v27_v4 = vld [vmem:[%s69_s0 + $0x21] sm:$0xff]  }
   0x4   :  { %26 = vst [vmem:[%s70_s1 + $0x12] sm:$0xff] %v25_v3   ;;  %28 = vst [vmem:[%s70_s1 + $0x1a] sm:$0xff] %v27_v4  }

// kernel: eq.8
= control target key start
LH: loop header
LB: loop body
LE: loop exit
PB: predicated region body
PF: predicated region fallthrough
CT: control target
= control target key end

     0   :  { %vm7_vm0 = vcmask 138240   ;;  %vm13_vm1 = vcmask 277640   ;;  %s39_s0 = inlined_call_operand.vmem [shape: s32[2,17], index: 0, kind: input, shape index: {}]   ;;  %s40_s1 = inlined_call_operand.vmem [shape: s32[34], index: 1, kind: output, shape index: {}]  }
   0x1   :  { %v4_v0 = vld [vmem:[%s39_s0] sm:$0x3]  ;;  %s22_s0 = smov 17  }
   0x2   :  { %5 = vst [vmem:[#allocation1] sm:$0x3] %v4_v0 }
   0x9   :  { %v10_v1 = vld [vmem:[#allocation1 + $0x1] sm:$0x1]   ;;  %v6_v2 = vld [vmem:[#allocation1] sm:$0x1]  }
   0xa   :  { %11 = vrot.lane.b32.xlu0 %v10_v1, %s22_s0  ;;  %8 = vst.msk [vmem:[#allocation0] sm:$0x1] %vm7_vm0, %v6_v2  }
  0x7c   :  { %v12_v3 = vpop.permute.xlu0 %11  }
  0x7d   :  { %14 = vst.msk [vmem:[#allocation0] sm:$0x1] %vm13_vm1, %v12_v3  }
  0x84   :  { %v18_v4 = vld [vmem:[#allocation0] sm:$0x1] }
  0x85   :  { %20 = vst [vmem:[%s40_s1] sm:$0x1] %v18_v4 }

// kernel: vit_encoder_forward.1
= control target key start
LH: loop header
LB: loop body
LE: loop exit
PB: predicated region body
PF: predicated region fallthrough
CT: control target
= control target key end

     0   :  { %s5735_s0 = inlined_call_operand.vmem [shape: f32[2,34,48], index: 0, kind: input, shape index: {}]   ;;  %s5736_s1 = inlined_call_operand.vmem [shape: f32[34,128], index: 1, kind: input, shape index: {}]   ;;  %s5737_s2 = inlined_call_operand.vmem [shape: f32[34,34], index: 2, kind: input, shape index: {}]   ;;  %s5738_s3 = inlined_call_operand.vmem [shape: bf16[48,128], index: 3, kind: input, shape index: {}]   ;;  %s5739_s4 = inlined_call_operand.vmem [shape: f32[3,1,128], index: 4, kind: input, shape index: {}]   ;;  %s5740_s5 = inlined_call_operand.vmem [shape: f32[3,1,128], index: 5, kind: input, shape index: {}]   ;;  %s5741_s6 = inlined_call_operand.vmem [shape: f32[3,1,128], index: 6, kind: input, shape index: {}]   ;;  %s5742_s7 = inlined_call_operand.vmem [shape: f32[3,1,128], index: 7, kind: input, shape index: {}]   ;;  %s5743_s8 = inlined_call_operand.vmem [shape: bf16[3,128,384], index: 8, kind: input, shape index: {}]   ;;  %s5744_s9 = inlined_call_operand.vmem [shape: f32[3,1,384], index: 9, kind: input, shape index: {}]   ;;  %s5745_s10 = inlined_call_operand.vmem [shape: bf16[3,128,128], index: 10, kind: input, shape index: {}]   ;;  %s5746_s11 = inlined_call_operand.vmem [shape: f32[3,1,128], index: 11, kind: input, shape index: {}]   ;;  %s5747_s12 = inlined_call_operand.vmem [shape: bf16[3,128,256], index: 12, kind: input, shape index: {}]   ;;  %s5748_s13 = inlined_call_operand.vmem [shape: f32[3,1,256], index: 13, kind: input, shape index: {}]   ;;  %s5749_s14 = inlined_call_operand.vmem [shape: bf16[3,256,128], index: 14, kind: input, shape index: {}]   ;;  %s5750_s15 = inlined_call_operand.vmem [shape: f32[3,1,128], index: 15, kind: input, shape index: {}]   ;;  %s5751_s16 = inlined_call_operand.vmem [shape: f32[1,128], index: 16, kind: input, shape index: {}]   ;;  %s5752_s17 = inlined_call_operand.vmem [shape: f32[1,128], index: 17, kind: input, shape index: {}]   ;;  %s5753_s18 = inlined_call_operand.hbm [shape: f32[2,2,128], index: 18, kind: output, shape index: {}]  }
   0x1   :  { %5772 = sst [smem:[#allocation21_spill]] %s5735_s0 }
   0x2   :  { %5773 = sst [smem:[#allocation22_spill]] %s5736_s1 }
   0x3   :  { %5774 = sst [smem:[#allocation23_spill]] %s5737_s2 }
   0x4   :  { %5775 = sst [smem:[#allocation24_spill]] %s5738_s3 }
   0x5   :  { %5776 = sst [smem:[#allocation25_spill]] %s5739_s4 }
   0x6   :  { %5777 = sst [smem:[#allocation26_spill]] %s5742_s7 }
   0x7   :  { %5778 = sst [smem:[#allocation27_spill]] %s5743_s8 }
   0x8   :  { %5779 = sst [smem:[#allocation28_spill]] %s5744_s9 }
   0x9   :  { %5780 = sst [smem:[#allocation29_spill]] %s5751_s16 }
   0xa   :  { %5781 = sst [smem:[#allocation30_spill]] %s5752_s17 }
   0xb   :  { %5782 = sst [smem:[#allocation31_spill]] %s5753_s18 }
   0xc   :  { %23 = vsyncpa [#allocation6], 0 }
   0xd   :  { %25 = vsyncpa [#allocation6 + $0x1], 0  ;;  %s4632_s27 = smov 0   ;;  %s4634_s28 = smov 0  }
   0xe   :  { %s4636_s29 = smov 0   ;;  %s4638_s30 = smov 0  }
   0xf   :  { %s4640_s0 = smov 0   ;;  %s4642_s19 = smov 0  }
  0x10   :  { %s4644_s1 = smov 0   ;;  %s4646_s20 = smov 0  }
  0x11 LB: > { %5783 = sst [smem:[#allocation8_spill]] %s4498_s27  ;;  %s3614_s21 = sadd.s32 4294967295, %s4526_s20   ;;  %s4526_s20 = sphi %s4646_s20, %s31_s20   ;;  %s4522_s1 = sphi %s4644_s1, %s5834_s1   ;;  %s4518_s19 = sphi %s4642_s19, %s5833_s19   ;;  %s4514_s0 = sphi %s4640_s0, %s5832_s0   ;;  %s4510_s30 = sphi %s4638_s30, %s5831_s30   ;;  %s4506_s29 = sphi %s4636_s29, %s5830_s29   ;;  %s4502_s28 = sphi %s4634_s28, %s5829_s28   ;;  %s4498_s27 = sphi %s4632_s27, %s5828_s27  }
  0x12   : > { %5784 = sst [smem:[#allocation9_spill]] %s4502_s28  ;;  %s3615_s22 = sadd.s32 4294967294, %s4526_s20  }
  0x13   : > { %5785 = sst [smem:[#allocation10_spill]] %s4506_s29  ;;  %s40_s2 = sadd.s32 1, %s4518_s19 }
  0x14   : > { %5786 = sst [smem:[#allocation11_spill]] %s4510_s30  ;;  %p41_p0 = scmp.ge.s32.totalorder %s40_s2, 3 }
  0x15   : > { %5787 = sst [smem:[#allocation12_spill]] %s4514_s0  ;;  %s43_s23 = sadd.s32 1, %s4522_s1 }
  0x16   : > { %5788 = sst [smem:[#allocation13_spill]] %s4518_s19  ;;  %p503_p1 = scmp.ne.s32.totalorder %s4506_s29, %s4502_s28 }
  0x17   : > { %5789 = sst [smem:[#allocation14_spill]] %s4522_s1  ;;  %p504_p2 = scmp.eq.s32.totalorder %s3614_s21, 5 }
  0x18   : > { %5790 = sst [smem:[#allocation15_spill]] %s4526_s20  ;;  %s5836_s2 = smov (%p41_p0, %s40_s2), 0 }
  0x19   : > { %5791 = sst [smem:[#allocation16_spill]] %s5836_s2  ;;  %s5838_s23 = smov (!%p41_p0, %s43_s23), %s4522_s1 }
  0x1a   : > { %p4681_p3 = por %p504_p2, %p503_p1  ;;  %p509_p4 = scmp.ne.s32.totalorder %s4502_s28, %s4498_s27 }
  0x1b   : > { %p45_p5 = scmp.ge.s32.totalorder %s5838_s23, 2  ;;  %p510_p6 = scmp.eq.s32.totalorder %s3615_s22, 5 }
  0x1c   : > { %s5792_s24 = scalar_select %p4681_p3, 1, 0 }
  0x1d   : > { %p3618_p7 = scmp.ge.s32.totalorder %s4526_s20, 1  ;;  %p633_p8 = scmp.lt.s32.totalorder %s4526_s20, 7 }
  0x1e   : > { %5793 = sst [smem:[#allocation17_spill]] %s5792_s24  ;;  %s5840_s23 = smov (%p45_p5, %s5838_s23), 0 }
  0x1f   : > { %5794 = sst [smem:[#allocation18_spill]] %s5840_s23  ;;  %p4691_p9 = por %p510_p6, %p509_p4 }
  0x20   : > { %p634_p10 = pnand %p3618_p7, %p633_p8  ;;  %s490_s26 = ssub.s32 %s4522_s1, %s5840_s23 }
  0x21   : > { %s5795_s25 = scalar_select %p4691_p9, 1, 0 }
  0x22   : > { %s493_s21 = sadd.s32 1, %s4506_s29  ;;  %p491_p11 = scmp.eq.s32.totalorder %s490_s26, 0 }
  0x23   : > { %5796 = sst [smem:[#allocation19_spill]] %s5795_s25  ;;  %637 = sbr.rel (%p634_p10) target bundleno = 3369 (0xd29), region = 92 }
  0x24   : > { %s4699_s2 = scalar_select %p491_p11, %s4506_s29, %s493_s21  }
  0x25   : > { %s5761_s22 = sand.u32 (!%p634_p10), 1, %s4502_s28   ;;  %p733_p12 = scmp.lt.s32.totalorder (!%p634_p10), %s4514_s0, 1 }
  0x26   : > { %5797 = sst [smem:[#allocation20_spill]] %s4699_s2  ;;  %s3619_s19 = sshll.u32 (!%p634_p10), %s5761_s22, 1 }
  0x27   : > { %p738_p13 = scmp.lt.s32.totalorder (!%p634_p10), %s4510_s30, 2  ;;  %s5799_s24 = sld [smem:[#allocation21_spill]] (!%p634_p10) }
  0x28   : > { %s5801_s8 = sld [smem:[#allocation27_spill]] (!%p634_p10)  ;;  %s5802_s9 = sld [smem:[#allocation28_spill]] (!%p634_p10) }
  0x2a   : > { %s734_s27 = scalar_select %p733_p12, %s4514_s0, 1 }
  0x2b   : > { %s4708_s25 = scalar_select %p738_p13, %s4510_s30, 2 }
  0x2c   : > { %s4115_s26 = smul.u32 40, %s734_s27  ;;  %s4774_s30 = scalar_lea.vmem [#allocation5], %s3619_s19 }
  0x2d   : > { %s4116_s23 = smul.u32 192, %s4708_s25  ;;  %s3758_s1 = sshll.u32 %s4708_s25, 6 }
  0x2e   : > { %s4721_s28 = scalar_lea.vmem %s5799_s24, %s4115_s26  ;;  %s4117_s21 = smul.u32 3, %s4708_s25 }
  0x2f   : > { %s4737_s22 = scalar_lea.vmem %s5801_s8, %s4116_s23  ;;  %s4742_s24 = scalar_lea.vmem %s5745_s10, %s3758_s1 }
  0x30   : > { %s4747_s0 = scalar_lea.vmem %s5802_s9, %s4117_s21  ;;  %s3759_s16 = sshll.u32 %s4708_s25, 7 }
  0x31   : > { %s3626_s29 = sshll.u32 %s4708_s25, 1  ;;  %s4758_s23 = scalar_lea.vmem %s5747_s12, %s3759_s16 }
  0x32   : > { %s4763_s1 = scalar_lea.vmem %s5748_s13, %s3626_s29  ;;  %s4768_s21 = scalar_lea.vmem %s5749_s14, %s3759_s16 }
  0x33   : > { %s783_s27 = scalar_lea.vmem %s5750_s15, %s4708_s25  ;;  %s5803_s8 = sld [smem:[#allocation11_spill]] }
  0x39   : > { %p3629_p0 = scmp.ne.s32.totalorder %s5803_s8, 0 }
  0x3a   : > { %s5804_s9 = sld [smem:[#allocation24_spill]] (!%p3629_p0)  ;;  %v4528_v1 = vmov (!%p3629_p0), 0.0   ;;  %vm4529_vm0 = vmmov (!%p3629_p0), 0   ;;  %v791_v4 = vld [vmem:[%s4721_s28 + $0x10] sm:$0xff] (!%p3629_p0)  ;;  %v792_v5 = vld [vmem:[%s4721_s28 + $0x18] sm:$0xff] (!%p3629_p0)  ;;  %v789_v6 = vld [vmem:[%s4721_s28] sm:$0xff] (!%p3629_p0) }
  0x3b   : > { %788 = sbr.rel (%p3629_p0) target bundleno = 299 (0x12b), region = 96  ;;  %4109 = vmatprep.subr.bf16.mxu1 (!%p3629_p0), %v4528_v1  ;;  %3891 = vmatprep.subr.bf16.mxu0 (!%p3629_p0), %v4528_v1  ;;  %v790_v7 = vld [vmem:[%s4721_s28 + $0x8] sm:$0xff] (!%p3629_p0)  ;;  %v795_v8 = vpack.c.bf16 (!%p3629_p0), %v792_v5, %v791_v4  ;;  %vm826_vm1 = vcmask (!%p3629_p0), 392192   ;;  %v793_v10 = vld [vmem:[%s4721_s28 + $0x20] sm:$0x3] (!%p3629_p0)  ;;  %s5805_s20 = sld [smem:[#allocation22_spill]] (!%p3629_p0) }
  0x3c   : > { %3901 = vmatprep.mubr.msk.bf16.mxu1 (!%p3629_p0), %vm4529_vm0, %v4528_v1  ;;  %3897 = vmatprep.mubr.msk.bf16.mxu0 (!%p3629_p0), %vm4529_vm0, %v4528_v1  ;;  %v794_v9 = vpack.c.bf16 (!%p3629_p0), %v790_v7, %v789_v6  ;;  %v796_v11 = vpack.c.bf16 (!%p3629_p0), %v793_v10, %v793_v10 }
  0x40   : > { %v4197_v0 = vld [vmem:[%s5804_s9] sm:$0xff] (!%p3629_p0)   ;;  %v4198_v2 = vld [vmem:[%s5804_s9 + $0x8] sm:$0xff] (!%p3629_p0)   ;;  %v4199_v3 = vld [vmem:[%s5804_s9 + $0x10] sm:$0xff] (!%p3629_p0)  }
  0x41   : > { %4112 = vmatpush3.bf16.msra.mxu1 (!%p3629_p0), %v4197_v0  ;;  %3892 = vmatpush3.bf16.msra.mxu0 (!%p3629_p0), %v4197_v0  ;;  %s5806_s26 = smov (!%p3629_p0), %s5805_s20  ;;  %v805_v12 = vld [vmem:[%s5805_s20 + $0x10] sm:$0xff] (!%p3629_p0) }
  0x42   : > { %4110 = vmatprep.subr.bf16.mxu1 %v4528_v1  ;;  %3893 = vmatprep.subr.bf16.mxu0 %v4528_v1  ;;  %v803_v13 = vld [vmem:[%s5806_s26] sm:$0xff]  ;;  %v806_v15 = vld [vmem:[%s5806_s26 + $0x18] sm:$0xff]  ;;  %v804_v17 = vld [vmem:[%s5806_s26 + $0x8] sm:$0xff] }
  0x43   : > { %v807_v28 = vld [vmem:[%s5806_s26 + $0x20] sm:$0x3] }
  0x45   : > { %4113 = vmatpush3.bf16.msra.mxu1 %v4198_v2  ;;  %3894 = vmatpush3.bf16.msra.mxu0 %v4198_v2 }
  0x46   : > { %4111 = vmatprep.subr.bf16.mxu1 %v4528_v1  ;;  %3895 = vmatprep.subr.bf16.mxu0 %v4528_v1 }
  0x49   : > { %4114 = vmatpush3.bf16.msra.mxu1 %v4199_v3  ;;  %3896 = vmatpush3.bf16.msra.mxu0 %v4199_v3 }
  0x4c   : > { %3902 = vmatmul.mubr.msk.bf16.vlgmr.msra.gmra.mrb[0].mxu1 %vm826_vm1, %v795_v8  ;;  %3898 = vmatmul.mubr.msk.bf16.vlgmr.msra.gmra.mrb[0].mxu0 %vm826_vm1, %v794_v9 }
  0x4d   : > { %3905 = vmatprep.mubr.msk.bf16.mxu1 %vm4529_vm0, %v4528_v1 }
  0x54   : > { %3906 = vmatmul.mubr.msk.bf16.gmra.mrb[4].mxu1 %vm826_vm1, %v796_v11 }
 0x11f   : > { %v878_v14 = vpop.f32.mrb[0].mxu1  ;;  %v870_v16 = vpop.f32.mrb[0].mxu0 }
 0x120   : > { %v879_v18 = vadd.f32 %v878_v14, %v805_v12  ;;  %v3903_v19 = vpop.f32.mrb[1].mxu1  ;;  %v871_v20 = vadd.f32 %v870_v16, %v803_v13  ;;  %v3899_v21 = vpop.f32.mrb[1].mxu0 }
 0x121   : > { %v881_v22 = vpop.f32.mrb[2].mxu1  ;;  %v873_v23 = vpop.f32.mrb[2].mxu0 }
 0x122   : > { %894 = vst [vmem:[#allocation2 + $0x10] sm:$0xff] %v879_v18  ;;  %v882_v24 = vadd.f32 %v881_v22, %v806_v15  ;;  %892 = vst [vmem:[#allocation2] sm:$0xff] %v871_v20  ;;  %v3904_v25 = vpop.f32.mrb[3].mxu1  ;;  %v874_v26 = vadd.f32 %v873_v23, %v804_v17  ;;  %v3900_v27 = vpop.f32.mrb[3].mxu0 }
 0x124   : > { %895 = vst [vmem:[#allocation2 + $0x18] sm:$0xff] %v882_v24  ;;  %893 = vst [vmem:[#allocation2 + $0x8] sm:$0xff] %v874_v26 }
 0x127   : > { %v886_v29 = vpop.f32.mrb[4].mxu1 }
 0x128   : > { %v887_v30 = vadd.f32 %v886_v29, %v807_v28  ;;  %v3907_v31 = vpop.f32.mrb[5].mxu1 }
 0x129   : > { %v889_v32 = vpop.f32.mrb[6].mxu1 }
 0x12a   : > { %896 = vst [vmem:[#allocation2 + $0x20] sm:$0x3] %v887_v30  ;;  %v3908_v33 = vpop.f32.mrb[7].mxu1 }
 0x12b PF: > { %v897_v34 = vld [vmem:[#allocation2] sm:$0xff]  ;;  %v899_v35 = vld [vmem:[#allocation2 + $0x10] sm:$0xff]  ;;  %v898_v36 = vld [vmem:[#allocation2 + $0x8] sm:$0xff]  ;;  %vm912_vm2 = vcmask 1041408   ;;  %v4530_v42 = vmov 0.0   ;;  %v4531_v20 = vmov 0   ;;  %s5809_s3 = scalar_lea.vmem %s5740_s5, %s4708_s25  ;;  %s5813_s29 = scalar_lea.vmem %s5741_s6, %s4708_s25 }
 0x12c   : > { %904 = vadd.xlane.f32.xlu0 %v897_v34  ;;  %908 = vadd.xlane.f32.xlu1 %v899_v35  ;;  %v900_v37 = vld [vmem:[#allocation2 + $0x18] sm:$0xff]  ;;  %v4200_v40 = vld [vmem:[%s4737_s22 + $0x4] ss:$12 sps:$4 sm:$0xff]   ;;  %v4202_v41 = vld [vmem:[%s4737_s22] ss:$12 sps:$4 sm:$0xff]   ;;  %vm4532_vm3 = vmmov 0  }
 0x12d   : > { %3909 = vmatprep.subr.bf16.mxu1 %v4530_v42  ;;  %v4203_v43 = vld [vmem:[%s4737_s22 + $0x8] ss:$12 sps:$4 sm:$0xff]   ;;  %1165 = vmatprep.subr.bf16.mxu0 %v4200_v40  ;;  %v4206_v2 = vld [vmem:[%s4737_s22 + $0x18] ss:$12 sps:$4 sm:$0xff]   ;;  %v4207_v3 = vld [vmem:[%s4737_s22 + $0x20] ss:$12 sps:$4 sm:$0xff]  }
 0x12e   : > { %v4204_v44 = vld [vmem:[%s4737_s22 + $0x1c] ss:$12 sps:$4 sm:$0xff]   ;;  %1166 = vmatpush1.bf16.msra.mxu0 %v4202_v41  ;;  %3910 = vmatpush3.bf16.msra.mxu1 %v4203_v43  ;;  %v4208_v4 = vld [vmem:[%s4737_s22 + $0x34] ss:$12 sps:$4 sm:$0xff]   ;;  %v4211_v6 = vld [vmem:[%s4737_s22 + $0x38] ss:$12 sps:$4 sm:$0xff]  }
 0x12f   : > { %1167 = vmatprep.subr.bf16.mxu0 %v4204_v44  ;;  %3911 = vmatprep.subr.bf16.mxu1 %v4530_v42  ;;  %v4210_v5 = vld [vmem:[%s4737_s22 + $0x30] ss:$12 sps:$4 sm:$0xff]   ;;  %v4212_v7 = vld [vmem:[%s4737_s22 + $0x4c] ss:$12 sps:$4 sm:$0xff]   ;;  %v4214_v8 = vld [vmem:[%s4737_s22 + $0x48] ss:$12 sps:$4 sm:$0xff]  }
 0x130   : > { %906 = vadd.xlane.f32.xlu0 %v898_v36  ;;  %910 = vadd.xlane.f32.xlu1 %v900_v37  ;;  %v4215_v9 = vld [vmem:[%s4737_s22 + $0x50] ss:$12 sps:$4 sm:$0xff]   ;;  %v4218_v11 = vld [vmem:[%s4737_s22 + $0x60] ss:$12 sps:$4 sm:$0xff]   ;;  %v4219_v12 = vld [vmem:[%s4737_s22 + $0x68] ss:$12 sps:$4 sm:$0xff]  }
 0x131   : > { %v901_v38 = vld [vmem:[#allocation2 + $0x20] sm:$0x3]  ;;  %v4216_v10 = vld [vmem:[%s4737_s22 + $0x64] ss:$12 sps:$4 sm:$0xff]   ;;  %v4220_v13 = vld [vmem:[%s4737_s22 + $0x7c] ss:$12 sps:$4 sm:$0xff]   ;;  %1197 = vmatprep.mubr.bf16.mxu0 %v4531_v20  ;;  %3925 = vmatprep.mubr.msk.bf16.mxu1 %vm4532_vm3, %v4530_v42 }
 0x132   : > { %v913_v39 = vsel %vm912_vm2, %v901_v38, 0.0  ;;  %1168 = vmatpush1.bf16.msra.mxu0 %v4206_v2  ;;  %3912 = vmatpush3.bf16.msra.mxu1 %v4207_v3  ;;  %v4222_v14 = vld [vmem:[%s4737_s22 + $0x78] ss:$12 sps:$4 sm:$0xff]   ;;  %v4223_v15 = vld [vmem:[%s4737_s22 + $0x80] ss:$12 sps:$4 sm:$0xff]   ;;  %s5807_s2 = sld [smem:[#allocation25_spill]] }
 0x133   : > { %3913 = vmatprep.subr.bf16.mxu1 %v4530_v42  ;;  %1169 = vmatprep.subr.bf16.mxu0 %v4208_v4  ;;  %v4224_v16 = vld [vmem:[%s4737_s22 + $0x94] ss:$12 sps:$4 sm:$0xff]   ;;  %v4226_v17 = vld [vmem:[%s4737_s22 + $0x90] ss:$12 sps:$4 sm:$0xff]   ;;  %v4227_v18 = vld [vmem:[%s4737_s22 + $0x98] ss:$12 sps:$4 sm:$0xff]  }
 0x134   : > { %914 = vadd.xlane.f32.xlu0 %v913_v39  ;;  %v4228_v19 = vld [vmem:[%s4737_s22 + $0xac] ss:$12 sps:$4 sm:$0xff]   ;;  %v4230_v21 = vld [vmem:[%s4737_s22 + $0xa8] ss:$12 sps:$4 sm:$0xff]   ;;  %v4231_v22 = vld [vmem:[%s4737_s22 + $0xb0] ss:$12 sps:$4 sm:$0xff]  }
 0x135   : > { %v1020_v4 = vld [vmem:[%s4747_s0] sm:$0x7]  ;;  %vm1326_vm4 = vcmask 261120   ;;  %s4533_s0 = smov 96   ;;  %s4534_s7 = smov 64   ;;  %vm1480_vm5 = vcmask 1040384  }
 0x136   : > { %1170 = vmatpush1.bf16.msra.mxu0 %v4210_v5  ;;  %3914 = vmatpush3.bf16.msra.mxu1 %v4211_v6  ;;  %s4535_s4 = smov 32   ;;  %s5810_s28 = sld [smem:[#allocation23_spill]]  ;;  %vm1411_vm6 = vcmask 277504   ;;  %vm1424_vm7 = vcmask 271360   ;;  %vm1561_vm8 = vcmask 257024   ;;  %vm1566_vm9 = vcmask 253952  }
 0x137   : > { %3915 = vmatprep.subr.bf16.mxu1 %v4530_v42  ;;  %1171 = vmatprep.subr.bf16.mxu0 %v4212_v7  ;;  %vm1862_vm10 = vcmask 519424   ;;  %vm2163_vm11 = vcmask 781824   ;;  %vm2464_vm12 = vcmask 1044224   ;;  %vm1867_vm13 = vcmask 516352   ;;  %s5814_s19 = sld [smem:[#allocation26_spill]] }
 0x138   : > { %s5808_s18 = scalar_lea.vmem %s5807_s2, %s4708_s25  ;;  %vm2168_vm14 = vcmask 778752   ;;  %vm2469_vm15 = vcmask 1041152  }
 0x139   : > { %v3636_v40 = vld [vmem:[%s5808_s18] ss:$0 sm:$0xff] }
 0x13a   : > { %1172 = vmatpush1.bf16.msra.mxu0 %v4214_v8  ;;  %3916 = vmatpush3.bf16.msra.mxu1 %v4215_v9 }
 0x13b   : > { %3917 = vmatprep.subr.bf16.mxu1 %v4530_v42  ;;  %1173 = vmatprep.subr.bf16.mxu0 %v4216_v10 }
 0x13c   : > { %s5811_s8 = smov %s5810_s28 }
 0x13d   : > { %s5815_s2 = scalar_lea.vmem %s5814_s19, %s4708_s25 }
 0x13e   : > { %1174 = vmatpush1.bf16.msra.mxu0 %v4218_v11  ;;  %3918 = vmatpush3.bf16.msra.mxu1 %v4219_v12 }
 0x13f   : > { %3919 = vmatprep.subr.bf16.mxu1 %v4530_v42  ;;  %1175 = vmatprep.subr.bf16.mxu0 %v4220_v13 }
 0x142   : > { %1176 = vmatpush1.bf16.msra.mxu0 %v4222_v14  ;;  %3920 = vmatpush3.bf16.msra.mxu1 %v4223_v15 }
 0x143   : > { %1177 = vmatprep.subr.bf16.mxu0 %v4224_v16  ;;  %3921 = vmatprep.subr.bf16.mxu1 %v4530_v42 }
 0x146   : > { %1178 = vmatpush1.bf16.msra.mxu0 %v4226_v17  ;;  %3922 = vmatpush3.bf16.msra.mxu1 %v4227_v18 }
 0x147   : > { %1179 = vmatprep.subr.bf16.mxu0 %v4228_v19  ;;  %3923 = vmatprep.subr.bf16.mxu1 %v4530_v42 }
 0x14a   : > { %1180 = vmatpush1.bf16.msra.mxu0 %v4230_v21  ;;  %3924 = vmatpush3.bf16.msra.mxu1 %v4231_v22 }
 0x14b   : > { %3937 = vmatprep.subr.bf16.mxu1 %v4530_v42  ;;  %3973 = vmatprep.subr.bf16.mxu0 %v4530_v42 }
 0x1b9   : > { %v905_v45 = vpop.xlane.xlu0 %904  ;;  %v909_v46 = vpop.xlane.xlu1 %908 }
 0x1ba   : > { %v917_v47 = vmul.f32 0.0078125, %v905_v45  ;;  %v919_v48 = vmul.f32 0.0078125, %v909_v46  ;;  %v3637_v46 = vld [vmem:[%s5809_s3] ss:$0 sm:$0xff] }
 0x1bc   : > { %v4816_v49 = vsub.f32 %v897_v34, %v917_v47  ;;  %v4818_v50 = vsub.f32 %v899_v35, %v919_v48 }
 0x1bd   : > { %v907_v51 = vpop.xlane.xlu0 %906  ;;  %v911_v52 = vpop.xlane.xlu1 %910 }
 0x1be   : > { %v918_v53 = vmul.f32 0.0078125, %v907_v51  ;;  %v927_v54 = vmul.f32 %v4816_v49, %v4816_v49  ;;  %v920_v55 = vmul.f32 0.0078125, %v911_v52  ;;  %v929_v57 = vmul.f32 %v4818_v50, %v4818_v50 }
 0x1c0   : > { %v4822_v56 = vsub.f32 %v898_v36, %v918_v53  ;;  %932 = vadd.xlane.f32.xlu1 %v927_v54  ;;  %v4826_v58 = vsub.f32 %v900_v37, %v920_v55 }
 0x1c1   : > { %v915_v59 = vpop.xlane.xlu0 %914 }
 0x1c2   : > { %v921_v60 = vmul.f32 0.0078125, %v915_v59  ;;  %v928_v61 = vmul.f32 %v4822_v56, %v4822_v56  ;;  %v930_v63 = vmul.f32 %v4826_v58, %v4826_v58 }
 0x1c4   : > { %v4830_v62 = vsub.f32 %v901_v38, %v921_v60  ;;  %936 = vadd.xlane.f32.xlu1 %v929_v57  ;;  %934 = vadd.xlane.f32.xlu0 %v928_v61 }
 0x1c6   : > { %v931_v0 = vmul.f32 %v4830_v62, %v4830_v62 }
 0x1c8   : > { %938 = vadd.xlane.f32.xlu0 %v930_v63  ;;  %v940_v1 = vsel %vm912_vm2, %v931_v0, 0.0 }
 0x1c9   : > { %941 = vadd.xlane.f32.xlu1 %v940_v1 }
 0x24d   : > { %v933_v23 = vpop.xlane.xlu1 %932 }
 0x24e   : > { %v943_v24 = vmul.f32 0.0078125, %v933_v23 }
 0x250   : > { %v948_v25 = vadd.f32 1e-05, %v943_v24 }
 0x251   : > { %v937_v26 = vpop.xlane.xlu1 %936  ;;  %v935_v27 = vpop.xlane.xlu0 %934 }
 0x252   : > { %4283 = vrsqrt.f32 %v948_v25  ;;  %v945_v28 = vmul.f32 0.0078125, %v937_v26  ;;  %v944_v29 = vmul.f32 0.0078125, %v935_v27 }
 0x254   : > { %v949_v30 = vadd.f32 1e-05, %v944_v29  ;;  %v950_v31 = vadd.f32 1e-05, %v945_v28 }
 0x255   : > { %v939_v32 = vpop.xlane.xlu0 %938 }
 0x256   : > { %v946_v33 = vmul.f32 0.0078125, %v939_v32  ;;  %v942_v34 = vpop.xlane.xlu1 %941  ;;  %4285 = vrsqrt.f32 %v949_v30 }
 0x257   : > { %v947_v35 = vmul.f32 0.0078125, %v942_v34  ;;  %4287 = vrsqrt.f32 %v950_v31 }
 0x258   : > { %v951_v36 = vadd.f32 1e-05, %v946_v33 }
 0x259   : > { %v952_v37 = vadd.f32 1e-05, %v947_v35 }
 0x25a   : > { %4289 = vrsqrt.f32 %v951_v36 }
 0x25b   : > { %4291 = vrsqrt.f32 %v952_v37 }
 0x25c   : > { %v4284_v38 = vpop.eup %4283 }
 0x25d   : > { %v958_v39 = vmul.f32 %v4284_v38, %v4816_v49 }
 0x25f   : > { %v969_v44 = vmul.f32 %v3636_v40, %v958_v39 }
 0x260   : > { %v4286_v41 = vpop.eup %4285 }
 0x261   : > { %v959_v43 = vmul.f32 %v4286_v41, %v4822_v56  ;;  %v4288_v45 = vpop.eup %4287  ;;  %v980_v51 = vadd.f32 %v3637_v46, %v969_v44 }
 0x262   : > { %v960_v53 = vmul.f32 %v4288_v45, %v4818_v50 }
 0x263   : > { %v970_v48 = vmul.f32 %v3636_v40, %v959_v43 }
 0x264   : > { %v4290_v47 = vpop.eup %4289  ;;  %v971_v56 = vmul.f32 %v3636_v40, %v960_v53 }
 0x265   : > { %v961_v49 = vmul.f32 %v4290_v47, %v4826_v58  ;;  %v981_v52 = vadd.f32 %v3637_v46, %v970_v48  ;;  %v4292_v57 = vpop.eup %4291 }
 0x266   : > { %v962_v60 = vmul.f32 %v4292_v57, %v4830_v62  ;;  %v982_v61 = vadd.f32 %v3637_v46, %v971_v56  ;;  %v1022_v62 = vlaneseq }
 0x267   : > { %v985_v54 = vpack.c.bf16 %v981_v52, %v980_v51  ;;  %v972_v55 = vmul.f32 %v3636_v40, %v961_v49 }
 0x268   : > { %v973_v63 = vmul.f32 %v3636_v40, %v962_v60  ;;  %v4893_v1 = vshrl.u32 %v1022_v62, 7 }
 0x269   : > { %1198 = vmatmul.mubr.bf16.vlgmr.msra.gmra.mrb[0].mxu0 %v985_v54  ;;  %3926 = vmatmul.mubr.bf16.vlgmr.msra.gmra.mrb[0].mxu1 %v985_v54  ;;  %v983_v59 = vadd.f32 %v3637_v46, %v972_v55 }
 0x26a   : > { %1207 = vmatprep.mubr.bf16.mxu0 %v4531_v20  ;;  %3929 = vmatprep.mubr.msk.bf16.mxu1 %vm4532_vm3, %v4530_v42  ;;  %v984_v50 = vadd.f32 %v3637_v46, %v973_v63  ;;  %v1024_v2 = vsub.s32 0, %v4893_v1  ;;  %v1032_v3 = vsub.s32 2, %v4893_v1  ;;  %v1028_v5 = vsub.s32 1, %v4893_v1 }
 0x26b   : > { %v986_v58 = vpack.c.bf16 %v983_v59, %v982_v61 }
 0x26c   : > { %v987_v0 = vpack.c.bf16 %v984_v50, %v984_v50  ;;  %v1025_v6 = vrot.slane %v1020_v4, %v1024_v2  ;;  %v1033_v7 = vrot.slane %v1020_v4, %v1032_v3  ;;  %v1029_v8 = vrot.slane %v1020_v4, %v1028_v5 }
 0x271   : > { %1208 = vmatmul.mubr.bf16.gmra.mrb[4].mxu0 %v986_v58  ;;  %3930 = vmatmul.mubr.bf16.gmra.mrb[4].mxu1 %v986_v58 }
 0x272   : > { %1217 = vmatprep.mubr.bf16.mxu0 %v4531_v20  ;;  %3933 = vmatprep.mubr.msk.bf16.mxu1 %vm4532_vm3, %v4530_v42 }
 0x279   : > { %1218 = vmatmul.mubr.bf16.gmra.mrb[8].mxu0 %v987_v0  ;;  %3934 = vmatmul.mubr.bf16.gmra.mrb[8].mxu1 %v987_v0 }
 0x27a   : > { %3943 = vmatprep.mubr.msk.bf16.mxu1 %vm4532_vm3, %v4530_v42  ;;  %3979 = vmatprep.mubr.msk.bf16.mxu0 %vm4532_vm3, %v4530_v42 }
 0x33c   : > { %v1199_v9 = vpop.f32.mrb[0].mxu0  ;;  %v1260_v10 = vpop.f32.mrb[0].mxu1 }
 0x33d   : > { %v1200_v11 = vadd.f32 %v1199_v9, %v1025_v6  ;;  %v1261_v12 = vadd.f32 %v1260_v10, %v1033_v7  ;;  %v1201_v13 = vpop.f32.mrb[1].mxu0  ;;  %v3927_v14 = vpop.f32.mrb[1].mxu1 }
 0x33e   : > { %v1202_v15 = vadd.f32 %v1201_v13, %v1029_v8  ;;  %v1203_v16 = vpop.f32.mrb[2].mxu0  ;;  %v1263_v17 = vpop.f32.mrb[2].mxu1 }
 0x33f   : > { %1284 = vst [vmem:[#allocation3 + $0x10] sm:$0xff] %v1261_v12  ;;  %v1204_v18 = vadd.f32 %v1203_v16, %v1025_v6  ;;  %v1264_v19 = vadd.f32 %v1263_v17, %v1033_v7  ;;  %v1205_v21 = vpop.f32.mrb[3].mxu0  ;;  %v3928_v22 = vpop.f32.mrb[3].mxu1 }
 0x340   : > { %v1206_v23 = vadd.f32 %v1205_v21, %v1029_v8 }
 0x341   : > { %1287 = vst [vmem:[#allocation3 + $0x28] sm:$0xff] %v1264_v19  ;;  %v4903_v24 = vpack.c.bf16 %v1204_v18, %v1200_v11  ;;  %v4905_v25 = vpack.c.bf16 %v1264_v19, %v1261_v12 }
 0x342   : > { %v1581_v26 = vpack.c.bf16 %v1206_v23, %v1202_v15 }
 0x344   : > { %v1209_v27 = vpop.f32.mrb[4].mxu0  ;;  %v1268_v28 = vpop.f32.mrb[4].mxu1  ;;  %1604 = vrot.lane.b32.xlu0 %v1581_v26, %s4533_s0  ;;  %v1337_v29 = vsel %vm1326_vm4, %v1581_v26, 0 }
 0x345   : > { %v1210_v30 = vadd.f32 %v1209_v27, %v1025_v6  ;;  %v1269_v31 = vadd.f32 %v1268_v28, %v1033_v7  ;;  %v1211_v32 = vpop.f32.mrb[5].mxu0  ;;  %v3931_v33 = vpop.f32.mrb[5].mxu1  ;;  %3938 = vmatpush3.bf16.xpose.msra.mxu1 %v1337_v29 }
 0x346   : > { %v1212_v34 = vadd.f32 %v1211_v32, %v1029_v8  ;;  %v1213_v35 = vpop.f32.mrb[6].mxu0  ;;  %v1271_v36 = vpop.f32.mrb[6].mxu1  ;;  %3939 = vmatprep.subr.bf16.mxu1 %v4530_v42 }
 0x347   : > { %1290 = vst [vmem:[#allocation3 + $0x40] sm:$0xff] %v1269_v31  ;;  %v1214_v37 = vadd.f32 %v1213_v35, %v1025_v6  ;;  %v1272_v38 = vadd.f32 %v1271_v36, %v1033_v7  ;;  %v1215_v39 = vpop.f32.mrb[7].mxu0  ;;  %v3932_v40 = vpop.f32.mrb[7].mxu1 }
 0x348   : > { %v1216_v41 = vadd.f32 %v1215_v39, %v1029_v8  ;;  %1905 = vrot.lane.b32.xlu0 %v1581_v26, %s4534_s7 }
 0x349   : > { %1293 = vst [vmem:[#allocation3 + $0x58] sm:$0xff] %v1272_v38  ;;  %v1574_v43 = vpack.c.bf16 %v1214_v37, %v1210_v30  ;;  %v4911_v44 = vpack.c.bf16 %v1272_v38, %v1269_v31 }
 0x34a   : > { %v1883_v45 = vpack.c.bf16 %v1216_v41, %v1212_v34 }
 0x34c   : > { %v1219_v46 = vpop.f32.mrb[8].mxu0  ;;  %v1276_v47 = vpop.f32.mrb[8].mxu1  ;;  %1907 = vrot.lane.b32.xlu0 %v1883_v45, %s4534_s7  ;;  %1606 = vrot.lane.b32.xlu1 %v1883_v45, %s4533_s0  ;;  %v1340_v48 = vsel %vm1326_vm4, %v1883_v45, 0 }
 0x34d   : > { %v1220_v49 = vadd.f32 %v1219_v46, %v1025_v6  ;;  %v1277_v51 = vadd.f32 %v1276_v47, %v1033_v7  ;;  %v1221_v52 = vpop.f32.mrb[9].mxu0  ;;  %v3935_v53 = vpop.f32.mrb[9].mxu1  ;;  %3940 = vmatpush3.bf16.xpose.msra.mxu1 %v1340_v48 }
 0x34e   : > { %v1222_v54 = vadd.f32 %v1221_v52, %v1029_v8  ;;  %v1223_v55 = vpop.f32.mrb[10].mxu0  ;;  %v1279_v57 = vpop.f32.mrb[10].mxu1  ;;  %3941 = vmatprep.subr.bf16.mxu1 %v4530_v42 }
 0x34f   : > { %1294 = vst [vmem:[#allocation3 + $0x60] sm:$0x3] %v1220_v49  ;;  %1296 = vst [vmem:[#allocation3 + $0x70] sm:$0x3] %v1277_v51  ;;  %v1224_v56 = vpop.f32.mrb[11].mxu0  ;;  %v3936_v59 = vpop.f32.mrb[11].mxu1 }
 0x350   : > { %1295 = vst [vmem:[#allocation3 + $0x68] sm:$0x3] %v1222_v54  ;;  %v5004_v49 = vld [vmem:[%s5810_s28] sm:$0xff]  ;;  %v5009_v54 = vld [vmem:[%s5811_s8 + $0x8] sm:$0xff] }
 0x356   : > { %v1572_v4 = vld [vmem:[#allocation3 + $0x60] sm:$0x3]  ;;  %v1322_v8 = vld [vmem:[#allocation3 + $0x70] sm:$0x3] }
 0x357   : > { %v1881_v60 = vld [vmem:[#allocation3 + $0x68] sm:$0x3]  ;;  %v1575_v7 = vpack.c.bf16 %v1572_v4, %v1572_v4  ;;  %v1325_v9 = vpack.c.bf16 %v1322_v8, %v1322_v8  ;;  %v1873_v11 = vld [vmem:[#allocation3 + $0x60] sm:$0x3] }
 0x358   : > { %v1580_v61 = vld [vmem:[#allocation3 + $0x68] sm:$0x3]  ;;  %v1884_v63 = vpack.c.bf16 %v1881_v60, %v1881_v60  ;;  %v1306_v12 = vld [vmem:[#allocation3 + $0x60] sm:$0x3]  ;;  %v1876_v13 = vpack.c.bf16 %v1873_v11, %v1873_v11  ;;  %v5042_v11 = vld [vmem:[%s5811_s8 + $0x20] sm:$0x3] }
 0x359   : > { %v1314_v58 = vld [vmem:[#allocation3 + $0x68] sm:$0x3]  ;;  %v1583_v50 = vpack.c.bf16 %v1580_v61, %v1580_v61  ;;  %v1482_v10 = vsel %vm1480_vm5, %v1325_v9, 0  ;;  %v1309_v14 = vpack.c.bf16 %v1306_v12, %v1306_v12  ;;  %v2174_v15 = vld [vmem:[#allocation3 + $0x60] sm:$0x3] }
 0x35a   : > { %v1317_v0 = vpack.c.bf16 %v1314_v58, %v1314_v58  ;;  %1909 = vrot.lane.b32.xlu0 %v1884_v63, %s4534_s7  ;;  %v2182_v3 = vld [vmem:[#allocation3 + $0x68] sm:$0x3]  ;;  %v2177_v16 = vpack.c.bf16 %v2174_v15, %v2174_v15 }
 0x35b   : > { %1608 = vrot.lane.b32.xlu1 %v1583_v50, %s4533_s0  ;;  %v2185_v6 = vpack.c.bf16 %v2182_v3, %v2182_v3  ;;  %v5024_v63 = vld [vmem:[%s5811_s8 + $0x10] sm:$0xff]  ;;  %v5029_v3 = vld [vmem:[%s5811_s8 + $0x18] sm:$0xff] }
 0x35c   : > { %v1343_v62 = vsel %vm1326_vm4, %v1317_v0, 0 }
 0x35d   : > { %3942 = vmatpush3.bf16.xpose.msra.mxu1 %v1343_v62 }
 0x35e   : > { %3955 = vmatprep.subr.bf16.mxu1 %v4530_v42  ;;  %2206 = vrot.lane.b32.xlu0 %v1581_v26, %s4535_s4 }
 0x35f   : > { %1595 = vrot.lane.b32.xlu1 %v4903_v24, %s4533_s0 }
 0x362   : > { %2208 = vrot.lane.b32.xlu0 %v1883_v45, %s4535_s4 }
 0x363   : > { %1597 = vrot.lane.b32.xlu1 %v1574_v43, %s4533_s0 }
 0x364   : > { %3944 = vmatmul.mubr.msk.bf16.vlgmr.msra.gmra.mrb[12].mxu1 %vm1326_vm4, %v4903_v24 }
 0x365   : > { %3956 = vmatpush3.bf16.msra.mxu1 %v4905_v25  ;;  %3947 = vmatprep.mubr.msk.bf16.mxu1 %vm4532_vm3, %v4530_v42 }
 0x366   : > { %3957 = vmatprep.subr.bf16.mxu1 %v4530_v42  ;;  %2210 = vrot.lane.b32.xlu0 %v2185_v6, %s4535_s4 }
 0x367   : > { %1599 = vrot.lane.b32.xlu1 %v1575_v7, %s4533_s0 }
 0x369   : > { %3958 = vmatpush3.bf16.msra.mxu1 %v4911_v44 }
 0x36a   : > { %3959 = vmatprep.subr.bf16.mxu1 %v4530_v42  ;;  %2199 = vrot.lane.b32.xlu0 %v1574_v43, %s4535_s4 }
 0x36b   : > { %1896 = vrot.lane.b32.xlu1 %v4903_v24, %s4534_s7 }
 0x36c   : > { %3948 = vmatmul.mubr.msk.bf16.gmra.mrb[16].mxu1 %vm1326_vm4, %v1574_v43 }
 0x36d   : > { %3960 = vmatpush3.bf16.msra.mxu1 %v1482_v10  ;;  %3951 = vmatprep.mubr.msk.bf16.mxu1 %vm4532_vm3, %v4530_v42 }
 0x36e   : > { %3991 = vmatprep.subr.bf16.mxu1 %v4530_v42  ;;  %1755 = vrot.lane.b32.xlu0 %v4905_v25, %s4533_s0 }
 0x36f   : > { %1898 = vrot.lane.b32.xlu1 %v1574_v43, %s4534_s7 }
 0x373   : > { %1900 = vrot.lane.b32.xlu1 %v1876_v13, %s4534_s7 }
 0x374   : > { %3952 = vmatmul.mubr.msk.bf16.gmra.mrb[20].mxu1 %vm1326_vm4, %v1309_v14 }
 0x375   : > { %3961 = vmatprep.mubr.msk.bf16.mxu1 %vm4532_vm3, %v4530_v42 }
 0x377   : > { %2197 = vrot.lane.b32.xlu1 %v4903_v24, %s4535_s4 }
 0x37b   : > { %2201 = vrot.lane.b32.xlu1 %v2177_v16, %s4535_s4 }
 0x37f   : > { %1757 = vrot.lane.b32.xlu1 %v4911_v44, %s4533_s0 }
 0x3b6   : > { %v1605_v17 = vpop.permute.xlu0 %1604 }
 0x3b7   : > { %v1620_v18 = vsel %vm1326_vm4, %v1605_v17, 0 }
 0x3b8   : > { %3974 = vmatpush3.bf16.xpose.msra.mxu0 %v1620_v18 }
 0x3b9   : > { %3975 = vmatprep.subr.bf16.mxu0 %v4530_v42 }
 0x3ba   : > { %v1906_v24 = vpop.permute.xlu0 %1905 }
 0x3bb   : > { %v1921_v27 = vsel %vm1326_vm4, %v1906_v24, 0 }
 0x3be   : > { %v1607_v19 = vpop.permute.xlu1 %1606  ;;  %v1908_v28 = vpop.permute.xlu0 %1907 }
 0x3bf   : > { %v1623_v21 = vsel %vm1326_vm4, %v1607_v19, 0  ;;  %v1924_v30 = vsel %vm1326_vm4, %v1908_v28, 0 }
 0x3c0   : > { %3976 = vmatpush3.bf16.xpose.msra.mxu0 %v1623_v21 }
 0x3c1   : > { %3977 = vmatprep.subr.bf16.mxu0 %v4530_v42 }
 0x3cc   : > { %v1910_v31 = vpop.permute.xlu0 %1909 }
 0x3cd   : > { %v1609_v22 = vpop.permute.xlu1 %1608  ;;  %v1927_v33 = vsel %vm1326_vm4, %v1910_v31, 0 }
 0x3ce   : > { %v1626_v23 = vsel %vm1326_vm4, %v1609_v22, 0 }
 0x3cf   : > { %3978 = vmatpush3.bf16.xpose.msra.mxu0 %v1626_v23 }
 0x3d0   : > { %4009 = vmatprep.subr.bf16.mxu0 %v4530_v42  ;;  %v2207_v34 = vpop.permute.xlu0 %2206 }
 0x3d1   : > { %v1596_v26 = vpop.permute.xlu1 %1595  ;;  %v2222_v36 = vsel %vm1326_vm4, %v2207_v34, 0 }
 0x3d4   : > { %v2209_v37 = vpop.permute.xlu0 %2208 }
 0x3d5   : > { %v1598_v29 = vpop.permute.xlu1 %1597  ;;  %v2225_v39 = vsel %vm1326_vm4, %v2209_v37, 0 }
 0x3d6   : > { %3980 = vmatmul.mubr.msk.bf16.vlgmr.msra.gmra.mrb[12].mxu0 %vm1326_vm4, %v1596_v26 }
 0x3d7   : > { %4010 = vmatpush3.bf16.xpose.msra.mxu0 %v1921_v27  ;;  %3983 = vmatprep.mubr.msk.bf16.mxu0 %vm4532_vm3, %v4530_v42 }
 0x3d8   : > { %4011 = vmatprep.subr.bf16.mxu0 %v4530_v42  ;;  %v2211_v40 = vpop.permute.xlu0 %2210 }
 0x3d9   : > { %v1600_v32 = vpop.permute.xlu1 %1599  ;;  %v2228_v43 = vsel %vm1326_vm4, %v2211_v40, 0 }
 0x3dc   : > { %v2200_v46 = vpop.permute.xlu0 %2199 }
 0x3dd   : > { %v1897_v35 = vpop.permute.xlu1 %1896 }
 0x3de   : > { %3984 = vmatmul.mubr.msk.bf16.gmra.mrb[16].mxu0 %vm1326_vm4, %v1598_v29 }
 0x3df   : > { %4012 = vmatpush3.bf16.xpose.msra.mxu0 %v1924_v30  ;;  %3987 = vmatprep.mubr.msk.bf16.mxu0 %vm4532_vm3, %v4530_v42 }
 0x3e0   : > { %4013 = vmatprep.subr.bf16.mxu0 %v4530_v42 }
 0x3e1   : > { %v1899_v38 = vpop.permute.xlu1 %1898 }
 0x3e5   : > { %v1901_v41 = vpop.permute.xlu1 %1900 }
 0x3e6   : > { %3988 = vmatmul.mubr.msk.bf16.gmra.mrb[20].mxu0 %vm1326_vm4, %v1600_v32 }
 0x3e7   : > { %4014 = vmatpush3.bf16.xpose.msra.mxu0 %v1927_v33  ;;  %4015 = vmatprep.mubr.msk.bf16.mxu0 %vm4532_vm3, %v4530_v42 }
 0x3e8   : > { %4045 = vmatprep.subr.bf16.mxu0 %v4530_v42 }
 0x3e9   : > { %v2198_v45 = vpop.permute.xlu1 %2197 }
 0x3ed   : > { %v2202_v47 = vpop.permute.xlu1 %2201 }
 0x3ee   : > { %4016 = vmatmul.mubr.msk.bf16.vlgmr.msra.gmra.mrb[24].mxu0 %vm1326_vm4, %v1897_v35 }
 0x3ef   : > { %4046 = vmatpush3.bf16.xpose.msra.mxu0 %v2222_v36  ;;  %4019 = vmatprep.mubr.msk.bf16.mxu0 %vm4532_vm3, %v4530_v42 }
 0x3f0   : > { %4047 = vmatprep.subr.bf16.mxu0 %v4530_v42 }
 0x3f6   : > { %4020 = vmatmul.mubr.msk.bf16.gmra.mrb[28].mxu0 %vm1326_vm4, %v1899_v38 }
 0x3f7   : > { %4048 = vmatpush3.bf16.xpose.msra.mxu0 %v2225_v39  ;;  %4023 = vmatprep.mubr.msk.bf16.mxu0 %vm4532_vm3, %v4530_v42 }
 0x3f8   : > { %4049 = vmatprep.subr.bf16.mxu0 %v4530_v42 }
 0x3fe   : > { %4024 = vmatmul.mubr.msk.bf16.gmra.mrb[32].mxu0 %vm1326_vm4, %v1901_v41  ;;  %v1588_v41 = vld [vmem:[#allocation3 + $0x70] sm:$0x3] }
 0x3ff   : > { %4050 = vmatpush3.bf16.xpose.msra.mxu0 %v2228_v43  ;;  %4051 = vmatprep.mubr.msk.bf16.mxu0 %vm4532_vm3, %v4530_v42 }
 0x400   : > { %4081 = vmatprep.subr.bf16.mxu0 %v4530_v42 }
 0x406   : > { %4052 = vmatmul.mubr.msk.bf16.vlgmr.msra.gmra.mrb[36].mxu0 %vm1326_vm4, %v2198_v45 }
 0x407   : > { %4055 = vmatprep.mubr.msk.bf16.mxu0 %vm4532_vm3, %v4530_v42 }
 0x40e   : > { %4056 = vmatmul.mubr.msk.bf16.gmra.mrb[40].mxu0 %vm1326_vm4, %v2200_v46  ;;  %v1591_v46 = vpack.c.bf16 %v1588_v41, %v1588_v41 }
 0x40f   : > { %4059 = vmatprep.mubr.msk.bf16.mxu0 %vm4532_vm3, %v4530_v42 }
 0x416   : > { %4060 = vmatmul.mubr.msk.bf16.gmra.mrb[44].mxu0 %vm1326_vm4, %v2202_v47 }
 0x417   : > { %4097 = vmatprep.mubr.msk.bf16.mxu0 %vm4532_vm3, %v4530_v42 }
 0x437   : > { %v1379_v48 = vpop.f32.mrb[12].mxu1 }
 0x438   : > { %v1401_v51 = vmul.f32 0.17677669, %v1379_v48  ;;  %v3945_v52 = vpop.f32.mrb[13].mxu1 }
 0x439   : > { %v1382_v53 = vpop.f32.mrb[14].mxu1 }
 0x43a   : > { %v1402_v55 = vmul.f32 0.17677669, %v1382_v53  ;;  %v3946_v57 = vpop.f32.mrb[15].mxu1  ;;  %v5012_v56 = vadd.f32 %v1401_v51, %v5004_v49 }
 0x43c   : > { %v1412_v59 = vsel %vm1411_vm6, %v5012_v56, -inf  ;;  %v5017_v60 = vadd.f32 %v1402_v55, %v5009_v54 }
 0x43d   : > { %1413 = vmax.xlane.f32.xlu0 %v1412_v59 }
 0x43e   : > { %v1415_v61 = vsel %vm1411_vm6, %v5017_v60, -inf }
 0x43f   : > { %1416 = vmax.xlane.f32.xlu1 %v1415_v61  ;;  %v1387_v58 = vpop.f32.mrb[16].mxu1  ;;  %v5064_v61 = vpop.permute.xlu0 %1755 }
 0x440   : > { %v1403_v50 = vmul.f32 0.17677669, %v1387_v58  ;;  %v3949_v0 = vpop.f32.mrb[17].mxu1  ;;  %v5066_v58 = vpop.permute.xlu1 %1757 }
 0x441   : > { %v1390_v62 = vpop.f32.mrb[18].mxu1 }
 0x442   : > { %v1404_v4 = vmul.f32 0.17677669, %v1390_v62  ;;  %v3950_v6 = vpop.f32.mrb[19].mxu1  ;;  %v5032_v7 = vadd.f32 %v1403_v50, %v5024_v63 }
 0x444   : > { %v1418_v8 = vsel %vm1411_vm6, %v5032_v7, -inf  ;;  %v5037_v9 = vadd.f32 %v1404_v4, %v5029_v3 }
 0x445   : > { %1419 = vmax.xlane.f32.xlu0 %v1418_v8 }
 0x446   : > { %v1421_v14 = vsel %vm1411_vm6, %v5037_v9, -inf }
 0x447   : > { %v1395_v10 = vpop.f32.mrb[20].mxu1 }
 0x448   : > { %v1405_v12 = vmul.f32 0.17677669, %v1395_v10  ;;  %v3953_v13 = vpop.f32.mrb[21].mxu1 }
 0x449   : > { %1422 = vmax.xlane.f32.xlu0 %v1421_v14  ;;  %v1398_v15 = vpop.f32.mrb[22].mxu1 }
 0x44a   : > { %v3954_v16 = vpop.f32.mrb[23].mxu1  ;;  %v5047_v17 = vadd.f32 %v1405_v12, %v5042_v11 }
 0x44c   : > { %v1425_v18 = vsel %vm1424_vm7, %v5047_v17, -inf }
 0x44d   : > { %1426 = vmax.xlane.f32.xlu0 %v1425_v18 }
 0x4a9   : > { %v1662_v19 = vpop.f32.mrb[12].mxu0 }
 0x4aa   : > { %v1684_v21 = vmul.f32 0.17677669, %v1662_v19  ;;  %v3981_v22 = vpop.f32.mrb[13].mxu0 }
 0x4ab   : > { %v1665_v23 = vpop.f32.mrb[14].mxu0 }
 0x4ac   : > { %v1685_v24 = vmul.f32 0.17677669, %v1665_v23  ;;  %v3982_v26 = vpop.f32.mrb[15].mxu0  ;;  %v5052_v27 = vadd.f32 %v1684_v21, %v5004_v49 }
 0x4ae   : > { %v1694_v28 = vsel %vm1411_vm6, %v5052_v27, -inf  ;;  %v5057_v29 = vadd.f32 %v1685_v24, %v5009_v54 }
 0x4af   : > { %1695 = vmax.xlane.f32.xlu1 %v1694_v28 }
 0x4b0   : > { %v1697_v30 = vsel %vm1411_vm6, %v5057_v29, -inf }
 0x4b1   : > { %1698 = vmax.xlane.f32.xlu0 %v1697_v30  ;;  %v1670_v31 = vpop.f32.mrb[16].mxu0 }
 0x4b2   : > { %v3985_v32 = vpop.f32.mrb[17].mxu0  ;;  %v1686_v62 = vmul.f32 0.17677669, %v1670_v31 }
 0x4b3   : > { %v1673_v33 = vpop.f32.mrb[18].mxu0 }
 0x4b4   : > { %v3986_v34 = vpop.f32.mrb[19].mxu0  ;;  %v1687_v8 = vmul.f32 0.17677669, %v1673_v33  ;;  %v5070_v15 = vadd.f32 %v1686_v62, %v5024_v63 }
 0x4b6   : > { %v5074_v21 = vadd.f32 %v1687_v8, %v5029_v3  ;;  %v1700_v30 = vsel %vm1411_vm6, %v5070_v15, -inf }
 0x4b8   : > { %v1703_v33 = vsel %vm1411_vm6, %v5074_v21, -inf }
 0x4b9   : > { %v1678_v35 = vpop.f32.mrb[20].mxu0 }
 0x4ba   : > { %v3989_v36 = vpop.f32.mrb[21].mxu0  ;;  %v1688_v14 = vmul.f32 0.17677669, %v1678_v35 }
 0x4bb   : > { %v1681_v37 = vpop.f32.mrb[22].mxu0 }
 0x4bc   : > { %v3990_v38 = vpop.f32.mrb[23].mxu0 }
 0x4c0   : > { %2056 = vrot.lane.b32.xlu1 %v4905_v25, %s4534_s7 }
 0x4c1   : > { %v1963_v39 = vpop.f32.mrb[24].mxu0 }
 0x4c2   : > { %v4017_v40 = vpop.f32.mrb[25].mxu0  ;;  %v1985_v18 = vmul.f32 0.17677669, %v1963_v39 }
 0x4c3   : > { %v1966_v43 = vpop.f32.mrb[26].mxu0 }
 0x4c4   : > { %v4018_v45 = vpop.f32.mrb[27].mxu0  ;;  %v1986_v24 = vmul.f32 0.17677669, %v1966_v43  ;;  %v5084_v34 = vadd.f32 %v1985_v18, %v5004_v49 }
 0x4c6   : > { %v5090_v38 = vadd.f32 %v1986_v24, %v5009_v54  ;;  %v1995_v43 = vsel %vm1411_vm6, %v5084_v34, -inf }
 0x4c7   : > { %1759 = vrot.lane.b32.xlu0 %v1591_v46, %s4533_s0 }
 0x4c9   : > { %v1971_v47 = vpop.f32.mrb[28].mxu0 }
 0x4ca   : > { %v4021_v48 = vpop.f32.mrb[29].mxu0  ;;  %v1414_v25 = vpop.xlane.xlu0 %1413 }
 0x4cb   : > { %v1974_v51 = vpop.f32.mrb[30].mxu0  ;;  %v1428_v13 = vsub.f32 %v5012_v56, %v1414_v25  ;;  %v5079_v56 = vadd.f32 %v1688_v14, %v5042_v11  ;;  %v1998_v48 = vsel %vm1411_vm6, %v5090_v38, -inf }
 0x4cc   : > { %v4022_v52 = vpop.f32.mrb[31].mxu0  ;;  %v1417_v10 = vpop.xlane.xlu1 %1416  ;;  %v1988_v36 = vmul.f32 0.17677669, %v1974_v51 }
 0x4cd   : > { %v1429_v16 = vsub.f32 %v5017_v60, %v1417_v10  ;;  %v1433_v22 = vmul.f32 1.442695, %v1428_v13  ;;  %v1987_v60 = vmul.f32 0.17677669, %v1971_v47  ;;  %v1706_v37 = vsel %vm1424_vm7, %v5079_v56, -inf }
 0x4ce   : > { %v5101_v51 = vadd.f32 %v1988_v36, %v5029_v3 }
 0x4cf   : > { %v1435_v31 = vmul.f32 1.442695, %v1429_v16  ;;  %4293 = vpow2.f32 %v1433_v22  ;;  %v5096_v45 = vadd.f32 %v1987_v60, %v5024_v63 }
 0x4d0   : > { %v2004_v25 = vsel %vm1411_vm6, %v5101_v51, -inf }
 0x4d1   : > { %v1979_v53 = vpop.f32.mrb[32].mxu0  ;;  %4295 = vpow2.f32 %v1435_v31 }
 0x4d2   : > { %v4025_v55 = vpop.f32.mrb[33].mxu0  ;;  %v1420_v12 = vpop.xlane.xlu0 %1419  ;;  %v1989_v40 = vmul.f32 0.17677669, %v1979_v53 }
 0x4d3   : > { %v1982_v57 = vpop.f32.mrb[34].mxu0  ;;  %v1430_v39 = vsub.f32 %v5032_v7, %v1420_v12  ;;  %v2001_v55 = vsel %vm1411_vm6, %v5096_v45, -inf }
 0x4d4   : > { %v4026_v59 = vpop.f32.mrb[35].mxu0  ;;  %v5106_v57 = vadd.f32 %v1989_v40, %v5042_v11 }
 0x4d5   : > { %v1437_v7 = vmul.f32 1.442695, %v1430_v39 }
 0x4d6   : > { %v1423_v26 = vpop.xlane.xlu0 %1422  ;;  %v2007_v8 = vsel %vm1424_vm7, %v5106_v57, -inf }
 0x4d7   : > { %v1431_v35 = vsub.f32 %v5037_v9, %v1423_v26 }
 0x4d9   : > { %v2264_v50 = vpop.f32.mrb[36].mxu0  ;;  %v1439_v9 = vmul.f32 1.442695, %v1431_v35 }
 0x4da   : > { %v4053_v0 = vpop.f32.mrb[37].mxu0  ;;  %v1427_v53 = vpop.xlane.xlu0 %1426  ;;  %v2286_v59 = vmul.f32 0.17677669, %v2264_v50 }
 0x4db   : > { %v2267_v4 = vpop.f32.mrb[38].mxu0  ;;  %4297 = vpow2.f32 %v1439_v9  ;;  %v5110_v0 = vpop.eup %4293  ;;  %v1432_v62 = vsub.f32 %v5047_v17, %v1427_v53 }
 0x4dc   : > { %v4054_v6 = vpop.f32.mrb[39].mxu0  ;;  %4299 = vpow2.f32 %v1437_v7  ;;  %v5115_v10 = vpop.eup %4295  ;;  %v1443_v12 = vsel %vm1411_vm6, %v5110_v0, 0.0  ;;  %v5120_v50 = vadd.f32 %v2286_v59, %v5004_v49 }
 0x4dd   : > { %v2287_v6 = vmul.f32 0.17677669, %v2267_v4  ;;  %v1441_v13 = vmul.f32 1.442695, %v1432_v62  ;;  %v1446_v14 = vsel %vm1411_vm6, %v5115_v10, 0.0 }
 0x4de   : > { %v2296_v16 = vsel %vm1411_vm6, %v5120_v50, -inf }
 0x4df   : > { %v5125_v17 = vadd.f32 %v2287_v6, %v5009_v54  ;;  %4301 = vpow2.f32 %v1441_v13 }
 0x4e1   : > { %v2272_v19 = vpop.f32.mrb[40].mxu0  ;;  %v2299_v49 = vsel %vm1411_vm6, %v5125_v17, -inf }
 0x4e2   : > { %v4057_v23 = vpop.f32.mrb[41].mxu0  ;;  %v2288_v4 = vmul.f32 0.17677669, %v2272_v19 }
 0x4e3   : > { %v2275_v28 = vpop.f32.mrb[42].mxu0 }
 0x4e4   : > { %1701 = vmax.xlane.f32.xlu1 %v1700_v30  ;;  %v4058_v32 = vpop.f32.mrb[43].mxu0  ;;  %v2289_v22 = vmul.f32 0.17677669, %v2275_v28  ;;  %v5138_v19 = vadd.f32 %v2288_v4, %v5024_v63 }
 0x4e5   : > { %v5129_v18 = vpop.eup %4297 }
 0x4e6   : > { %1704 = vmax.xlane.f32.xlu0 %v1703_v33  ;;  %v5133_v23 = vpop.eup %4299  ;;  %v1452_v54 = vsel %vm1411_vm6, %v5129_v18, 0.0  ;;  %v5143_v30 = vadd.f32 %v2289_v22, %v5029_v3  ;;  %v2302_v28 = vsel %vm1411_vm6, %v5138_v19, -inf }
 0x4e7   : > { %v1449_v26 = vsel %vm1411_vm6, %v5133_v23, 0.0 }
 0x4e8   : > { %1707 = vmax.xlane.f32.xlu1 %v1706_v37  ;;  %v2305_v32 = vsel %vm1411_vm6, %v5143_v30, -inf }
 0x4e9   : > { %v2280_v41 = vpop.f32.mrb[44].mxu0  ;;  %v5152_v63 = vpop.eup %4301 }
 0x4ea   : > { %1996 = vmax.xlane.f32.xlu0 %v1995_v43  ;;  %v4061_v46 = vpop.f32.mrb[45].mxu0  ;;  %v2290_v24 = vmul.f32 0.17677669, %v2280_v41  ;;  %v1455_v3 = vsel %vm1424_vm7, %v5152_v63, 0.0 }
 0x4eb   : > { %v2283_v47 = vpop.f32.mrb[46].mxu0 }
 0x4ec   : > { %1999 = vmax.xlane.f32.xlu1 %v1998_v48  ;;  %v4062_v52 = vpop.f32.mrb[47].mxu0  ;;  %v5148_v31 = vadd.f32 %v2290_v24, %v5042_v11 }
 0x4ee   : > { %2002 = vmax.xlane.f32.xlu0 %v2001_v55  ;;  %v2308_v60 = vsel %vm1424_vm7, %v5148_v31, -inf }
 0x4f0   : > { %2005 = vmax.xlane.f32.xlu1 %v2004_v25 }
 0x4f2   : > { %2008 = vmax.xlane.f32.xlu0 %v2007_v8 }
 0x4f4   : > { %1444 = vadd.xlane.f32.xlu1 %v1443_v12 }
 0x4f6   : > { %1447 = vadd.xlane.f32.xlu0 %v1446_v14 }
 0x4f8   : > { %2297 = vmax.xlane.f32.xlu1 %v2296_v16 }
 0x4fa   : > { %2300 = vmax.xlane.f32.xlu0 %v2299_v49 }
 0x4fc   : > { %1453 = vadd.xlane.f32.xlu1 %v1452_v54 }
 0x4fe   : > { %1450 = vadd.xlane.f32.xlu0 %v1449_v26 }
 0x500   : > { %2303 = vmax.xlane.f32.xlu1 %v2302_v28 }
 0x502   : > { %2306 = vmax.xlane.f32.xlu0 %v2305_v32 }
 0x504   : > { %2309 = vmax.xlane.f32.xlu1 %v2308_v60 }
 0x506   : > { %1456 = vadd.xlane.f32.xlu0 %v1455_v3 }
 0x53c   : > { %v1696_v33 = vpop.xlane.xlu1 %1695 }
 0x53d   : > { %v1709_v35 = vsub.f32 %v5052_v27, %v1696_v33 }
 0x53e   : > { %v1699_v11 = vpop.xlane.xlu0 %1698 }
 0x53f   : > { %v1714_v36 = vmul.f32 1.442695, %v1709_v35  ;;  %v1710_v37 = vsub.f32 %v5057_v29, %v1699_v11 }
 0x540   : > { %v5170_v27 = vpop.permute.xlu1 %2056 }
 0x541   : > { %4303 = vpow2.f32 %v1714_v36  ;;  %v1716_v39 = vmul.f32 1.442695, %v1710_v37 }
 0x542   : > { %v5172_v29 = vpop.permute.xlu0 %1759 }
 0x543   : > { %4305 = vpow2.f32 %v1716_v39 }
 0x54b   : > { %v5160_v40 = vpop.eup %4303 }
 0x54c   : > { %v1724_v41 = vsel %vm1411_vm6, %v5160_v40, 0.0 }
 0x54d   : > { %v5164_v43 = vpop.eup %4305  ;;  %1725 = vadd.xlane.f32.xlu1 %v1724_v41 }
 0x54e   : > { %v1727_v9 = vsel %vm1411_vm6, %v5164_v43, 0.0 }
 0x54f   : > { %1728 = vadd.xlane.f32.xlu0 %v1727_v9 }
 0x565   : > { %2058 = vrot.lane.b32.xlu0 %v4911_v44, %s4534_s7 }
 0x571   : > { %v1702_v46 = vpop.xlane.xlu1 %1701 }
 0x572   : > { %v1711_v47 = vsub.f32 %v5070_v15, %v1702_v46 }
 0x573   : > { %v1705_v48 = vpop.xlane.xlu0 %1704 }
 0x574   : > { %v1718_v7 = vmul.f32 1.442695, %v1711_v47  ;;  %v1712_v52 = vsub.f32 %v5074_v21, %v1705_v48 }
 0x575   : > { %v1708_v53 = vpop.xlane.xlu1 %1707 }
 0x576   : > { %4307 = vpow2.f32 %v1718_v7  ;;  %v1720_v55 = vmul.f32 1.442695, %v1712_v52  ;;  %v1713_v59 = vsub.f32 %v5079_v56, %v1708_v53 }
 0x577   : > { %v1997_v25 = vpop.xlane.xlu0 %1996 }
 0x578   : > { %4309 = vpow2.f32 %v1720_v55  ;;  %v1722_v62 = vmul.f32 1.442695, %v1713_v59  ;;  %v2010_v44 = vsub.f32 %v5084_v34, %v1997_v25 }
 0x579   : > { %v2000_v6 = vpop.xlane.xlu1 %1999 }
 0x57a   : > { %4311 = vpow2.f32 %v1722_v62  ;;  %v2015_v8 = vmul.f32 1.442695, %v2010_v44  ;;  %v2011_v12 = vsub.f32 %v5090_v38, %v2000_v6 }
 0x57b   : > { %v2003_v15 = vpop.xlane.xlu0 %2002 }
 0x57c   : > { %4313 = vpow2.f32 %v2015_v8  ;;  %v2017_v13 = vmul.f32 1.442695, %v2011_v12  ;;  %v2012_v21 = vsub.f32 %v5096_v45, %v2003_v15 }
 0x57d   : > { %v2006_v14 = vpop.xlane.xlu1 %2005 }
 0x57e   : > { %4315 = vpow2.f32 %v2017_v13  ;;  %v2019_v4 = vmul.f32 1.442695, %v2012_v21  ;;  %v2013_v56 = vsub.f32 %v5101_v51, %v2006_v14  ;;  %v1773_v13 = vsel %vm1480_vm5, %v5172_v29, 0  ;;  %v2187_v14 = vld [vmem:[#allocation3 + $0x28] sm:$0xff]  ;;  %v1889_v29 = vld [vmem:[#allocation3 + $0x70] sm:$0x3] }
 0x57f   : > { %v2009_v16 = vpop.xlane.xlu0 %2008 }
 0x580   : > { %v5181_v22 = vpop.eup %4307  ;;  %4317 = vpow2.f32 %v2019_v4  ;;  %v2021_v34 = vmul.f32 1.442695, %v2013_v56  ;;  %v2014_v49 = vsub.f32 %v5106_v57, %v2009_v16  ;;  %v1892_v56 = vpack.c.bf16 %v1889_v29, %v1889_v29 }
 0x581   : > { %v1445_v24 = vpop.xlane.xlu1 %1444  ;;  %v1730_v38 = vsel %vm1411_vm6, %v5181_v22, 0.0 }
 0x582   : > { %v5186_v54 = vpop.eup %4309  ;;  %1731 = vadd.xlane.f32.xlu1 %v1730_v38  ;;  %4319 = vrcp.f32 %v1445_v24  ;;  %v2023_v28 = vmul.f32 1.442695, %v2014_v49 }
 0x583   : > { %v1448_v45 = vpop.xlane.xlu0 %1447  ;;  %v1733_v26 = vsel %vm1411_vm6, %v5186_v54, 0.0  ;;  %4321 = vpow2.f32 %v2021_v34 }
 0x584   : > { %v5190_v51 = vpop.eup %4311  ;;  %1734 = vadd.xlane.f32.xlu0 %v1733_v26  ;;  %4323 = vrcp.f32 %v1448_v45 }
 0x585   : > { %v2298_v32 = vpop.xlane.xlu1 %2297  ;;  %v1736_v57 = vsel %vm1424_vm7, %v5190_v51, 0.0  ;;  %4325 = vpow2.f32 %v2023_v28 }
 0x586   : > { %v5194_v60 = vpop.eup %4313  ;;  %v2311_v3 = vsub.f32 %v5120_v50, %v2298_v32  ;;  %1737 = vadd.xlane.f32.xlu1 %v1736_v57 }
 0x587   : > { %v5197_v33 = vpop.xlane.xlu0 %2300  ;;  %v2025_v39 = vsel %vm1411_vm6, %v5194_v60, 0.0 }
 0x588   : > { %v5199_v35 = vpop.eup %4315  ;;  %v2316_v11 = vmul.f32 1.442695, %v2311_v3 }
 0x589   : > { %v1454_v36 = vpop.xlane.xlu1 %1453  ;;  %v2028_v37 = vsel %vm1411_vm6, %v5199_v35, 0.0 }
 0x58a   : > { %v5205_v41 = vpop.eup %4317  ;;  %4327 = vpow2.f32 %v2316_v11  ;;  %2029 = vadd.xlane.f32.xlu0 %v2028_v37  ;;  %2026 = vadd.xlane.f32.xlu1 %v2025_v39  ;;  %v2189_v39 = vld [vmem:[#allocation3 + $0x58] sm:$0xff] }
 0x58b   : > { %4329 = vrcp.f32 %v1454_v36  ;;  %v1451_v50 = vpop.xlane.xlu0 %1450  ;;  %v2031_v46 = vsel %vm1411_vm6, %v5205_v41, 0.0 }
 0x58c   : > { %v4320_v9 = vpop.eup %4319  ;;  %4331 = vrcp.f32 %v1451_v50  ;;  %v2188_v50 = vld [vmem:[#allocation3 + $0x40] sm:$0xff] }
 0x58d   : > { %v5209_v47 = vpop.eup %4321  ;;  %v1463_v52 = vmul.f32 %v4320_v9, %v5110_v0  ;;  %v2304_v16 = vpop.xlane.xlu1 %2303  ;;  %v2192_v9 = vpack.c.bf16 %v2189_v39, %v2188_v50 }
 0x58e   : > { %2032 = vadd.xlane.f32.xlu1 %v2031_v46  ;;  %v4324_v48 = vpop.eup %4323  ;;  %v2034_v55 = vsel %vm1411_vm6, %v5209_v47, 0.0  ;;  %v2313_v38 = vsub.f32 %v5138_v19, %v2304_v16  ;;  %v2190_v46 = vld [vmem:[#allocation3 + $0x70] sm:$0x3] }
 0x58f   : > { %v2307_v7 = vpop.xlane.xlu0 %2306  ;;  %v1464_v53 = vmul.f32 %v4324_v48, %v5115_v10  ;;  %v5215_v59 = vpop.eup %4325 }
 0x590   : > { %v2037_v10 = vsel %vm1424_vm7, %v5215_v59, 0.0  ;;  %v2320_v26 = vmul.f32 1.442695, %v2313_v38  ;;  %v2314_v28 = vsub.f32 %v5143_v30, %v2307_v7  ;;  %v2193_v7 = vpack.c.bf16 %v2190_v46, %v2190_v46 }
 0x591   : > { %v1468_v25 = vpack.c.bf16 %v1464_v53, %v1463_v52  ;;  %v2310_v34 = vpop.xlane.xlu1 %2309 }
 0x592   : > { %2035 = vadd.xlane.f32.xlu1 %v2034_v55  ;;  %v2315_v49 = vsub.f32 %v5148_v31, %v2310_v34  ;;  %v2322_v32 = vmul.f32 1.442695, %v2314_v28 }
 0x593   : > { %v1457_v62 = vpop.xlane.xlu0 %1456  ;;  %3962 = vmatmul.mubr.msk.bf16.vlgmr.msra.gmra.mrb[24].mxu1 %vm1411_vm6, %v1468_v25 }
 0x594   : > { %v5217_v44 = vpop.eup %4327  ;;  %3992 = vmatpush3.bf16.msra.mxu1 %v5064_v61  ;;  %4333 = vrcp.f32 %v1457_v62  ;;  %3965 = vmatprep.mubr.msk.bf16.mxu1 %vm4532_vm3, %v4530_v42  ;;  %v2324_v45 = vmul.f32 1.442695, %v2315_v49 }
 0x595   : > { %v4330_v6 = vpop.eup %4329  ;;  %v2326_v0 = vsel %vm1411_vm6, %v5217_v44, 0.0  ;;  %3993 = vmatprep.subr.bf16.mxu1 %v4530_v42 }
 0x596   : > { %2327 = vadd.xlane.f32.xlu0 %v2326_v0  ;;  %2038 = vadd.xlane.f32.xlu1 %v2037_v10  ;;  %v4332_v8 = vpop.eup %4331  ;;  %v1466_v15 = vmul.f32 %v4330_v6, %v5129_v18 }
 0x597   : > { %v1465_v12 = vmul.f32 %v4332_v8, %v5133_v23 }
 0x598   : > { %3994 = vmatpush3.bf16.msra.mxu1 %v5066_v58  ;;  %v2186_v58 = vld [vmem:[#allocation3 + $0x10] sm:$0xff] }
 0x599   : > { %3995 = vmatprep.subr.bf16.mxu1 %v4530_v42  ;;  %v1469_v61 = vpack.c.bf16 %v1466_v15, %v1465_v12  ;;  %v2191_v4 = vpack.c.bf16 %v2187_v14, %v2186_v58 }
 0x59b   : > { %3966 = vmatmul.mubr.msk.bf16.gmra.mrb[28].mxu1 %vm1411_vm6, %v1469_v61 }
 0x59c   : > { %3996 = vmatpush3.bf16.msra.mxu1 %v1773_v13  ;;  %3969 = vmatprep.mubr.msk.bf16.mxu1 %vm4532_vm3, %v4530_v42 }
 0x59d   : > { %4027 = vmatprep.subr.bf16.mxu1 %v4530_v42 }
 0x59e   : > { %v4334_v21 = vpop.eup %4333 }
 0x59f   : > { %v1467_v23 = vmul.f32 %v4334_v21, %v5152_v63  ;;  %v2312_v63 = vsub.f32 %v5125_v17, %v5197_v33 }
 0x5a1   : > { %v1470_v18 = vpack.c.bf16 %v1467_v23, %v1467_v23  ;;  %v2318_v24 = vmul.f32 1.442695, %v2312_v63 }
 0x5a3   : > { %3970 = vmatmul.mubr.msk.bf16.gmra.mrb[32].mxu1 %vm1411_vm6, %v1470_v18  ;;  %4335 = vpow2.f32 %v2318_v24 }
 0x5a4   : > { %3997 = vmatprep.mubr.msk.bf16.mxu1 %vm4532_vm3, %v4530_v42  ;;  %4337 = vpow2.f32 %v2324_v45 }
 0x5a5   : > { %4339 = vpow2.f32 %v2320_v26 }
 0x5a6   : > { %4341 = vpow2.f32 %v2322_v32 }
 0x5a7   : > { %2357 = vrot.lane.b32.xlu1 %v2191_v4, %s4535_s4 }
 0x5ac   : > { %2060 = vrot.lane.b32.xlu0 %v1892_v56, %s4534_s7 }
 0x5ad   : > { %v5249_v57 = vpop.eup %4335 }
 0x5ae   : > { %v5251_v3 = vpop.eup %4337  ;;  %v2329_v31 = vsel %vm1411_vm6, %v5249_v57, 0.0 }
 0x5af   : > { %v2338_v17 = vsel %vm1424_vm7, %v5251_v3, 0.0  ;;  %v5257_v19 = vpop.eup %4339 }
 0x5b0   : > { %v2332_v30 = vsel %vm1411_vm6, %v5257_v19, 0.0  ;;  %v5261_v33 = vpop.eup %4341 }
 0x5b1   : > { %v2335_v11 = vsel %vm1411_vm6, %v5261_v33, 0.0 }
 0x5cb   : > { %2339 = vadd.xlane.f32.xlu0 %v2338_v17  ;;  %2330 = vadd.xlane.f32.xlu1 %v2329_v31 }
 0x5cf   : > { %2333 = vadd.xlane.f32.xlu1 %v2332_v30 }
 0x5d3   : > { %2336 = vadd.xlane.f32.xlu1 %v2335_v11 }
 0x5da   : > { %v1726_v36 = vpop.xlane.xlu1 %1725 }
 0x5db   : > { %4343 = vrcp.f32 %v1726_v36 }
 0x5dc   : > { %v1729_v37 = vpop.xlane.xlu0 %1728 }
 0x5dd   : > { %4345 = vrcp.f32 %v1729_v37 }
 0x5e0   : > { %v2059_v62 = vpop.permute.xlu0 %2058 }
 0x5e4   : > { %2359 = vrot.lane.b32.xlu1 %v2192_v9, %s4535_s4 }
 0x5e5   : > { %v4344_v48 = vpop.eup %4343 }
 0x5e6   : > { %v1744_v53 = vmul.f32 %v4344_v48, %v5160_v40 }
 0x5e7   : > { %v4346_v52 = vpop.eup %4345 }
 0x5e8   : > { %v1745_v55 = vmul.f32 %v4346_v52, %v5164_v43  ;;  %2361 = vrot.lane.b32.xlu1 %v2193_v7, %s4535_s4 }
 0x5ea   : > { %v1749_v25 = vpack.c.bf16 %v1745_v55, %v1744_v53 }
 0x5ec   : > { %3998 = vmatmul.mubr.msk.bf16.vlgmr.msra.gmra.mrb[36].mxu1 %vm1411_vm6, %v1749_v25 }
 0x5ed   : > { %4028 = vmatpush3.bf16.msra.mxu1 %v5170_v27  ;;  %4001 = vmatprep.mubr.msk.bf16.mxu1 %vm4532_vm3, %v4530_v42 }
 0x5ee   : > { %4029 = vmatprep.subr.bf16.mxu1 %v4530_v42 }
 0x5f1   : > { %4030 = vmatpush3.bf16.msra.mxu1 %v2059_v62 }
 0x5f2   : > { %4031 = vmatprep.subr.bf16.mxu1 %v4530_v42 }
 0x60f   : > { %v1732_v6 = vpop.xlane.xlu1 %1731 }
 0x610   : > { %4347 = vrcp.f32 %v1732_v6 }
 0x611   : > { %v1735_v40 = vpop.xlane.xlu0 %1734 }
 0x612   : > { %4349 = vrcp.f32 %v1735_v40 }
 0x613   : > { %v1738_v43 = vpop.xlane.xlu1 %1737 }
 0x614   : > { %4351 = vrcp.f32 %v1738_v43 }
 0x617   : > { %v2027_v0 = vpop.xlane.xlu1 %2026  ;;  %v2030_v8 = vpop.xlane.xlu0 %2029 }
 0x618   : > { %4353 = vrcp.f32 %v2027_v0 }
 0x619   : > { %4355 = vrcp.f32 %v2030_v8 }
 0x61a   : > { %v4348_v10 = vpop.eup %4347 }
 0x61b   : > { %v2033_v27 = vpop.xlane.xlu1 %2032  ;;  %v1746_v15 = vmul.f32 %v4348_v10, %v5181_v22 }
 0x61c   : > { %v4350_v12 = vpop.eup %4349 }
 0x61d   : > { %v1747_v61 = vmul.f32 %v4350_v12, %v5186_v54 }
 0x61e   : > { %v4352_v21 = vpop.eup %4351 }
 0x61f   : > { %v1750_v13 = vpack.c.bf16 %v1747_v61, %v1746_v15  ;;  %v2036_v23 = vpop.xlane.xlu1 %2035  ;;  %v1748_v14 = vmul.f32 %v4352_v21, %v5190_v51 }
 0x620   : > { %4357 = vrcp.f32 %v2036_v23 }
 0x621   : > { %4002 = vmatmul.mubr.msk.bf16.gmra.mrb[40].mxu1 %vm1411_vm6, %v1750_v13  ;;  %v1751_v29 = vpack.c.bf16 %v1748_v14, %v1748_v14  ;;  %4359 = vrcp.f32 %v2033_v27 }
 0x622   : > { %4005 = vmatprep.mubr.msk.bf16.mxu1 %vm4532_vm3, %v4530_v42  ;;  %v4354_v58 = vpop.eup %4353 }
 0x623   : > { %v2328_v18 = vpop.xlane.xlu0 %2327  ;;  %v4356_v56 = vpop.eup %4355  ;;  %v2045_v54 = vmul.f32 %v4354_v58, %v5194_v60 }
 0x624   : > { %v2046_v16 = vmul.f32 %v4356_v56, %v5199_v35  ;;  %v2039_v34 = vpop.xlane.xlu1 %2038 }
 0x625   : > { %4361 = vrcp.f32 %v2039_v34 }
 0x626   : > { %v2050_v51 = vpack.c.bf16 %v2046_v16, %v2045_v54 }
 0x627   : > { %v2061_v4 = vpop.permute.xlu0 %2060 }
 0x628   : > { %v2074_v22 = vsel %vm1480_vm5, %v2061_v4, 0  ;;  %v2358_v49 = vpop.permute.xlu1 %2357 }
 0x629   : > { %4006 = vmatmul.mubr.msk.bf16.gmra.mrb[44].mxu1 %vm1411_vm6, %v1751_v29 }
 0x62a   : > { %4032 = vmatpush3.bf16.msra.mxu1 %v2074_v22  ;;  %4033 = vmatprep.mubr.msk.bf16.mxu1 %vm4532_vm3, %v4530_v42  ;;  %v4358_v63 = vpop.eup %4357 }
 0x62b   : > { %4063 = vmatprep.subr.bf16.mxu1 %v4530_v42  ;;  %v4360_v24 = vpop.eup %4359  ;;  %v2048_v38 = vmul.f32 %v4358_v63, %v5209_v47 }
 0x62c   : > { %v2047_v60 = vmul.f32 %v4360_v24, %v5205_v41 }
 0x62e   : > { %v2051_v35 = vpack.c.bf16 %v2048_v38, %v2047_v60 }
 0x62f   : > { %v4362_v45 = vpop.eup %4361 }
 0x630   : > { %v2049_v26 = vmul.f32 %v4362_v45, %v5215_v59 }
 0x631   : > { %4034 = vmatmul.mubr.msk.bf16.vlgmr.msra.gmra.mrb[48].mxu1 %vm1411_vm6, %v2050_v51 }
 0x632   : > { %4064 = vmatpush3.bf16.msra.mxu1 %v2358_v49  ;;  %4037 = vmatprep.mubr.msk.bf16.mxu1 %vm4532_vm3, %v4530_v42  ;;  %v2052_v28 = vpack.c.bf16 %v2049_v26, %v2049_v26 }
 0x633   : > { %4065 = vmatprep.subr.bf16.mxu1 %v4530_v42 }
 0x639   : > { %4038 = vmatmul.mubr.msk.bf16.gmra.mrb[52].mxu1 %vm1411_vm6, %v2051_v35  ;;  %v4232_v35 = vld [vmem:[%s4742_s24] sm:$0xff]  }
 0x63a   : > { %4041 = vmatprep.mubr.msk.bf16.mxu1 %vm4532_vm3, %v4530_v42  ;;  %4082 = vmatpush3.bf16.msra.mxu0 %v4232_v35 }
 0x63b   : > { %4083 = vmatprep.subr.bf16.mxu0 %v4530_v42 }
 0x641   : > { %4042 = vmatmul.mubr.msk.bf16.gmra.mrb[56].mxu1 %vm1411_vm6, %v2052_v28  ;;  %v4233_v28 = vld [vmem:[%s4742_s24 + $0x8] sm:$0xff]  }
 0x642   : > { %4069 = vmatprep.mubr.msk.bf16.mxu1 %vm4532_vm3, %v4530_v42  ;;  %4084 = vmatpush3.bf16.msra.mxu0 %v4233_v28 }
 0x643   : > { %4085 = vmatprep.subr.bf16.mxu0 %v4530_v42 }
 0x658   : > { %v2331_v47 = vpop.xlane.xlu1 %2330  ;;  %v2340_v11 = vpop.xlane.xlu0 %2339 }
 0x659   : > { %4363 = vrcp.f32 %v2331_v47 }
 0x65a   : > { %4365 = vrcp.f32 %v2328_v18 }
 0x65c   : > { %v2334_v32 = vpop.xlane.xlu1 %2333 }
 0x660   : > { %v2337_v41 = vpop.xlane.xlu1 %2336 }
 0x661   : > { %4367 = vrcp.f32 %v2337_v41  ;;  %v4234_v41 = vld [vmem:[%s4742_s24 + $0x10] sm:$0xff]  }
 0x662   : > { %4369 = vrcp.f32 %v2334_v32  ;;  %4086 = vmatpush3.bf16.msra.mxu0 %v4234_v41 }
 0x663   : > { %v4364_v17 = vpop.eup %4363  ;;  %4371 = vrcp.f32 %v2340_v11  ;;  %v4235_v11 = vld [vmem:[%s4742_s24 + $0x18] sm:$0xff]   ;;  %4087 = vmatprep.subr.bf16.mxu0 %v4530_v42 }
 0x664   : > { %v2360_v31 = vpop.permute.xlu1 %2359  ;;  %v4366_v30 = vpop.eup %4365  ;;  %v2347_v59 = vmul.f32 %v4364_v17, %v5249_v57 }
 0x665   : > { %4066 = vmatpush3.bf16.msra.mxu1 %v2360_v31  ;;  %v2346_v9 = vmul.f32 %v4366_v30, %v5217_v44 }
 0x666   : > { %4067 = vmatprep.subr.bf16.mxu1 %v4530_v42  ;;  %v1518_v36 = vpop.f32.mrb[24].mxu1  ;;  %4088 = vmatpush3.bf16.msra.mxu0 %v4235_v11  ;;  %v4425_v11 = vld [vmem:[#allocation2 + $0x10] sm:$0xff] }
 0x667   : > { %v3761_v37 = vpack.c.bf16 %v1518_v36, %v1518_v36  ;;  %v3963_v39 = vpop.f32.mrb[25].mxu1  ;;  %v2351_v53 = vpack.c.bf16 %v2347_v59, %v2346_v9  ;;  %4089 = vmatprep.subr.bf16.mxu0 %v4530_v42 }
 0x668   : > { %v2362_v50 = vpop.permute.xlu1 %2361  ;;  %v1521_v46 = vpop.f32.mrb[26].mxu1  ;;  %v4236_v39 = vld [vmem:[%s4742_s24 + $0x20] sm:$0xff]  }
 0x669   : > { %v2375_v48 = vsel %vm1480_vm5, %v2362_v50, 0  ;;  %1562 = vst.msk [vmem:[#allocation4] sm:$0xf] %vm1561_vm8, %v3761_v37  ;;  %v3762_v7 = vpack.c.bf16 %v1521_v46, %v1521_v46  ;;  %v3964_v52 = vpop.f32.mrb[27].mxu1 }
 0x66a   : > { %4068 = vmatpush3.bf16.msra.mxu1 %v2375_v48  ;;  %4090 = vmatpush3.bf16.msra.mxu0 %v4236_v39 }
 0x66b   : > { %v4368_v55 = vpop.eup %4367  ;;  %1563 = vst.msk [vmem:[#allocation4 + $0x4] sm:$0xf] %vm1561_vm8, %v3762_v7  ;;  %4091 = vmatprep.subr.bf16.mxu0 %v4530_v42  ;;  %v4237_v7 = vld [vmem:[%s4742_s24 + $0x28] sm:$0xff]  }
 0x66c   : > { %v4370_v57 = vpop.eup %4369  ;;  %v2349_v25 = vmul.f32 %v4368_v55, %v5261_v33  ;;  %v4239_v55 = vld [vmem:[%s4742_s24 + $0x38] sm:$0xff]  }
 0x66d   : > { %4070 = vmatmul.mubr.msk.bf16.vlgmr.msra.gmra.mrb[60].mxu1 %vm1411_vm6, %v2351_v53  ;;  %v2348_v43 = vmul.f32 %v4370_v57, %v5257_v19  ;;  %v4372_v12 = vpop.eup %4371  ;;  %v4238_v53 = vld [vmem:[%s4742_s24 + $0x30] sm:$0xff]  }
 0x66e   : > { %4073 = vmatprep.mubr.msk.bf16.mxu1 %vm4532_vm3, %v4530_v42  ;;  %v1526_v44 = vpop.f32.mrb[28].mxu1  ;;  %v2350_v33 = vmul.f32 %v4372_v12, %v5251_v3  ;;  %4092 = vmatpush3.bf16.msra.mxu0 %v4237_v7 }
 0x66f   : > { %v3763_v62 = vpack.c.bf16 %v1526_v44, %v1526_v44  ;;  %v3967_v6 = vpop.f32.mrb[29].mxu1  ;;  %v2352_v8 = vpack.c.bf16 %v2349_v25, %v2348_v43  ;;  %4093 = vmatprep.subr.bf16.mxu0 %v4530_v42 }
 0x670   : > { %v1529_v40 = vpop.f32.mrb[30].mxu1  ;;  %v2353_v21 = vpack.c.bf16 %v2350_v33, %v2350_v33 }
 0x671   : > { %1564 = vst.msk [vmem:[#allocation4 + $0x8] sm:$0xf] %vm1561_vm8, %v3763_v62  ;;  %v3764_v0 = vpack.c.bf16 %v1529_v40, %v1529_v40  ;;  %v3968_v10 = vpop.f32.mrb[31].mxu1 }
 0x672   : > { %4094 = vmatpush3.bf16.msra.mxu0 %v4238_v53  ;;  %v4427_v53 = vld [vmem:[#allocation2 + $0x20] sm:$0x3] }
 0x673   : > { %1565 = vst.msk [vmem:[#allocation4 + $0xc] sm:$0xf] %vm1561_vm8, %v3764_v0  ;;  %4095 = vmatprep.subr.bf16.mxu0 %v4530_v42 }
 0x675   : > { %4074 = vmatmul.mubr.msk.bf16.gmra.mrb[64].mxu1 %vm1411_vm6, %v2352_v8 }
 0x676   : > { %4077 = vmatprep.mubr.msk.bf16.mxu1 %vm4532_vm3, %v4530_v42  ;;  %v1534_v27 = vpop.f32.mrb[32].mxu1  ;;  %4096 = vmatpush3.bf16.msra.mxu0 %v4239_v55 }
 0x677   : > { %v3765_v15 = vpack.c.bf16 %v1534_v27, %v1534_v27  ;;  %v3971_v61 = vpop.f32.mrb[33].mxu1 }
 0x678   : > { %v1537_v19 = vpop.f32.mrb[34].mxu1 }
 0x679   : > { %1567 = vst.msk [vmem:[#allocation4 + $0x10] sm:$0x1] %vm1566_vm9, %v3765_v15  ;;  %v3972_v13 = vpop.f32.mrb[35].mxu1 }
 0x67d   : > { %4078 = vmatmul.mubr.msk.bf16.gmra.mrb[68].mxu1 %vm1411_vm6, %v2353_v21 }
 0x67e   : > { %2853 = vmatprep.mubr.bf16.mxu1 %v4531_v20 }
 0x6bf   : > { %v1809_v23 = vpop.f32.mrb[36].mxu1 }
 0x6c0   : > { %v3766_v18 = vpack.c.bf16 %v1809_v23, %v1809_v23  ;;  %v3999_v14 = vpop.f32.mrb[37].mxu1 }
 0x6c1   : > { %v1812_v58 = vpop.f32.mrb[38].mxu1 }
 0x6c2   : > { %1847 = vrot.lane.b32.xlu1 %v3766_v18, %s4535_s4  ;;  %v4000_v4 = vpop.f32.mrb[39].mxu1  ;;  %v3767_v29 = vpack.c.bf16 %v1812_v58, %v1812_v58 }
 0x6c6   : > { %1849 = vrot.lane.b32.xlu1 %v3767_v29, %s4535_s4 }
 0x6f4   : > { %v1817_v3 = vpop.f32.mrb[40].mxu1 }
 0x6f5   : > { %v4003_v56 = vpop.f32.mrb[41].mxu1  ;;  %v3768_v47 = vpack.c.bf16 %v1817_v3, %v1817_v3 }
 0x6f6   : > { %v1820_v22 = vpop.f32.mrb[42].mxu1 }
 0x6f7   : > { %v4004_v54 = vpop.f32.mrb[43].mxu1  ;;  %v3769_v17 = vpack.c.bf16 %v1820_v22, %v1820_v22 }
 0x6fc   : > { %v5322_v16 = vpop.f32.mrb[44].mxu1 }
 0x6fd   : > { %v4007_v34 = vpop.f32.mrb[45].mxu1  ;;  %v3770_v33 = vpack.c.bf16 %v5322_v16, %v5322_v16 }
 0x6fe   : > { %v1828_v51 = vpop.f32.mrb[46].mxu1 }
 0x6ff   : > { %v4008_v63 = vpop.f32.mrb[47].mxu1 }
 0x704   : > { %v2110_v49 = vpop.f32.mrb[48].mxu1 }
 0x705   : > { %v3771_v24 = vpack.c.bf16 %v2110_v49, %v2110_v49  ;;  %v4035_v38 = vpop.f32.mrb[49].mxu1 }
 0x706   : > { %v2113_v60 = vpop.f32.mrb[50].mxu1 }
 0x707   : > { %v3772_v45 = vpack.c.bf16 %v2113_v60, %v2113_v60  ;;  %2148 = vrot.lane.b32.xlu1 %v3771_v24, %s4534_s7  ;;  %v4036_v26 = vpop.f32.mrb[51].mxu1 }
 0x708   : > { %v4423_v26 = vld [vmem:[#allocation2] sm:$0xff] }
 0x709   : > { %2150 = vrot.lane.b32.xlu0 %v3772_v45, %s4534_s7 }
 0x70b   : > { %1851 = vrot.lane.b32.xlu1 %v3768_v47, %s4535_s4 }
 0x70c   : > { %v2118_v32 = vpop.f32.mrb[52].mxu1 }
 0x70d   : > { %v4039_v31 = vpop.f32.mrb[53].mxu1  ;;  %v3773_v36 = vpack.c.bf16 %v2118_v32, %v2118_v32 }
 0x70e   : > { %v2121_v30 = vpop.f32.mrb[54].mxu1 }
 0x70f   : > { %1853 = vrot.lane.b32.xlu1 %v3769_v17, %s4535_s4  ;;  %v4040_v59 = vpop.f32.mrb[55].mxu1  ;;  %v3774_v0 = vpack.c.bf16 %v2121_v30, %v2121_v30  ;;  %v4424_v17 = vld [vmem:[#allocation2 + $0x8] sm:$0xff] }
 0x713   : > { %2152 = vrot.lane.b32.xlu1 %v3773_v36, %s4534_s7 }
 0x714   : > { %v2126_v37 = vpop.f32.mrb[56].mxu1 }
 0x715   : > { %v4043_v50 = vpop.f32.mrb[57].mxu1  ;;  %v3775_v19 = vpack.c.bf16 %v2126_v37, %v2126_v37 }
 0x716   : > { %v2129_v9 = vpop.f32.mrb[58].mxu1 }
 0x717   : > { %v4044_v46 = vpop.f32.mrb[59].mxu1  ;;  %v4426_v9 = vld [vmem:[#allocation2 + $0x18] sm:$0xff] }
 0x734   : > { %v1848_v48 = vpop.permute.xlu1 %1847 }
 0x735   : > { %1863 = vst.msk [vmem:[#allocation4] sm:$0xf] %vm1862_vm10, %v1848_v48 }
 0x738   : > { %v1850_v52 = vpop.permute.xlu1 %1849 }
 0x739   : > { %1864 = vst.msk [vmem:[#allocation4 + $0x4] sm:$0xf] %vm1862_vm10, %v1850_v52 }
 0x740   : > { %v2411_v57 = vpop.f32.mrb[60].mxu1 }
 0x741   : > { %v3776_v44 = vpack.c.bf16 %v2411_v57, %v2411_v57  ;;  %v4071_v25 = vpop.f32.mrb[61].mxu1 }
 0x742   : > { %v2414_v62 = vpop.f32.mrb[62].mxu1 }
 0x743   : > { %2449 = vrot.lane.b32.xlu1 %v3776_v44, %s4533_s0  ;;  %v4072_v6 = vpop.f32.mrb[63].mxu1  ;;  %v3777_v40 = vpack.c.bf16 %v2414_v62, %v2414_v62 }
 0x747   : > { %2451 = vrot.lane.b32.xlu1 %v3777_v40, %s4533_s0  ;;  %v4243_v40 = vld [vmem:[%s4758_s23] ss:$8 sps:$4 sm:$0xff]  }
 0x748   : > { %v2419_v43 = vpop.f32.mrb[64].mxu1 }
 0x749   : > { %v3778_v10 = vpack.c.bf16 %v2419_v43, %v2419_v43  ;;  %v4075_v8 = vpop.f32.mrb[65].mxu1  ;;  %v4245_v43 = vld [vmem:[%s4758_s23 + $0x4] ss:$8 sps:$4 sm:$0xff]  }
 0x74a   : > { %v2422_v12 = vpop.f32.mrb[66].mxu1  ;;  %2821 = vmatprep.subr.bf16.mxu1 %v4245_v43 }
 0x74b   : > { %2154 = vrot.lane.b32.xlu1 %v3774_v0, %s4534_s7  ;;  %2453 = vrot.lane.b32.xlu0 %v3778_v10, %s4533_s0  ;;  %v4076_v27 = vpop.f32.mrb[67].mxu1  ;;  %v3779_v15 = vpack.c.bf16 %v2422_v12, %v2422_v12  ;;  %v4248_v0 = vld [vmem:[%s4758_s23 + $0x14] ss:$8 sps:$4 sm:$0xff]   ;;  %v4246_v10 = vld [vmem:[%s4758_s23 + $0x10] ss:$8 sps:$4 sm:$0xff]  }
 0x74c   : > { %2822 = vmatpush1.bf16.msra.mxu1 %v4243_v40 }
 0x74d   : > { %2823 = vmatprep.subr.bf16.mxu1 %v4248_v0  ;;  %v3719_v0 = vld [vmem:[%s5815_s2] ss:$0 sm:$0xff] }
 0x74f   : > { %1855 = vrot.lane.b32.xlu0 %v3770_v33, %s4535_s4  ;;  %2455 = vrot.lane.b32.xlu1 %v3779_v15, %s4533_s0 }
 0x750   : > { %v2427_v61 = vpop.f32.mrb[68].mxu1  ;;  %2824 = vmatpush1.bf16.msra.mxu1 %v4246_v10 }
 0x751   : > { %v3780_v13 = vpack.c.bf16 %v2427_v61, %v2427_v61  ;;  %v4079_v21 = vpop.f32.mrb[69].mxu1 }
 0x752   : > { %v2430_v23 = vpop.f32.mrb[70].mxu1 }
 0x753   : > { %2156 = vrot.lane.b32.xlu1 %v3775_v19, %s4534_s7  ;;  %2457 = vrot.lane.b32.xlu0 %v3780_v13, %s4533_s0  ;;  %v4080_v18 = vpop.f32.mrb[71].mxu1  ;;  %s5812_s7 = scalar_lea.vmem %s5746_s11, %s4708_s25  ;;  %s5816_s25 = sld [smem:[#allocation11_spill]] }
 0x754   : > { %v3717_v45 = vld [vmem:[%s5812_s7] ss:$0 sm:$0xff] }
 0x759   : > { %p3753_p1 = scmp.ne.s32.totalorder %s5816_s25, 2 }
 0x75a   : > { %s5817_s20 = sld [smem:[#allocation29_spill]] (!%p3753_p1)  ;;  %s5818_s16 = sld [smem:[#allocation30_spill]] (!%p3753_p1) }
 0x779   : > { %v2149_v14 = vpop.permute.xlu1 %2148 }
 0x77a   : > { %2164 = vst.msk [vmem:[#allocation4] sm:$0xf] %vm2163_vm11, %v2149_v14 }
 0x77b   : > { %v2151_v58 = vpop.permute.xlu0 %2150 }
 0x77c   : > { %2165 = vst.msk [vmem:[#allocation4 + $0x4] sm:$0xf] %vm2163_vm11, %v2151_v58 }
 0x77d   : > { %v1852_v4 = vpop.permute.xlu1 %1851 }
 0x77e   : > { %1865 = vst.msk [vmem:[#allocation4 + $0x8] sm:$0xf] %vm1862_vm10, %v1852_v4 }
 0x781   : > { %v1854_v29 = vpop.permute.xlu1 %1853 }
 0x782   : > { %1866 = vst.msk [vmem:[#allocation4 + $0xc] sm:$0xf] %vm1862_vm10, %v1854_v29 }
 0x785   : > { %v2153_v3 = vpop.permute.xlu1 %2152 }
 0x786   : > { %2166 = vst.msk [vmem:[#allocation4 + $0x8] sm:$0xf] %vm2163_vm11, %v2153_v3 }
 0x7b5   : > { %v2450_v56 = vpop.permute.xlu1 %2449 }
 0x7b6   : > { %2465 = vst.msk [vmem:[#allocation4] sm:$0xf] %vm2464_vm12, %v2450_v56 }
 0x7b9   : > { %v2452_v22 = vpop.permute.xlu1 %2451 }
 0x7ba   : > { %2466 = vst.msk [vmem:[#allocation4 + $0x4] sm:$0xf] %vm2464_vm12, %v2452_v22 }
 0x7bd   : > { %v2155_v54 = vpop.permute.xlu1 %2154  ;;  %v2454_v16 = vpop.permute.xlu0 %2453 }
 0x7be   : > { %2167 = vst.msk [vmem:[#allocation4 + $0xc] sm:$0xf] %vm2163_vm11, %v2155_v54 }
 0x7bf   : > { %2467 = vst.msk [vmem:[#allocation4 + $0x8] sm:$0xf] %vm2464_vm12, %v2454_v16 }
 0x7c1   : > { %v2456_v34 = vpop.permute.xlu1 %2455  ;;  %v1856_v51 = vpop.permute.xlu0 %1855  ;;  %v4240_v63 = vld [vmem:[#allocation4] sm:$0xff]  }
 0x7c2   : > { %2468 = vst.msk [vmem:[#allocation4 + $0xc] sm:$0xf] %vm2464_vm12, %v2456_v34  ;;  %4098 = vmatmul.mubr.bf16.vlgmr.msra.gmra.mrb[48].mxu0 %v4240_v63  ;;  %v4249_v63 = vld [vmem:[%s4758_s23 + $0x20] ss:$8 sps:$4 sm:$0xff]  }
 0x7c3   : > { %1868 = vst.msk [vmem:[#allocation4 + $0x10] sm:$0x1] %vm1867_vm13, %v1856_v51  ;;  %4101 = vmatprep.mubr.msk.bf16.mxu0 %vm4532_vm3, %v4530_v42  ;;  %v4251_v51 = vld [vmem:[%s4758_s23 + $0x24] ss:$8 sps:$4 sm:$0xff]  }
 0x7c4   : > { %2825 = vmatprep.subr.bf16.mxu1 %v4251_v51  ;;  %v4269_v51 = vld [vmem:[%s4768_s21 + $0x48] sm:$0xff]  }
 0x7c5   : > { %v2157_v49 = vpop.permute.xlu1 %2156  ;;  %v2458_v24 = vpop.permute.xlu0 %2457  ;;  %2826 = vmatpush1.bf16.msra.mxu1 %v4249_v63  ;;  %v4270_v63 = vld [vmem:[%s4768_s21 + $0x8] sm:$0xff]  }
 0x7c6   : > { %2169 = vst.msk [vmem:[#allocation4 + $0x10] sm:$0x1] %vm2168_vm14, %v2157_v49  ;;  %v4254_v49 = vld [vmem:[%s4758_s23 + $0x34] ss:$8 sps:$4 sm:$0xff]  }
 0x7c7   : > { %2470 = vst.msk [vmem:[#allocation4 + $0x10] sm:$0x1] %vm2469_vm15, %v2458_v24  ;;  %v4252_v24 = vld [vmem:[%s4758_s23 + $0x30] ss:$8 sps:$4 sm:$0xff]   ;;  %2827 = vmatprep.subr.bf16.mxu1 %v4254_v49 }
 0x7c8   : > { %v4273_v49 = vld [vmem:[%s4768_s21 + $0x58] sm:$0xff]  }
 0x7c9   : > { %v4241_v38 = vld [vmem:[#allocation4 + $0x8] sm:$0xff]   ;;  %2828 = vmatpush1.bf16.msra.mxu1 %v4252_v24  ;;  %v4274_v24 = vld [vmem:[%s4768_s21 + $0x18] sm:$0xff]  }
 0x7ca   : > { %4102 = vmatmul.mubr.bf16.gmra.mrb[52].mxu0 %v4241_v38  ;;  %v4257_v38 = vld [vmem:[%s4758_s23 + $0x44] ss:$8 sps:$4 sm:$0xff]  }
 0x7cb   : > { %4105 = vmatprep.mubr.msk.bf16.mxu0 %vm4532_vm3, %v4530_v42  ;;  %2829 = vmatprep.subr.bf16.mxu1 %v4257_v38  ;;  %v4275_v38 = vld [vmem:[%s4768_s21 + $0x60] sm:$0xff]  }
 0x7ce   : > { %v4242_v60 = vld [vmem:[#allocation4 + $0x10] ss:$0 sps:$4 sm:$0x11]  }
 0x7d2   : > { %4106 = vmatmul.mubr.bf16.gmra.mrb[56].mxu0 %v4242_v60  ;;  %v4255_v60 = vld [vmem:[%s4758_s23 + $0x40] ss:$8 sps:$4 sm:$0xff]  }
 0x7d3   : > { %2830 = vmatpush1.bf16.msra.mxu1 %v4255_v60  ;;  %v4276_v60 = vld [vmem:[%s4768_s21 + $0x20] sm:$0xff]  }
 0x895   : > { %v2590_v35 = vpop.f32.mrb[48].mxu0 }
 0x896   : > { %v2612_v28 = vadd.f32 %v4423_v26, %v2590_v35  ;;  %v4099_v47 = vpop.f32.mrb[49].mxu0  ;;  %v4260_v35 = vld [vmem:[%s4758_s23 + $0x54] ss:$8 sps:$4 sm:$0xff]   ;;  %v4261_v26 = vld [vmem:[%s4758_s23 + $0x60] ss:$8 sps:$4 sm:$0xff]  }
 0x897   : > { %v2593_v32 = vpop.f32.mrb[50].mxu0  ;;  %2831 = vmatprep.subr.bf16.mxu1 %v4260_v35  ;;  %v4264_v47 = vld [vmem:[%s4758_s23 + $0x70] ss:$8 sps:$4 sm:$0xff]   ;;  %v4277_v35 = vld [vmem:[%s4768_s21 + $0x68] sm:$0xff]  }
 0x898   : > { %v5371_v41 = vadd.f32 %v3717_v45, %v2612_v28  ;;  %v2613_v31 = vadd.f32 %v4424_v17, %v2593_v32  ;;  %v4100_v30 = vpop.f32.mrb[51].mxu0  ;;  %v4263_v28 = vld [vmem:[%s4758_s23 + $0x64] ss:$8 sps:$4 sm:$0xff]   ;;  %v4266_v32 = vld [vmem:[%s4758_s23 + $0x74] ss:$8 sps:$4 sm:$0xff]  }
 0x89a   : > { %v5373_v59 = vadd.f32 %v3717_v45, %v2613_v31  ;;  %2631 = vadd.xlane.f32.xlu1 %v5371_v41 }
 0x89c   : > { %2633 = vadd.xlane.f32.xlu0 %v5373_v59 }
 0x89d   : > { %v2598_v42 = vpop.f32.mrb[52].mxu0 }
 0x89e   : > { %v2614_v36 = vadd.f32 %v4425_v11, %v2598_v42  ;;  %v4103_v37 = vpop.f32.mrb[53].mxu0 }
 0x89f   : > { %v2601_v39 = vpop.f32.mrb[54].mxu0 }
 0x8a0   : > { %v5377_v50 = vadd.f32 %v3717_v45, %v2614_v36  ;;  %v2615_v46 = vadd.f32 %v4426_v9, %v2601_v39  ;;  %v4104_v48 = vpop.f32.mrb[55].mxu0 }
 0x8a2   : > { %v5379_v7 = vadd.f32 %v3717_v45, %v2615_v46  ;;  %2635 = vadd.xlane.f32.xlu0 %v5377_v50 }
 0x8a4   : > { %2637 = vadd.xlane.f32.xlu1 %v5379_v7 }
 0x8a5   : > { %v2606_v52 = vpop.f32.mrb[56].mxu0 }
 0x8a6   : > { %v2616_v55 = vadd.f32 %v4427_v53, %v2606_v52  ;;  %v4107_v57 = vpop.f32.mrb[57].mxu0 }
 0x8a7   : > { %v2609_v44 = vpop.f32.mrb[58].mxu0 }
 0x8a8   : > { %v5383_v25 = vadd.f32 %v3717_v45, %v2616_v55  ;;  %v4108_v62 = vpop.f32.mrb[59].mxu0  ;;  %v4258_v45 = vld [vmem:[%s4758_s23 + $0x50] ss:$8 sps:$4 sm:$0xff]   ;;  %v3718_v55 = vld [vmem:[%s5813_s29] ss:$0 sm:$0xff] }
 0x8a9   : > { %2832 = vmatpush1.bf16.msra.mxu1 %v4258_v45  ;;  %v4278_v45 = vld [vmem:[%s4768_s21 + $0x28] sm:$0xff]  }
 0x8aa   : > { %v2639_v6 = vsel %vm912_vm2, %v5383_v25, 0.0  ;;  %2833 = vmatprep.subr.bf16.mxu1 %v4263_v28  ;;  %v4280_v28 = vld [vmem:[%s4768_s21 + $0x30] sm:$0xff]  }
 0x8ab   : > { %2640 = vadd.xlane.f32.xlu0 %v2639_v6 }
 0x8ad   : > { %2834 = vmatpush1.bf16.msra.mxu1 %v4261_v26  ;;  %v4279_v26 = vld [vmem:[%s4768_s21 + $0x70] sm:$0xff]  }
 0x8ae   : > { %2835 = vmatprep.subr.bf16.mxu1 %v4266_v32  ;;  %v4282_v32 = vld [vmem:[%s4768_s21 + $0x38] sm:$0xff]  }
 0x8b1   : > { %2836 = vmatpush1.bf16.msra.mxu1 %v4264_v47  ;;  %v4281_v47 = vld [vmem:[%s4768_s21 + $0x78] sm:$0xff]  }
 0x927   : > { %v2632_v8 = vpop.xlane.xlu1 %2631 }
 0x928   : > { %v2642_v12 = vmul.f32 0.0078125, %v2632_v8 }
 0x929   : > { %v2634_v27 = vpop.xlane.xlu0 %2633 }
 0x92a   : > { %v5392_v33 = vsub.f32 %v5371_v41, %v2642_v12  ;;  %v2643_v15 = vmul.f32 0.0078125, %v2634_v27 }
 0x92c   : > { %v5395_v61 = vsub.f32 %v5373_v59, %v2643_v15  ;;  %v2652_v19 = vmul.f32 %v5392_v33, %v5392_v33 }
 0x92e   : > { %2657 = vadd.xlane.f32.xlu1 %v2652_v19  ;;  %v2653_v13 = vmul.f32 %v5395_v61, %v5395_v61 }
 0x92f   : > { %v2636_v21 = vpop.xlane.xlu0 %2635 }
 0x930   : > { %v2644_v23 = vmul.f32 0.0078125, %v2636_v21  ;;  %2659 = vadd.xlane.f32.xlu0 %v2653_v13 }
 0x931   : > { %v2638_v18 = vpop.xlane.xlu1 %2637 }
 0x932   : > { %v5402_v14 = vsub.f32 %v5377_v50, %v2644_v23  ;;  %v2645_v58 = vmul.f32 0.0078125, %v2638_v18 }
 0x934   : > { %v5405_v4 = vsub.f32 %v5379_v7, %v2645_v58  ;;  %v2654_v29 = vmul.f32 %v5402_v14, %v5402_v14 }
 0x936   : > { %2661 = vadd.xlane.f32.xlu1 %v2654_v29  ;;  %v2655_v3 = vmul.f32 %v5405_v4, %v5405_v4 }
 0x938   : > { %2663 = vadd.xlane.f32.xlu0 %v2655_v3  ;;  %v2641_v56 = vpop.xlane.xlu0 %2640 }
 0x939   : > { %v2646_v22 = vmul.f32 0.0078125, %v2641_v56 }
 0x93b   : > { %v5412_v54 = vsub.f32 %v5383_v25, %v2646_v22 }
 0x93d   : > { %v2656_v16 = vmul.f32 %v5412_v54, %v5412_v54 }
 0x93f   : > { %v2665_v34 = vsel %vm912_vm2, %v2656_v16, 0.0  ;;  %v4267_v16 = vld [vmem:[%s4768_s21 + $0x40] sm:$0xff]  }
 0x940   : > { %2666 = vadd.xlane.f32.xlu1 %v2665_v34  ;;  %v4268_v34 = vld [vmem:[%s4768_s21] sm:$0xff]   ;;  %3857 = vmatprep.subr.bf16.mxu0 %v4267_v16 }
 0x941   : > { %3858 = vmatpush3.bf16.msra.mxu0 %v4268_v34 }
 0x942   : > { %3859 = vmatprep.subr.bf16.mxu0 %v4269_v51 }
 0x945   : > { %3860 = vmatpush3.bf16.msra.mxu0 %v4270_v63 }
 0x9bb   : > { %v2658_v17 = vpop.xlane.xlu1 %2657 }
 0x9bc   : > { %v2668_v31 = vmul.f32 0.0078125, %v2658_v17  ;;  %v2729_v17 = vld [vmem:[%s4763_s1] sm:$0x3] }
 0x9bd   : > { %v2660_v30 = vpop.xlane.xlu0 %2659 }
 0x9be   : > { %v2673_v42 = vadd.f32 1e-05, %v2668_v31  ;;  %v2669_v11 = vmul.f32 0.0078125, %v2660_v30  ;;  %v5465_v31 = vrot.slane %v2729_v17, %v1024_v2  ;;  %v5469_v30 = vrot.slane %v2729_v17, %v1028_v5 }
 0x9c0   : > { %4373 = vrsqrt.f32 %v2673_v42  ;;  %v2674_v36 = vadd.f32 1e-05, %v2669_v11 }
 0x9c2   : > { %4375 = vrsqrt.f32 %v2674_v36 }
 0x9c3   : > { %v2662_v37 = vpop.xlane.xlu1 %2661 }
 0x9c4   : > { %v2670_v39 = vmul.f32 0.0078125, %v2662_v37 }
 0x9c5   : > { %v2664_v9 = vpop.xlane.xlu0 %2663 }
 0x9c6   : > { %v2675_v46 = vadd.f32 1e-05, %v2670_v39  ;;  %v2671_v48 = vmul.f32 0.0078125, %v2664_v9 }
 0x9c8   : > { %4377 = vrsqrt.f32 %v2675_v46  ;;  %v2676_v52 = vadd.f32 1e-05, %v2671_v48 }
 0x9ca   : > { %v4374_v53 = vpop.eup %4373  ;;  %4379 = vrsqrt.f32 %v2676_v52 }
 0x9cb   : > { %v2683_v57 = vmul.f32 %v4374_v53, %v5392_v33 }
 0x9cc   : > { %v4376_v44 = vpop.eup %4375 }
 0x9cd   : > { %v2694_v62 = vmul.f32 %v3718_v55, %v2683_v57  ;;  %v2684_v6 = vmul.f32 %v4376_v44, %v5395_v61  ;;  %v2667_v40 = vpop.xlane.xlu1 %2666 }
 0x9ce   : > { %v2672_v43 = vmul.f32 0.0078125, %v2667_v40 }
 0x9cf   : > { %v2695_v10 = vmul.f32 %v3718_v55, %v2684_v6  ;;  %v2705_v12 = vadd.f32 %v3719_v0, %v2694_v62 }
 0x9d0   : > { %v2677_v8 = vadd.f32 1e-05, %v2672_v43 }
 0x9d1   : > { %v2706_v27 = vadd.f32 %v3719_v0, %v2695_v10 }
 0x9d2   : > { %v4378_v15 = vpop.eup %4377  ;;  %4381 = vrsqrt.f32 %v2677_v8 }
 0x9d3   : > { %v2710_v19 = vpack.c.bf16 %v2706_v27, %v2705_v12  ;;  %v2685_v33 = vmul.f32 %v4378_v15, %v5402_v14 }
 0x9d4   : > { %v4380_v13 = vpop.eup %4379 }
 0x9d5   : > { %2854 = vmatmul.mubr.bf16.vlgmr.msra.gmra.mrb[72].mxu1 %v2710_v19  ;;  %v2686_v61 = vmul.f32 %v4380_v13, %v5405_v4  ;;  %v2696_v21 = vmul.f32 %v3718_v55, %v2685_v33 }
 0x9d6   : > { %2863 = vmatprep.mubr.bf16.mxu1 %v4531_v20 }
 0x9d7   : > { %v2697_v23 = vmul.f32 %v3718_v55, %v2686_v61  ;;  %v2707_v18 = vadd.f32 %v3719_v0, %v2696_v21 }
 0x9d9   : > { %v2708_v58 = vadd.f32 %v3719_v0, %v2697_v23 }
 0x9db   : > { %v2711_v29 = vpack.c.bf16 %v2708_v58, %v2707_v18 }
 0x9dc   : > { %v4382_v3 = vpop.eup %4381 }
 0x9dd   : > { %2864 = vmatmul.mubr.bf16.gmra.mrb[76].mxu1 %v2711_v29  ;;  %v2687_v14 = vmul.f32 %v4382_v3, %v5412_v54  ;;  %v4272_v54 = vld [vmem:[%s4768_s21 + $0x10] sm:$0xff]  }
 0x9de   : > { %2873 = vmatprep.mubr.bf16.mxu1 %v4531_v20  ;;  %v4271_v20 = vld [vmem:[%s4768_s21 + $0x50] sm:$0xff]  }
 0x9df   : > { %v2698_v56 = vmul.f32 %v3718_v55, %v2687_v14  ;;  %3861 = vmatprep.subr.bf16.mxu0 %v4271_v20 }
 0x9e0   : > { %3862 = vmatpush3.bf16.msra.mxu0 %v4272_v54 }
 0x9e1   : > { %v2709_v4 = vadd.f32 %v3719_v0, %v2698_v56  ;;  %3863 = vmatprep.subr.bf16.mxu0 %v4273_v49 }
 0x9e3   : > { %v2712_v22 = vpack.c.bf16 %v2709_v4, %v2709_v4 }
 0x9e4   : > { %3864 = vmatpush3.bf16.msra.mxu0 %v4274_v24 }
 0x9e5   : > { %2874 = vmatmul.mubr.bf16.gmra.mrb[80].mxu1 %v2712_v22  ;;  %3865 = vmatprep.subr.bf16.mxu0 %v4275_v38 }
 0x9e8   : > { %3866 = vmatpush3.bf16.msra.mxu0 %v4276_v60 }
 0x9e9   : > { %3867 = vmatprep.subr.bf16.mxu0 %v4277_v35 }
 0x9ec   : > { %3868 = vmatpush3.bf16.msra.mxu0 %v4278_v45 }
 0x9ed   : > { %3869 = vmatprep.subr.bf16.mxu0 %v4279_v26 }
 0x9f0   : > { %3870 = vmatpush3.bf16.msra.mxu0 %v4280_v28 }
 0x9f1   : > { %3871 = vmatprep.subr.bf16.mxu0 %v4281_v47 }
 0x9f4   : > { %3872 = vmatpush3.bf16.msra.mxu0 %v4282_v32 }
 0xaa8   : > { %v2855_v42 = vpop.f32.mrb[72].mxu1 }
 0xaa9   : > { %v5472_v11 = vadd.f32 %v2855_v42, %v5465_v31  ;;  %v2857_v36 = vpop.f32.mrb[73].mxu1 }
 0xaaa   : > { %v5475_v37 = vadd.f32 %v2857_v36, %v5469_v30  ;;  %v2859_v39 = vpop.f32.mrb[74].mxu1 }
 0xaab   : > { %v5478_v9 = vmul.f32 0.70710677, %v5472_v11  ;;  %v5481_v46 = vadd.f32 %v2859_v39, %v5465_v31  ;;  %v2861_v2 = vpop.f32.mrb[75].mxu1 }
 0xaac   : > { %v5484_v1 = vmul.f32 0.70710677, %v5475_v37  ;;  %v5487_v5 = vadd.f32 %v2861_v2, %v5469_v30 }
 0xaad   : > { %v2902_v48 = vand.u32 2147483647, %v5478_v9  ;;  %v5491_v52 = vmul.f32 0.70710677, %v5481_v46  ;;  %vm3102_vm0 = vcmp.lt.f32.partialorder %v5478_v9, 0.0 }
 0xaae   : > { %v2903_v53 = vand.u32 2147483647, %v5484_v1  ;;  %v5495_v55 = vmul.f32 0.70710677, %v5487_v5  ;;  %vm3103_vm1 = vcmp.lt.f32.partialorder %v5484_v1, 0.0 }
 0xaaf   : > { %v2912_v57 = vmul.f32 0.3275911, %v2902_v48  ;;  %v3042_v44 = vmul.f32 %v2902_v48, %v2902_v48  ;;  %v2904_v62 = vand.u32 2147483647, %v5491_v52  ;;  %vm3104_vm2 = vcmp.lt.f32.partialorder %v5491_v52, 0.0 }
 0xab0   : > { %v2913_v6 = vmul.f32 0.3275911, %v2903_v53  ;;  %v3043_v40 = vmul.f32 %v2903_v53, %v2903_v53  ;;  %v2905_v43 = vand.u32 2147483647, %v5495_v55  ;;  %v2865_v0 = vpop.f32.mrb[76].mxu1  ;;  %vm3105_vm3 = vcmp.lt.f32.partialorder %v5495_v55, 0.0 }
 0xab1   : > { %v2922_v10 = vadd.f32 1.0, %v2912_v57  ;;  %v2914_v8 = vmul.f32 0.3275911, %v2904_v62  ;;  %v3044_v12 = vmul.f32 %v2904_v62, %v2904_v62  ;;  %v2867_v27 = vpop.f32.mrb[77].mxu1  ;;  %v3052_v15 = vsub.f32 0.0, %v3042_v44 }
 0xab2   : > { %v2923_v19 = vadd.f32 1.0, %v2913_v6  ;;  %v2915_v33 = vmul.f32 0.3275911, %v2905_v43  ;;  %v2869_v13 = vpop.f32.mrb[78].mxu1  ;;  %v3053_v61 = vsub.f32 0.0, %v3043_v40  ;;  %v3045_v18 = vmul.f32 %v2905_v43, %v2905_v43 }
 0xab3   : > { %4383 = vrcp.f32 %v2922_v10  ;;  %v2924_v21 = vadd.f32 1.0, %v2914_v8  ;;  %v2871_v23 = vpop.f32.mrb[79].mxu1  ;;  %v3054_v58 = vsub.f32 0.0, %v3044_v12  ;;  %v5500_v3 = vadd.f32 %v2865_v0, %v5465_v31 }
 0xab4   : > { %4385 = vrcp.f32 %v2923_v19  ;;  %v2925_v29 = vadd.f32 1.0, %v2915_v33  ;;  %v5503_v14 = vadd.f32 %v2867_v27, %v5469_v30  ;;  %v3062_v56 = vmul.f32 1.442695, %v3052_v15 }
 0xab5   : > { %v5506_v4 = vadd.f32 %v2869_v13, %v5465_v31  ;;  %v3064_v22 = vmul.f32 1.442695, %v3053_v61  ;;  %4387 = vrcp.f32 %v2924_v21  ;;  %v5509_v16 = vmul.f32 0.70710677, %v5500_v3 }
 0xab6   : > { %v5512_v34 = vadd.f32 %v2871_v23, %v5469_v30  ;;  %v3055_v51 = vsub.f32 0.0, %v3045_v18  ;;  %v5515_v63 = vmul.f32 0.70710677, %v5503_v14  ;;  %v3066_v49 = vmul.f32 1.442695, %v3054_v58 }
 0xab7   : > { %v5518_v20 = vmul.f32 0.70710677, %v5506_v4  ;;  %4389 = vrcp.f32 %v2925_v29  ;;  %v2906_v24 = vand.u32 2147483647, %v5509_v16  ;;  %vm3106_vm4 = vcmp.lt.f32.partialorder %v5509_v16, 0.0 }
 0xab8   : > { %v2875_v54 = vpop.f32.mrb[80].mxu1  ;;  %4391 = vpow2.f32 %v3062_v56  ;;  %v2907_v60 = vand.u32 2147483647, %v5515_v63  ;;  %v5526_v47 = vmul.f32 0.70710677, %v5512_v34  ;;  %vm3107_vm7 = vcmp.lt.f32.partialorder %v5515_v63, 0.0 }
 0xab9   : > { %v5521_v38 = vpop.f32.mrb[81].mxu1  ;;  %v2908_v35 = vand.u32 2147483647, %v5518_v20  ;;  %4393 = vpow2.f32 %v3064_v22  ;;  %v2916_v26 = vmul.f32 0.3275911, %v2906_v24  ;;  %v3046_v28 = vmul.f32 %v2906_v24, %v2906_v24 }
 0xaba   : > { %v2879_v45 = vpop.f32.mrb[82].mxu1  ;;  %v3068_v17 = vmul.f32 1.442695, %v3055_v51  ;;  %v2917_v42 = vmul.f32 0.3275911, %v2907_v60  ;;  %v3047_v36 = vmul.f32 %v2907_v60, %v2907_v60  ;;  %4395 = vpow2.f32 %v3066_v49 }
 0xabb   : > { %v2880_v32 = vpop.f32.mrb[83].mxu1  ;;  %v2918_v39 = vmul.f32 0.3275911, %v2908_v35  ;;  %v2926_v48 = vadd.f32 1.0, %v2916_v26  ;;  %v3056_v53 = vsub.f32 0.0, %v3046_v28  ;;  %v3048_v57 = vmul.f32 %v2908_v35, %v2908_v35 }
 0xabc   : > { %v2909_v44 = vand.u32 2147483647, %v5526_v47  ;;  %v2927_v40 = vadd.f32 1.0, %v2917_v42  ;;  %v3057_v43 = vsub.f32 0.0, %v3047_v36  ;;  %v5543_v56 = vadd.f32 %v2875_v54, %v5465_v31 }
 0xabd   : > { %v5528_v2 = vpop.eup %4383  ;;  %4397 = vrcp.f32 %v2926_v48  ;;  %v2928_v10 = vadd.f32 1.0, %v2918_v39  ;;  %v3070_v12 = vmul.f32 1.442695, %v3056_v53  ;;  %v3058_v33 = vsub.f32 0.0, %v3048_v57 }
 0xabe   : > { %v5531_v62 = vpop.eup %4385  ;;  %v2952_v6 = vmul.f32 1.0614054, %v5528_v2  ;;  %4399 = vrcp.f32 %v2927_v40  ;;  %v2919_v27 = vmul.f32 0.3275911, %v2909_v44  ;;  %v3072_v21 = vmul.f32 1.442695, %v3057_v43 }
 0xabf   : > { %v2953_v0 = vmul.f32 1.0614054, %v5531_v62  ;;  %v5535_v15 = vpop.eup %4387  ;;  %4401 = vpow2.f32 %v3068_v17  ;;  %v3049_v29 = vmul.f32 %v2909_v44, %v2909_v44  ;;  %v5547_v35 = vmul.f32 0.5, %v5472_v11 }
 0xac0   : > { %v2962_v8 = vadd.f32 -1.4531521, %v2952_v6  ;;  %v2954_v61 = vmul.f32 1.0614054, %v5535_v15  ;;  %v2929_v23 = vadd.f32 1.0, %v2919_v27  ;;  %4403 = vrcp.f32 %v2928_v10 }
 0xac1   : > { %v2963_v19 = vadd.f32 -1.4531521, %v2953_v0  ;;  %v5539_v18 = vpop.eup %4389  ;;  %4405 = vpow2.f32 %v3070_v12  ;;  %v3074_v26 = vmul.f32 1.442695, %v3058_v33  ;;  %v5552_v31 = vmul.f32 0.70710677, %v5543_v56 }
 0xac2   : > { %v2972_v13 = vmul.f32 %v5528_v2, %v2962_v8  ;;  %v4392_v22 = vpop.eup %4391  ;;  %v2964_v49 = vadd.f32 -1.4531521, %v2954_v61  ;;  %v2955_v24 = vmul.f32 1.0614054, %v5539_v18  ;;  %4407 = vrcp.f32 %v2929_v23 }
 0xac3   : > { %v2973_v58 = vmul.f32 %v5531_v62, %v2963_v19  ;;  %v4394_v60 = vpop.eup %4393  ;;  %v5555_v54 = vmul.f32 0.5, %v5475_v37  ;;  %4409 = vpow2.f32 %v3072_v21  ;;  %v3059_v36 = vsub.f32 0.0, %v3049_v29 }
 0xac4   : > { %v2982_v51 = vadd.f32 1.4214138, %v2972_v13  ;;  %v2974_v32 = vmul.f32 %v5535_v15, %v2964_v49  ;;  %v2965_v17 = vadd.f32 -1.4531521, %v2955_v24  ;;  %v4396_v11 = vpop.eup %4395  ;;  %v5560_v57 = vand.u32 2147483647, %v5552_v31 }
 0xac5   : > { %v2983_v45 = vadd.f32 1.4214138, %v2973_v58  ;;  %v5565_v40 = vmul.f32 0.5, %v5481_v46  ;;  %v5568_v37 = vmul.f32 0.5, %v5487_v5  ;;  %4411 = vpow2.f32 %v3074_v26 }
 0xac6   : > { %v2992_v28 = vmul.f32 %v5528_v2, %v2982_v51  ;;  %v2984_v48 = vadd.f32 1.4214138, %v2974_v32  ;;  %v2975_v53 = vmul.f32 %v5539_v18, %v2965_v17  ;;  %v5577_v46 = vmul.f32 1.442695, %v3059_v36 }
 0xac7   : > { %v2993_v42 = vmul.f32 %v5531_v62, %v2983_v45  ;;  %v5562_v44 = vpop.eup %4397  ;;  %v2920_v5 = vmul.f32 0.3275911, %v5560_v57  ;;  %v5586_v24 = vadd.f32 %v5521_v38, %v5469_v30  ;;  %vm3108_vm6 = vcmp.lt.f32.partialorder %v5518_v20, 0.0 }
 0xac8   : > { %v3002_v39 = vadd.f32 -0.28449672, %v2992_v28  ;;  %v5570_v43 = vpop.eup %4399  ;;  %v2994_v10 = vmul.f32 %v5535_v15, %v2984_v48  ;;  %v2985_v8 = vadd.f32 1.4214138, %v2975_v53  ;;  %v2956_v12 = vmul.f32 1.0614054, %v5562_v44 }
 0xac9   : > { %v3003_v6 = vadd.f32 -0.28449672, %v2993_v42  ;;  %v4402_v27 = vpop.eup %4401  ;;  %v2957_v33 = vmul.f32 1.0614054, %v5570_v43  ;;  %v2930_v49 = vadd.f32 1.0, %v2920_v5  ;;  %vm3109_vm8 = vcmp.lt.f32.partialorder %v5526_v47, 0.0 }
 0xaca   : > { %v3012_v0 = vmul.f32 %v5528_v2, %v3002_v39  ;;  %v3004_v61 = vadd.f32 -0.28449672, %v2994_v10  ;;  %v2995_v21 = vmul.f32 %v5539_v18, %v2985_v8  ;;  %v2966_v23 = vadd.f32 -1.4531521, %v2956_v12  ;;  %v5581_v58 = vpop.eup %4403 }
 0xacb   : > { %v3013_v19 = vmul.f32 %v5531_v62, %v3003_v6  ;;  %v2967_v51 = vadd.f32 -1.4531521, %v2957_v33  ;;  %v5588_v45 = vpop.eup %4405  ;;  %v2958_v30 = vmul.f32 1.0614054, %v5581_v58  ;;  %4413 = vrcp.f32 %v2930_v49 }
 0xacc   : > { %v3022_v13 = vadd.f32 0.2548296, %v3012_v0  ;;  %v3014_v28 = vmul.f32 %v5535_v15, %v3004_v61  ;;  %v3005_v32 = vadd.f32 -0.28449672, %v2995_v21  ;;  %v2976_v17 = vmul.f32 %v5562_v44, %v2966_v23  ;;  %v5594_v42 = vpop.eup %4407 }
 0xacd   : > { %v3023_v29 = vadd.f32 0.2548296, %v3013_v19  ;;  %v2977_v39 = vmul.f32 %v5570_v43, %v2967_v51  ;;  %v4410_v6 = vpop.eup %4409  ;;  %v2968_v8 = vadd.f32 -1.4531521, %v2958_v30  ;;  %v2959_v12 = vmul.f32 1.0614054, %v5594_v42 }
 0xace   : > { %v3032_v26 = vmul.f32 %v5528_v2, %v3022_v13  ;;  %v3024_v48 = vadd.f32 0.2548296, %v3014_v28  ;;  %v3015_v2 = vmul.f32 %v5539_v18, %v3005_v32  ;;  %v2986_v53 = vadd.f32 1.4214138, %v2976_v17 }
 0xacf   : > { %v3033_v36 = vmul.f32 %v5531_v62, %v3023_v29  ;;  %v2987_v10 = vadd.f32 1.4214138, %v2977_v39  ;;  %v4412_v13 = vpop.eup %4411  ;;  %v2969_v21 = vadd.f32 -1.4531521, %v2959_v12  ;;  %4415 = vpow2.f32 %v5577_v46 }
 0xad0   : > { %v3082_v38 = vmul.f32 %v4392_v22, %v3032_v26  ;;  %v3034_v62 = vmul.f32 %v5535_v15, %v3024_v48  ;;  %v3025_v33 = vadd.f32 0.2548296, %v3015_v2  ;;  %v2996_v5 = vmul.f32 %v5562_v44, %v2986_v53 }
 0xad1   : > { %v3083_v0 = vmul.f32 %v4394_v60, %v3033_v36  ;;  %v2997_v61 = vmul.f32 %v5570_v43, %v2987_v10  ;;  %v2978_v60 = vmul.f32 %v5581_v58, %v2968_v8  ;;  %v2979_v32 = vmul.f32 %v5594_v42, %v2969_v21 }
 0xad2   : > { %v3092_v19 = vsub.f32 1.0, %v3082_v38  ;;  %v3084_v29 = vmul.f32 %v4396_v11, %v3034_v62  ;;  %v3035_v51 = vmul.f32 %v5539_v18, %v3025_v33  ;;  %v3006_v49 = vadd.f32 -0.28449672, %v2996_v5 }
 0xad3   : > { %v3093_v22 = vsub.f32 1.0, %v3083_v0  ;;  %v3007_v28 = vadd.f32 -0.28449672, %v2997_v61  ;;  %v2988_v15 = vadd.f32 1.4214138, %v2978_v60  ;;  %vm3110_vm9 = vcmp.lt.f32.partialorder %v5552_v31, 0.0 }
 0xad4   : > { %v3112_v23 = vsub.f32 0.0, %v3092_v19  ;;  %v3094_v36 = vsub.f32 1.0, %v3084_v29  ;;  %v3085_v39 = vmul.f32 %v4402_v27, %v3035_v51  ;;  %v3016_v30 = vmul.f32 %v5562_v44, %v3006_v49 }
 0xad5   : > { %v3113_v26 = vsub.f32 0.0, %v3093_v22  ;;  %v3017_v11 = vmul.f32 %v5570_v43, %v3007_v28  ;;  %v2998_v18 = vmul.f32 %v5581_v58, %v2988_v15  ;;  %v5617_v48 = vmul.f32 0.70710677, %v5586_v24  ;;  %v5619_v9 = vpop.eup %4413 }
 0xad6   : > { %v3122_v17 = vsel %vm3102_vm0, %v3112_v23, %v3092_v19  ;;  %v3114_v53 = vsub.f32 0.0, %v3094_v36  ;;  %v3095_v0 = vsub.f32 1.0, %v3085_v39  ;;  %v3026_v10 = vadd.f32 0.2548296, %v3016_v30 }
 0xad7   : > { %v3123_v38 = vsel %vm3103_vm1, %v3113_v26, %v3093_v22  ;;  %v3132_v2 = vadd.f32 1.0, %v3122_v17  ;;  %v3027_v8 = vadd.f32 0.2548296, %v3017_v11  ;;  %v3008_v27 = vadd.f32 -0.28449672, %v2998_v18 }
 0xad8   : > { %v2989_v12 = vadd.f32 1.4214138, %v2979_v32  ;;  %v3133_v1 = vadd.f32 1.0, %v3123_v38  ;;  %v3124_v19 = vsel %vm3104_vm2, %v3114_v53, %v3094_v36  ;;  %v3115_v62 = vsub.f32 0.0, %v3095_v0 }
 0xad9   : > { %v3036_v33 = vmul.f32 %v5562_v44, %v3026_v10  ;;  %v3134_v5 = vadd.f32 1.0, %v3124_v19  ;;  %v3037_v22 = vmul.f32 %v5570_v43, %v3027_v8  ;;  %v3018_v61 = vmul.f32 %v5581_v58, %v3008_v27 }
 0xada   : > { %v2999_v60 = vmul.f32 %v5594_v42, %v2989_v12  ;;  %v3142_v21 = vmul.f32 %v3132_v2, %v5547_v35  ;;  %v3125_v23 = vsel %vm3105_vm3, %v3115_v62, %v3095_v0  ;;  %v2911_v52 = vand.u32 2147483647, %v5617_v48 }
 0xadb   : > { %v3086_v46 = vmul.f32 %v5588_v45, %v3036_v33  ;;  %v3144_v29 = vmul.f32 %v3134_v5, %v5565_v40  ;;  %v3135_v51 = vadd.f32 1.0, %v3125_v23  ;;  %v3087_v44 = vmul.f32 %v4410_v6, %v3037_v22 }
 0xadc   : > { %v3028_v49 = vadd.f32 0.2548296, %v3018_v61  ;;  %v3009_v43 = vadd.f32 -0.28449672, %v2999_v60  ;;  %v3050_v28 = vmul.f32 %v5560_v57, %v5560_v57  ;;  %v2921_v15 = vmul.f32 0.3275911, %v2911_v52  ;;  %v4416_v57 = vpop.eup %4415 }
 0xadd   : > { %v3096_v26 = vsub.f32 1.0, %v3086_v46  ;;  %v3143_v35 = vmul.f32 %v3133_v1, %v5555_v54  ;;  %v3152_v32 = vpack.c.bf16 %v3144_v29, %v3142_v21  ;;  %v3145_v55 = vmul.f32 %v3135_v51, %v5568_v37 }
 0xade   : > { %v3038_v45 = vmul.f32 %v5581_v58, %v3028_v49  ;;  %v3097_v36 = vsub.f32 1.0, %v3087_v44  ;;  %v3019_v40 = vmul.f32 %v5594_v42, %v3009_v43  ;;  %v2931_v39 = vadd.f32 1.0, %v2921_v15 }
 0xadf   : > { %v3116_v17 = vsub.f32 0.0, %v3096_v26  ;;  %v3153_v30 = vpack.c.bf16 %v3145_v55, %v3143_v35  ;;  %v3060_v11 = vsub.f32 0.0, %v3050_v28  ;;  %v2960_v37 = vmul.f32 1.0614054, %v5619_v9 }
 0xae0   : > { %v3088_v6 = vmul.f32 %v4412_v13, %v3038_v45  ;;  %v3029_v38 = vadd.f32 0.2548296, %v3019_v40  ;;  %4417 = vrcp.f32 %v2931_v39  ;;  %v3117_v2 = vsub.f32 0.0, %v3097_v36 }
 0xae1   : > { %v3126_v18 = vsel %vm3106_vm4, %v3116_v17, %v3096_v26  ;;  %3318 = vmatprep.mubr.bf16.mxu0 %v3153_v30  ;;  %v2886_v53 = vmul.f32 0.5, %v5500_v3  ;;  %v2970_v13 = vadd.f32 -1.4531521, %v2960_v37  ;;  %v3078_v8 = vmul.f32 1.442695, %v3060_v11 }
 0xae2   : > { %v3098_v54 = vsub.f32 1.0, %v3088_v6  ;;  %v3039_v58 = vmul.f32 %v5594_v42, %v3029_v38  ;;  %3319 = vmatmul.mubr.bf16.vlgmr.msra.gmra.mrb[60].mxu0 %v3152_v32  ;;  %v3136_v10 = vadd.f32 1.0, %v3126_v18  ;;  %v2888_v27 = vmul.f32 0.5, %v5506_v4 }
 0xae3   : > { %v2980_v1 = vmul.f32 %v5619_v9, %v2970_v13  ;;  %v3127_v19 = vsel %vm3107_vm7, %v3117_v2, %v3097_v36  ;;  %v3051_v33 = vmul.f32 %v2911_v52, %v2911_v52  ;;  %4419 = vpow2.f32 %v3078_v8 }
 0xae4   : > { %v3118_v0 = vsub.f32 0.0, %v3098_v54  ;;  %v3089_v16 = vmul.f32 %v4416_v57, %v3039_v58  ;;  %v3146_v3 = vmul.f32 %v3136_v10, %v2886_v53  ;;  %v3137_v60 = vadd.f32 1.0, %v3127_v19 }
 0xae5   : > { %v2990_v5 = vadd.f32 1.4214138, %v2980_v1  ;;  %v2887_v4 = vmul.f32 0.5, %v5503_v14  ;;  %v3061_v23 = vsub.f32 0.0, %v3051_v33  ;;  %v2889_v29 = vmul.f32 0.5, %v5512_v34 }
 0xae6   : > { %v3128_v12 = vsel %vm3108_vm6, %v3118_v0, %v3098_v54  ;;  %v3099_v42 = vsub.f32 1.0, %v3089_v16  ;;  %vm3111_vm10 = vcmp.lt.f32.partialorder %v5617_v48, 0.0  ;;  %v2891_v53 = vmul.f32 0.5, %v5586_v24  ;;  %v3752_v48 = vld [vmem:[%s783_s27] ss:$0 sm:$0xff] }
 0xae7   : > { %v3138_v62 = vadd.f32 1.0, %v3128_v12  ;;  %v3000_v20 = vmul.f32 %v5619_v9, %v2990_v5  ;;  %v3147_v49 = vmul.f32 %v3137_v60, %v2887_v4  ;;  %v3080_v15 = vmul.f32 1.442695, %v3061_v23 }
 0xae8   : > { %v3119_v61 = vsub.f32 0.0, %v3099_v42 }
 0xae9   : > { %v3148_v22 = vmul.f32 %v3138_v62, %v2888_v27  ;;  %v3010_v44 = vadd.f32 -0.28449672, %v3000_v20  ;;  %4421 = vpow2.f32 %v3080_v15 }
 0xaea   : > { %v4418_v63 = vpop.eup %4417  ;;  %v3129_v21 = vsel %vm3109_vm8, %v3119_v61, %v3099_v42 }
 0xaeb   : > { %v3154_v46 = vpack.c.bf16 %v3148_v22, %v3146_v3  ;;  %v3139_v51 = vadd.f32 1.0, %v3129_v21  ;;  %v2961_v52 = vmul.f32 1.0614054, %v4418_v63  ;;  %v3020_v28 = vmul.f32 %v5619_v9, %v3010_v44 }
 0xaed   : > { %v3149_v26 = vmul.f32 %v3139_v51, %v2889_v29  ;;  %v2971_v43 = vadd.f32 -1.4531521, %v2961_v52  ;;  %v3030_v32 = vadd.f32 0.2548296, %v3020_v28  ;;  %v4420_v45 = vpop.eup %4419 }
 0xaef   : > { %v3155_v47 = vpack.c.bf16 %v3149_v26, %v3147_v49  ;;  %v2981_v35 = vmul.f32 %v4418_v63, %v2971_v43  ;;  %v3040_v14 = vmul.f32 %v5619_v9, %v3030_v32  ;;  %v2890_v9 = vmul.f32 0.5, %v5543_v56 }
 0xaf1   : > { %3326 = vmatprep.mubr.bf16.mxu0 %v3155_v47  ;;  %v2991_v55 = vadd.f32 1.4214138, %v2981_v35  ;;  %v3090_v17 = vmul.f32 %v4420_v45, %v3040_v14 }
 0xaf2   : > { %3327 = vmatmul.mubr.bf16.gmra.mrb[64].mxu0 %v3154_v46 }
 0xaf3   : > { %v3001_v34 = vmul.f32 %v4418_v63, %v2991_v55  ;;  %v3100_v40 = vsub.f32 1.0, %v3090_v17  ;;  %v4422_v11 = vpop.eup %4421 }
 0xaf5   : > { %v3011_v36 = vadd.f32 -0.28449672, %v3001_v34  ;;  %v3120_v30 = vsub.f32 0.0, %v3100_v40 }
 0xaf7   : > { %v3021_v39 = vmul.f32 %v4418_v63, %v3011_v36  ;;  %v3130_v18 = vsel %vm3110_vm9, %v3120_v30, %v3100_v40 }
 0xaf8   : > { %v3140_v2 = vadd.f32 1.0, %v3130_v18 }
 0xaf9   : > { %v3031_v6 = vadd.f32 0.2548296, %v3021_v39 }
 0xafa   : > { %v3150_v13 = vmul.f32 %v3140_v2, %v2890_v9 }
 0xafb   : > { %v3041_v38 = vmul.f32 %v4418_v63, %v3031_v6 }
 0xafc   : > { %v3156_v8 = vpack.c.bf16 %v3150_v13, %v3150_v13 }
 0xafd   : > { %v3091_v57 = vmul.f32 %v4422_v11, %v3041_v38  ;;  %v3368_v38 = vld [vmem:[%s5817_s20] sm:$0x1] (!%p3753_p1) }
 0xaff   : > { %v3101_v54 = vsub.f32 1.0, %v3091_v57  ;;  %v3369_v57 = vld [vmem:[%s5818_s16] sm:$0x1] (!%p3753_p1) }
 0xb01   : > { %v3121_v37 = vsub.f32 0.0, %v3101_v54 }
 0xb03   : > { %v3131_v58 = vsel %vm3111_vm10, %v3121_v37, %v3101_v54 }
 0xb04   : > { %v3141_v0 = vadd.f32 1.0, %v3131_v58 }
 0xb06   : > { %v3151_v10 = vmul.f32 %v3141_v0, %v2891_v53 }
 0xb08   : > { %v3157_v16 = vpack.c.bf16 %v3151_v10, %v3151_v10 }
 0xb0a   : > { %3334 = vmatprep.mubr.bf16.mxu0 %v3157_v16 }
 0xb0b   : > { %3335 = vmatmul.mubr.bf16.gmra.mrb[68].mxu0 %v3156_v8 }
 0xbb5   : > { %v3873_v31 = vpop.f32.mrb[60].mxu0 }
 0xbb6   : > { %v3874_v27 = vpop.f32.mrb[61].mxu0 }
 0xbb7   : > { %v3875_v12 = vadd.f32 %v3874_v27, %v3873_v31  ;;  %v3876_v1 = vpop.f32.mrb[62].mxu0 }
 0xbb8   : > { %v3877_v56 = vpop.f32.mrb[63].mxu0 }
 0xbb9   : > { %v3342_v19 = vadd.f32 %v3875_v12, %v5371_v41  ;;  %v3878_v24 = vadd.f32 %v3877_v56, %v3876_v1 }
 0xbbb   : > { %v3354_v62 = vadd.f32 %v3752_v48, %v3342_v19  ;;  %v3343_v42 = vadd.f32 %v3878_v24, %v5373_v59 }
 0xbbd   : > { %3359 = vst [vmem:[#allocation2] sm:$0xff] %v3354_v62  ;;  %v3355_v33 = vadd.f32 %v3752_v48, %v3343_v42 }
 0xbbf   : > { %3360 = vst [vmem:[#allocation2 + $0x8] sm:$0xff] %v3355_v33 }
 0xbc5   : > { %v3879_v5 = vpop.f32.mrb[64].mxu0 }
 0xbc6   : > { %v3880_v3 = vpop.f32.mrb[65].mxu0 }
 0xbc7   : > { %v3881_v22 = vadd.f32 %v3880_v3, %v3879_v5  ;;  %v3882_v61 = vpop.f32.mrb[66].mxu0 }
 0xbc8   : > { %v3883_v60 = vpop.f32.mrb[67].mxu0 }
 0xbc9   : > { %v3344_v20 = vadd.f32 %v3881_v22, %v5377_v50  ;;  %v3884_v63 = vadd.f32 %v3883_v60, %v3882_v61  ;;  %v3370_v50 = vld [vmem:[#allocation2] sm:$0x1] (!%p3753_p1) }
 0xbca   : > { %v3371_v26 = vsel (!%p3753_p1), %vm1480_vm5, %v3370_v50, 0.0 }
 0xbcb   : > { %v3356_v4 = vadd.f32 %v3752_v48, %v3344_v20  ;;  %v3345_v21 = vadd.f32 %v3884_v63, %v5379_v7  ;;  %3372 = vadd.xlane.f32.xlu0 (!%p3753_p1), %v3371_v26 }
 0xbcd   : > { %3361 = vst [vmem:[#allocation2 + $0x10] sm:$0xff] %v3356_v4  ;;  %v3357_v41 = vadd.f32 %v3752_v48, %v3345_v21 }
 0xbcf   : > { %3362 = vst [vmem:[#allocation2 + $0x18] sm:$0xff] %v3357_v41 }
 0xbd4   : > { %v3387_v49 = vld [vmem:[#allocation2 + $0x11] sm:$0x1] (!%p3753_p1) }
 0xbd5   : > { %v3388_v7 = vsel (!%p3753_p1), %vm1480_vm5, %v3387_v49, 0.0 }
 0xbd6   : > { %3389 = vadd.xlane.f32.xlu0 (!%p3753_p1), %v3388_v7 }
 0xbde   : > { %v3885_v23 = vpop.f32.mrb[68].mxu0 }
 0xbdf   : > { %v3886_v46 = vpop.f32.mrb[69].mxu0 }
 0xbe0   : > { %v3887_v59 = vadd.f32 %v3886_v46, %v3885_v23  ;;  %v3888_v29 = vpop.f32.mrb[70].mxu0  ;;  %3367 = sbr.rel (%p3753_p1) target bundleno = 3343 (0xd0f), region = 100 }
 0xbe1   : > { %v3889_v51 = vpop.f32.mrb[71].mxu0 }
 0xbe2   : > { %v3346_v52 = vadd.f32 %v3887_v59, %v5383_v25 }
 0xbe4   : > { %v3358_v44 = vadd.f32 %v3752_v48, %v3346_v52 }
 0xbe6   : > { %3363 = vst [vmem:[#allocation2 + $0x20] sm:$0x3] %v3358_v44 }
 0xc58   : > { %v3373_v43 = vpop.xlane.xlu0 %3372 }
 0xc59   : > { %v3374_v28 = vmul.f32 0.0078125, %v3373_v43 }
 0xc5b   : > { %v3375_v15 = vsub.f32 %v3370_v50, %v3374_v28 }
 0xc5d   : > { %v3376_v32 = vmul.f32 %v3375_v15, %v3375_v15 }
 0xc5f   : > { %v3377_v55 = vsel %vm1480_vm5, %v3376_v32, 0.0 }
 0xc60   : > { %3378 = vadd.xlane.f32.xlu1 %v3377_v55 }
 0xc63   : > { %v3390_v47 = vpop.xlane.xlu0 %3389 }
 0xc64   : > { %v3391_v35 = vmul.f32 0.0078125, %v3390_v47 }
 0xc66   : > { %v3392_v25 = vsub.f32 %v3387_v49, %v3391_v35 }
 0xc68   : > { %v3393_v14 = vmul.f32 %v3392_v25, %v3392_v25 }
 0xc6a   : > { %v3394_v45 = vsel %vm1480_vm5, %v3393_v14, 0.0 }
 0xc6b   : > { %3395 = vadd.xlane.f32.xlu1 %v3394_v45 }
 0xced   : > { %v3379_v34 = vpop.xlane.xlu1 %3378 }
 0xcee   : > { %v3380_v17 = vmul.f32 0.0078125, %v3379_v34 }
 0xcf0   : > { %v3381_v36 = vadd.f32 1e-05, %v3380_v17 }
 0xcf2   : > { %4428 = vrsqrt.f32 %v3381_v36 }
 0xcf8   : > { %v3396_v40 = vpop.xlane.xlu1 %3395 }
 0xcf9   : > { %v3397_v39 = vmul.f32 0.0078125, %v3396_v40 }
 0xcfb   : > { %v3398_v6 = vadd.f32 1e-05, %v3397_v39 }
 0xcfc   : > { %v4429_v30 = vpop.eup %4428 }
 0xcfd   : > { %4430 = vrsqrt.f32 %v3398_v6  ;;  %v3383_v11 = vmul.f32 %v4429_v30, %v3375_v15 }
 0xcff   : > { %v3384_v18 = vmul.f32 %v3383_v11, %v3368_v38 }
 0xd01   : > { %v3385_v37 = vadd.f32 %v3384_v18, %v3369_v57 }
 0xd03   : > { %3386 = vst [vmem:[%s4774_s30] sm:$0x1] %v3385_v37 }
 0xd07   : > { %v4431_v54 = vpop.eup %4430 }
 0xd08   : > { %v3400_v2 = vmul.f32 %v4431_v54, %v3392_v25 }
 0xd0a   : > { %v3401_v9 = vmul.f32 %v3400_v2, %v3368_v38 }
 0xd0c   : > { %v3402_v58 = vadd.f32 %v3401_v9, %v3369_v57 }
 0xd0e   : > { %3403 = vst [vmem:[%s4774_s30 + $0x1] sm:$0x1] %v3402_v58 }
 0xd0f PF: > { %s5819_s24 = sld [smem:[#allocation12_spill]]  ;;  %s5820_s0 = sld [smem:[#allocation9_spill]] }
 0xd10   : > { %s5822_s28 = sld [smem:[#allocation31_spill]]  ;;  %s3418_s2 = sshll.u32 %s4774_s30, 4  ;;  %s3419_s2 = int_to_ptr.vmem [resolvable:$true] %s3418_s2 }
 0xd11   : > { %s4432_s25 = scalar_lea.vmem %s3419_s2, 32  ;;  %s4536_s27 = smov [#allocation5]  }
 0xd12   : > { %p4433_p2 = scmp.ne.s32.totalorder %s3419_s2, %s4432_s25  ;;  %s4436_s18 = sshll.u32 %s4536_s27, 4  ;;  %s4437_s18 = int_to_ptr.vmem [resolvable:$false] %s4436_s18 }
 0xd13   : > { %s4438_s20 = scalar_lea.vmem %s4437_s18, 64  ;;  %p4439_p6 = scmp.lt.s32.totalorder %s3419_s2, %s4437_s18 }
 0xd14   : > { %p4434_p4 = pnand %p4433_p2, %p4681_p3  ;;  %p4440_p7 = scmp.lt.s32.totalorder %s4438_s20, %s4432_s25 }
 0xd15   : > { %s3755_s23 = sshll.u32 %s5819_s24, 5  ;;  %s5824_s1 = sand.u32 1, %s5820_s0  }
 0xd16   : > { %s5823_s22 = smov %s5822_s28  ;;  %s5685_s19 = scalar_lea.hbm %s5822_s28, %s3755_s23 }
 0xd17   : > { %s3405_s21 = scalar_lea.sflag [#allocation6], %s5824_s1  ;;  %p4435_p5 = pneg %p4434_p4 }
 0xd18   : > { %p4441_p8 = por %p4440_p7, %p4439_p6 }
 0xd1a   : > { %p4442_p10 = pnand %p4441_p8, %p4435_p5 }
 0xd1c   : > { %4445 = shalt.err (!%p4442_p10)
}
 0xd1d   : > { %s4446_s30 = scalar_lea.hbm %s5685_s19, 32  ;;  %s4450_s16 = scalar_lea.hbm %s5823_s22, 64 }
 0xd1e   : > { %p4447_p11 = scmp.ne.s32.totalorder %s5685_s19, %s4446_s30  ;;  %p4451_p0 = scmp.lt.u32.totalorder %s5685_s19, %s5823_s22 }
 0xd1f   : > { %p4452_p1 = scmp.lt.u32.totalorder %s4450_s16, %s4446_s30  ;;  %p4454_p4 = scmp.lt.u32.totalorder %s4446_s30, %s5685_s19 }
 0xd20   : > { %p4448_p12 = pnand %p4447_p11, %p4681_p3 }
 0xd21   : > { %p4453_p2 = por %p4452_p1, %p4451_p0 }
 0xd22   : > { %p4449_p13 = pneg %p4448_p12 }
 0xd23   : > { %p4455_p5 = por %p4454_p4, %p4453_p2 }
 0xd25   : > { %p4456_p6 = pnand %p4455_p5, %p4449_p13 }
 0xd27   : > { %4459 = shalt.err (!%p4456_p6)
}
 0xd28   : > { %4118 = dma.vmem_to_hbm [thread:$0]  (%p4681_p3), %s3419_s2, 32, %s5685_s19, %s3405_s21  }
 0xd29 PF: > { %s5825_s23 = sld [smem:[#allocation15_spill]]  ;;  %s5826_s4 = sld [smem:[#allocation8_spill]] }
 0xd2f   : > { %p4124_p7 = scmp.ge.s32.totalorder %s5825_s23, 2  ;;  %s3430_s28 = sand.u32 1, %s5826_s4  }
 0xd30   : > { %s3431_s1 = scalar_lea.sflag [#allocation6], %s3430_s28 }
 0xd31   : > { %p4121_p8 = pnand %p4124_p7, %p4691_p9 }
 0xd33   : > { %4493 = dma.done.wait (!%p4121_p8), %s3431_s1, 32  }
 0xd34   : > { %4495 = vsyncadd (!%p4121_p8), %s3431_s1, 4294967264  ;;  %s31_s20 = sadd.s32 1, %s5825_s23   ;;  %s5828_s27 = sld [smem:[#allocation9_spill]] }
 0xd35   : > { %p28_p10 = scmp.ge.s32.totalorder %s31_s20, 8   ;;  %s5829_s28 = sld [smem:[#allocation10_spill]] }
 0xd36   : > { %s5830_s29 = sld [smem:[#allocation20_spill]]  ;;  %s5831_s30 = sld [smem:[#allocation13_spill]] }
 0xd37   : > { %s5832_s0 = sld [smem:[#allocation14_spill]]  ;;  %s5833_s19 = sld [smem:[#allocation16_spill]] }
 0xd38   : > { %s5834_s1 = sld [smem:[#allocation18_spill]]  ;;  %30 = sbr.rel (!%p28_p10) target bundleno = 17 (0x11), region = 171 }
 0xd3f   :  { %3436 = vsyncpa [#allocation6], 1 }
 0xd40   :  { %3438 = vsyncpa [#allocation6 + $0x1], 1 }

</bundles_post_ra>
